<compile_context>
chip_gen: v7x
topology: tpu7x:2x2x1
jax: 0.10.0
libtpu: 0.0.40
codegen_flags: <defaults>
</compile_context>

<pallas_src>
import functools

import jax
import jax.numpy as jnp
from jax.experimental import pallas as pl
from jax.experimental.pallas import tpu as pltpu


def _gelu_tanh(y):
    # TODO(synk): PyTorch nn.GELU() default is the exact erf formulation; we use
    # the tanh approximation (guaranteed Mosaic lowering via EUP tanh), max
    # difference vs torch is ~1e-3.
    c = 0.7978845608028654  # sqrt(2/pi)
    return 0.5 * y * (1.0 + jnp.tanh(c * (y + 0.044715 * y * y * y)))


def residual_block_kernel(x_ref, w_ref, bias_ref, scale_ref, shift_ref,
                          out_ref, xpad_ref, *, K, H, W, TH, PADL):
    """One (batch, channel-tile) block per grid step.

    x_ref    : (1, H, W, TC)              input block (read once; also residual)
    w_ref    : (K, K, TC)                 depthwise conv weights
    bias_ref : (1, TC)                    conv bias
    scale_ref: (1, TC)                    folded BN scale = gamma/sqrt(var+eps)
    shift_ref: (1, TC)                    folded BN shift = beta - mean*scale
    out_ref  : (1, H, W, TC)
    xpad_ref : (1, H+K-1, PADL+W+p, TC)   VMEM scratch: zero-padded copy
    """
    p = (K - 1) // 2
    TC = x_ref.shape[-1]

    # Build the "same"-padded block in VMEM: zero fill + interior copy.
    # PADL is p rounded up to a multiple of 8 so the interior *store* starts on
    # a sublane boundary; only the tap *reads* are sublane-unaligned.
    xpad_ref[...] = jnp.zeros_like(xpad_ref)
    xpad_ref[:, p:p + H, PADL:PADL + W, :] = x_ref[...]

    # Hoist per-channel parameter loads / casts / broadcasts out of the tap loop.
    w_taps = [[w_ref[kh, kw, :].astype(jnp.float32) for kw in range(K)]
              for kh in range(K)]
    bias = bias_ref[...].astype(jnp.float32)
    scale = scale_ref[...].astype(jnp.float32)
    shift = shift_ref[...].astype(jnp.float32)

    # Row-chunked tap loop: the f32 accumulator covers only TH rows (~<=32
    # vregs) so it stays register-resident instead of spilling through VMEM.
    for h0 in range(0, H, TH):
        th = min(TH, H - h0)
        acc = jnp.zeros((1, th, W, TC), jnp.float32)
        for kh in range(K):
            for kw in range(K):
                c0 = PADL - p + kw
                window = xpad_ref[:, h0 + kh:h0 + kh + th, c0:c0 + W, :]
                acc = acc + window.astype(jnp.float32) * w_taps[kh][kw]
        y = _gelu_tanh(acc + bias)
        y = y * scale + shift
        y = y + x_ref[:, h0:h0 + th, :, :].astype(jnp.float32)   # residual add
        out_ref[:, h0:h0 + th, :, :] = y.astype(out_ref.dtype)


def _pick_channel_tile(C, H, W, K, itemsize, budget=12 << 20):
    """Largest multiple-of-128 divisor of C whose working set (padded scratch +
    double-buffered in/out blocks) fits a conservative VMEM budget, so the same
    choice is safe on v5e/v6e (128 MiB) and v7x (64 MiB)."""
    if C % 128 != 0:
        return C                      # small C: one full-channel lane tile
    p = K // 2
    Hp = H + 2 * p
    Wp = ((p + 7) // 8) * 8 + W + p
    best = 128
    tc = 128
    while tc <= C:
        if C % tc == 0:
            work = (Hp * Wp + 4 * H * W) * tc * itemsize
            if work <= budget:
                best = tc
        tc += 128
    return best


def _pick_row_tile(H, W, TC, vreg_budget=32):
    """Rows per accumulator chunk so the f32 accumulator stays <=~32 vregs."""
    vregs_per_row = ((W + 7) // 8) * ((TC + 127) // 128)
    return max(1, min(H, vreg_budget // max(1, vregs_per_row)))


def residual_convmixer_block(x_nchw, weight, bias, gamma, beta, running_mean,
                             running_var, *, eps=1e-5, channel_tile=None):
    """x_nchw: (N, C, H, W).  weight: (C, 1, K, K) (PyTorch depthwise layout)."""
    N, C, H, W = x_nchw.shape
    K = weight.shape[-1]
    assert K % 2 == 1, "odd kernel size required for 'same' padding"
    p = (K - 1) // 2
    pad_left = ((p + 7) // 8) * 8          # sublane-aligned interior column offset
    Hp = H + 2 * p
    Wp = pad_left + W + p

    # ---- glue (plain JAX): layout conversion + BN folding (eval mode) ----
    x = jnp.transpose(x_nchw, (0, 2, 3, 1))                  # NHWC
    w = jnp.transpose(weight[:, 0, :, :], (1, 2, 0))         # (K, K, C)
    scale = gamma / jnp.sqrt(running_var + eps)
    shift = beta - running_mean * scale
    bias2 = bias.reshape(1, C)
    scale2 = scale.reshape(1, C)
    shift2 = shift.reshape(1, C)

    TC = (channel_tile if channel_tile is not None
          else _pick_channel_tile(C, H, W, K, x.dtype.itemsize))
    assert C % TC == 0 and (TC == C or TC % 128 == 0)
    num_ct = C // TC
    TH = _pick_row_tile(H, W, TC)

    kern = functools.partial(residual_block_kernel, K=K, H=H, W=W, TH=TH,
                             PADL=pad_left)

    out_nhwc = pl.pallas_call(
        kern,
        out_shape=jax.ShapeDtypeStruct((N, H, W, C), x.dtype),
        grid_spec=pltpu.PrefetchScalarGridSpec(
            num_scalar_prefetch=0,
            grid=(N, num_ct),
            in_specs=[
                pl.BlockSpec((1, H, W, TC), lambda b, c: (b, 0, 0, c)),
                pl.BlockSpec((K, K, TC), lambda b, c: (0, 0, c)),
                pl.BlockSpec((1, TC), lambda b, c: (0, c)),
                pl.BlockSpec((1, TC), lambda b, c: (0, c)),
                pl.BlockSpec((1, TC), lambda b, c: (0, c)),
            ],
            out_specs=pl.BlockSpec((1, H, W, TC), lambda b, c: (b, 0, 0, c)),
            scratch_shapes=[pltpu.VMEM((1, Hp, Wp, TC), x.dtype)],
        ),
        compiler_params=pltpu.CompilerParams(
            dimension_semantics=("parallel", "parallel")),
    )(x, w, bias2, scale2, shift2)

    return jnp.transpose(out_nhwc, (0, 3, 1, 2))             # back to NCHW


def _reference(x_nchw, weight, bias, gamma, beta, running_mean, running_var,
               eps=1e-5):
    """Pure-JAX reference of fn(x) + x (same GELU approximation)."""
    N, C, H, W = x_nchw.shape
    K = weight.shape[-1]
    p = (K - 1) // 2
    x = jnp.transpose(x_nchw, (0, 2, 3, 1))
    xpad = jnp.pad(x, ((0, 0), (p, p), (p, p), (0, 0)))
    w = jnp.transpose(weight[:, 0, :, :], (1, 2, 0))
    acc = jnp.zeros_like(x)
    for kh in range(K):
        for kw in range(K):
            acc = acc + xpad[:, kh:kh + H, kw:kw + W, :] * w[kh, kw, :]
    y = acc + bias
    y = _gelu_tanh(y)
    scale = gamma / jnp.sqrt(running_var + eps)
    shift = beta - running_mean * scale
    y = y * scale + shift
    return jnp.transpose(y + x, (0, 3, 1, 2))


def _make_inputs(key, N, C, H, W, K):
    kx, kw, kb, kg, kbe, km, kv = jax.random.split(key, 7)
    x = jax.random.normal(kx, (N, C, H, W), jnp.float32)
    weight = jax.random.normal(kw, (C, 1, K, K), jnp.float32) * 0.1  # depthwise
    bias = jax.random.normal(kb, (C,), jnp.float32) * 0.1
    gamma = 1.0 + 0.1 * jax.random.normal(kg, (C,), jnp.float32)
    beta = 0.1 * jax.random.normal(kbe, (C,), jnp.float32)
    running_mean = 0.1 * jax.random.normal(km, (C,), jnp.float32)
    running_var = jnp.abs(1.0 + 0.1 * jax.random.normal(kv, (C,), jnp.float32))
    return x, weight, bias, gamma, beta, running_mean, running_var


if __name__ == "__main__":
    key = jax.random.PRNGKey(0)
    k1, k2 = jax.random.split(key)

    # Case 1: small channel count (C < 128 -> full-C lane tile), K=5.
    args1 = _make_inputs(k1, 2, 8, 16, 16, 5)
    out1 = jax.block_until_ready(residual_convmixer_block(*args1))
    ref1 = _reference(*args1)
    assert out1.shape == (2, 8, 16, 16)
    assert jnp.allclose(out1, ref1, atol=1e-5, rtol=1e-5)

    # Case 2: lane-dense channels with a 2-tile channel grid axis, K=3.
    args2 = _make_inputs(k2, 2, 256, 16, 16, 3)
    out2 = jax.block_until_ready(
        residual_convmixer_block(*args2, channel_tile=128))
    ref2 = _reference(*args2)
    assert out2.shape == (2, 256, 16, 16)
    assert jnp.allclose(out2, ref2, atol=1e-5, rtol=1e-5)

    print("KERNEL_OK")
</pallas_src>

<mosaic_0001>
module attributes {stable_mosaic.version = 11 : i64} {
  func.func @residual_block_kernel(%arg0: i32, %arg1: i32, %arg2: memref<1x16x16x8xf32, #tpu.memory_space<vmem>>, %arg3: memref<5x5x8xf32, #tpu.memory_space<vmem>>, %arg4: memref<1x8xf32, #tpu.memory_space<vmem>>, %arg5: memref<1x8xf32, #tpu.memory_space<vmem>>, %arg6: memref<1x8xf32, #tpu.memory_space<vmem>>, %arg7: memref<1x16x16x8xf32, #tpu.memory_space<vmem>>, %arg8: memref<1x20x26x8xf32, #tpu.memory_space<vmem>>) attributes {dimension_semantics = [#tpu.dimension_semantics<parallel>, #tpu.dimension_semantics<parallel>], iteration_bounds = array<i64: 2, 1>, scalar_prefetch = 0 : i64, scratch_operands = 1 : i64, tpu.core_type = #tpu.core_type<tc>, window_params = [{transform_indices = @transform_0, window_bounds = array<i64: 1, 16, 16, 8>}, {transform_indices = @transform_1, window_bounds = array<i64: 5, 5, 8>}, {transform_indices = @transform_2, window_bounds = array<i64: 1, 8>}, {transform_indices = @transform_3, window_bounds = array<i64: 1, 8>}, {transform_indices = @transform_4, window_bounds = array<i64: 1, 8>}, {transform_indices = @transform_5, window_bounds = array<i64: 1, 16, 16, 8>}]} {
    %cst = arith.constant 0.000000e+00 : f32
    %0 = vector.broadcast %cst : f32 to vector<1x20x26x8xf32>
    %c0 = arith.constant 0 : index
    %c0_0 = arith.constant 0 : index
    %c0_1 = arith.constant 0 : index
    %c0_2 = arith.constant 0 : index
    %1 = vector.load %arg8[%c0, %c0_0, %c0_1, %c0_2] : memref<1x20x26x8xf32, #tpu.memory_space<vmem>>, vector<1x20x26x8xf32>
    tpu.vector_store %arg8[%c0, %c0_0, %c0_1, %c0_2], %0 {strides = array<i32>} : memref<1x20x26x8xf32, #tpu.memory_space<vmem>>, vector<1x20x26x8xf32>,
    %c0_3 = arith.constant 0 : index
    %c0_4 = arith.constant 0 : index
    %c0_5 = arith.constant 0 : index
    %c0_6 = arith.constant 0 : index
    %2 = vector.load %arg2[%c0_3, %c0_4, %c0_5, %c0_6] : memref<1x16x16x8xf32, #tpu.memory_space<vmem>>, vector<1x16x16x8xf32>
    %c0_7 = arith.constant 0 : index
    %c2 = arith.constant 2 : index
    %c8 = arith.constant 8 : index
    %c0_8 = arith.constant 0 : index
    %3 = vector.load %arg8[%c0_7, %c2, %c8, %c0_8] : memref<1x20x26x8xf32, #tpu.memory_space<vmem>>, vector<1x16x16x8xf32>
    tpu.vector_store %arg8[%c0_7, %c2, %c8, %c0_8], %2 {strides = array<i32>} : memref<1x20x26x8xf32, #tpu.memory_space<vmem>>, vector<1x16x16x8xf32>,
    %c0_9 = arith.constant 0 : index
    %c0_10 = arith.constant 0 : index
    %c0_11 = arith.constant 0 : index
    %4 = vector.load %arg3[%c0_9, %c0_10, %c0_11] : memref<5x5x8xf32, #tpu.memory_space<vmem>>, vector<1x1x8xf32>
    %5 = vector.shape_cast %4 : vector<1x1x8xf32> to vector<8xf32>
    %c0_12 = arith.constant 0 : index
    %c1 = arith.constant 1 : index
    %c0_13 = arith.constant 0 : index
    %6 = vector.load %arg3[%c0_12, %c1, %c0_13] : memref<5x5x8xf32, #tpu.memory_space<vmem>>, vector<1x1x8xf32>
    %7 = vector.shape_cast %6 : vector<1x1x8xf32> to vector<8xf32>
    %c0_14 = arith.constant 0 : index
    %c2_15 = arith.constant 2 : index
    %c0_16 = arith.constant 0 : index
    %8 = vector.load %arg3[%c0_14, %c2_15, %c0_16] : memref<5x5x8xf32, #tpu.memory_space<vmem>>, vector<1x1x8xf32>
    %9 = vector.shape_cast %8 : vector<1x1x8xf32> to vector<8xf32>
    %c0_17 = arith.constant 0 : index
    %c3 = arith.constant 3 : index
    %c0_18 = arith.constant 0 : index
    %10 = vector.load %arg3[%c0_17, %c3, %c0_18] : memref<5x5x8xf32, #tpu.memory_space<vmem>>, vector<1x1x8xf32>
    %11 = vector.shape_cast %10 : vector<1x1x8xf32> to vector<8xf32>
    %c0_19 = arith.constant 0 : index
    %c4 = arith.constant 4 : index
    %c0_20 = arith.constant 0 : index
    %12 = vector.load %arg3[%c0_19, %c4, %c0_20] : memref<5x5x8xf32, #tpu.memory_space<vmem>>, vector<1x1x8xf32>
    %13 = vector.shape_cast %12 : vector<1x1x8xf32> to vector<8xf32>
    %c1_21 = arith.constant 1 : index
    %c0_22 = arith.constant 0 : index
    %c0_23 = arith.constant 0 : index
    %14 = vector.load %arg3[%c1_21, %c0_22, %c0_23] : memref<5x5x8xf32, #tpu.memory_space<vmem>>, vector<1x1x8xf32>
    %15 = vector.shape_cast %14 : vector<1x1x8xf32> to vector<8xf32>
    %c1_24 = arith.constant 1 : index
    %c1_25 = arith.constant 1 : index
    %c0_26 = arith.constant 0 : index
    %16 = vector.load %arg3[%c1_24, %c1_25, %c0_26] : memref<5x5x8xf32, #tpu.memory_space<vmem>>, vector<1x1x8xf32>
    %17 = vector.shape_cast %16 : vector<1x1x8xf32> to vector<8xf32>
    %c1_27 = arith.constant 1 : index
    %c2_28 = arith.constant 2 : index
    %c0_29 = arith.constant 0 : index
    %18 = vector.load %arg3[%c1_27, %c2_28, %c0_29] : memref<5x5x8xf32, #tpu.memory_space<vmem>>, vector<1x1x8xf32>
    %19 = vector.shape_cast %18 : vector<1x1x8xf32> to vector<8xf32>
    %c1_30 = arith.constant 1 : index
    %c3_31 = arith.constant 3 : index
    %c0_32 = arith.constant 0 : index
    %20 = vector.load %arg3[%c1_30, %c3_31, %c0_32] : memref<5x5x8xf32, #tpu.memory_space<vmem>>, vector<1x1x8xf32>
    %21 = vector.shape_cast %20 : vector<1x1x8xf32> to vector<8xf32>
    %c1_33 = arith.constant 1 : index
    %c4_34 = arith.constant 4 : index
    %c0_35 = arith.constant 0 : index
    %22 = vector.load %arg3[%c1_33, %c4_34, %c0_35] : memref<5x5x8xf32, #tpu.memory_space<vmem>>, vector<1x1x8xf32>
    %23 = vector.shape_cast %22 : vector<1x1x8xf32> to vector<8xf32>
    %c2_36 = arith.constant 2 : index
    %c0_37 = arith.constant 0 : index
    %c0_38 = arith.constant 0 : index
    %24 = vector.load %arg3[%c2_36, %c0_37, %c0_38] : memref<5x5x8xf32, #tpu.memory_space<vmem>>, vector<1x1x8xf32>
    %25 = vector.shape_cast %24 : vector<1x1x8xf32> to vector<8xf32>
    %c2_39 = arith.constant 2 : index
    %c1_40 = arith.constant 1 : index
    %c0_41 = arith.constant 0 : index
    %26 = vector.load %arg3[%c2_39, %c1_40, %c0_41] : memref<5x5x8xf32, #tpu.memory_space<vmem>>, vector<1x1x8xf32>
    %27 = vector.shape_cast %26 : vector<1x1x8xf32> to vector<8xf32>
    %c2_42 = arith.constant 2 : index
    %c2_43 = arith.constant 2 : index
    %c0_44 = arith.constant 0 : index
    %28 = vector.load %arg3[%c2_42, %c2_43, %c0_44] : memref<5x5x8xf32, #tpu.memory_space<vmem>>, vector<1x1x8xf32>
    %29 = vector.shape_cast %28 : vector<1x1x8xf32> to vector<8xf32>
    %c2_45 = arith.constant 2 : index
    %c3_46 = arith.constant 3 : index
    %c0_47 = arith.constant 0 : index
    %30 = vector.load %arg3[%c2_45, %c3_46, %c0_47] : memref<5x5x8xf32, #tpu.memory_space<vmem>>, vector<1x1x8xf32>
    %31 = vector.shape_cast %30 : vector<1x1x8xf32> to vector<8xf32>
    %c2_48 = arith.constant 2 : index
    %c4_49 = arith.constant 4 : index
    %c0_50 = arith.constant 0 : index
    %32 = vector.load %arg3[%c2_48, %c4_49, %c0_50] : memref<5x5x8xf32, #tpu.memory_space<vmem>>, vector<1x1x8xf32>
    %33 = vector.shape_cast %32 : vector<1x1x8xf32> to vector<8xf32>
    %c3_51 = arith.constant 3 : index
    %c0_52 = arith.constant 0 : index
    %c0_53 = arith.constant 0 : index
    %34 = vector.load %arg3[%c3_51, %c0_52, %c0_53] : memref<5x5x8xf32, #tpu.memory_space<vmem>>, vector<1x1x8xf32>
    %35 = vector.shape_cast %34 : vector<1x1x8xf32> to vector<8xf32>
    %c3_54 = arith.constant 3 : index
    %c1_55 = arith.constant 1 : index
    %c0_56 = arith.constant 0 : index
    %36 = vector.load %arg3[%c3_54, %c1_55, %c0_56] : memref<5x5x8xf32, #tpu.memory_space<vmem>>, vector<1x1x8xf32>
    %37 = vector.shape_cast %36 : vector<1x1x8xf32> to vector<8xf32>
    %c3_57 = arith.constant 3 : index
    %c2_58 = arith.constant 2 : index
    %c0_59 = arith.constant 0 : index
    %38 = vector.load %arg3[%c3_57, %c2_58, %c0_59] : memref<5x5x8xf32, #tpu.memory_space<vmem>>, vector<1x1x8xf32>
    %39 = vector.shape_cast %38 : vector<1x1x8xf32> to vector<8xf32>
    %c3_60 = arith.constant 3 : index
    %c3_61 = arith.constant 3 : index
    %c0_62 = arith.constant 0 : index
    %40 = vector.load %arg3[%c3_60, %c3_61, %c0_62] : memref<5x5x8xf32, #tpu.memory_space<vmem>>, vector<1x1x8xf32>
    %41 = vector.shape_cast %40 : vector<1x1x8xf32> to vector<8xf32>
    %c3_63 = arith.constant 3 : index
    %c4_64 = arith.constant 4 : index
    %c0_65 = arith.constant 0 : index
    %42 = vector.load %arg3[%c3_63, %c4_64, %c0_65] : memref<5x5x8xf32, #tpu.memory_space<vmem>>, vector<1x1x8xf32>
    %43 = vector.shape_cast %42 : vector<1x1x8xf32> to vector<8xf32>
    %c4_66 = arith.constant 4 : index
    %c0_67 = arith.constant 0 : index
    %c0_68 = arith.constant 0 : index
    %44 = vector.load %arg3[%c4_66, %c0_67, %c0_68] : memref<5x5x8xf32, #tpu.memory_space<vmem>>, vector<1x1x8xf32>
    %45 = vector.shape_cast %44 : vector<1x1x8xf32> to vector<8xf32>
    %c4_69 = arith.constant 4 : index
    %c1_70 = arith.constant 1 : index
    %c0_71 = arith.constant 0 : index
    %46 = vector.load %arg3[%c4_69, %c1_70, %c0_71] : memref<5x5x8xf32, #tpu.memory_space<vmem>>, vector<1x1x8xf32>
    %47 = vector.shape_cast %46 : vector<1x1x8xf32> to vector<8xf32>
    %c4_72 = arith.constant 4 : index
    %c2_73 = arith.constant 2 : index
    %c0_74 = arith.constant 0 : index
    %48 = vector.load %arg3[%c4_72, %c2_73, %c0_74] : memref<5x5x8xf32, #tpu.memory_space<vmem>>, vector<1x1x8xf32>
    %49 = vector.shape_cast %48 : vector<1x1x8xf32> to vector<8xf32>
    %c4_75 = arith.constant 4 : index
    %c3_76 = arith.constant 3 : index
    %c0_77 = arith.constant 0 : index
    %50 = vector.load %arg3[%c4_75, %c3_76, %c0_77] : memref<5x5x8xf32, #tpu.memory_space<vmem>>, vector<1x1x8xf32>
    %51 = vector.shape_cast %50 : vector<1x1x8xf32> to vector<8xf32>
    %c4_78 = arith.constant 4 : index
    %c4_79 = arith.constant 4 : index
    %c0_80 = arith.constant 0 : index
    %52 = vector.load %arg3[%c4_78, %c4_79, %c0_80] : memref<5x5x8xf32, #tpu.memory_space<vmem>>, vector<1x1x8xf32>
    %53 = vector.shape_cast %52 : vector<1x1x8xf32> to vector<8xf32>
    %c0_81 = arith.constant 0 : index
    %c0_82 = arith.constant 0 : index
    %54 = vector.load %arg4[%c0_81, %c0_82] : memref<1x8xf32, #tpu.memory_space<vmem>>, vector<1x8xf32>
    %c0_83 = arith.constant 0 : index
    %c0_84 = arith.constant 0 : index
    %55 = vector.load %arg5[%c0_83, %c0_84] : memref<1x8xf32, #tpu.memory_space<vmem>>, vector<1x8xf32>
    %c0_85 = arith.constant 0 : index
    %c0_86 = arith.constant 0 : index
    %56 = vector.load %arg6[%c0_85, %c0_86] : memref<1x8xf32, #tpu.memory_space<vmem>>, vector<1x8xf32>
    %cst_87 = arith.constant 0.000000e+00 : f32
    %57 = vector.broadcast %cst_87 : f32 to vector<1x16x16x8xf32>
    %c0_88 = arith.constant 0 : index
    %c0_89 = arith.constant 0 : index
    %c6 = arith.constant 6 : index
    %c0_90 = arith.constant 0 : index
    %58 = vector.load %arg8[%c0_88, %c0_89, %c6, %c0_90] : memref<1x20x26x8xf32, #tpu.memory_space<vmem>>, vector<1x16x16x8xf32>
    %59 = vector.shape_cast %5 : vector<8xf32> to vector<1x1x1x8xf32>
    %60 = vector.broadcast %59 : vector<1x1x1x8xf32> to vector<1x16x16x8xf32>
    %61 = arith.mulf %58, %60 : vector<1x16x16x8xf32>
    %62 = arith.addf %57, %61 : vector<1x16x16x8xf32>
    %c0_91 = arith.constant 0 : index
    %c0_92 = arith.constant 0 : index
    %c7 = arith.constant 7 : index
    %c0_93 = arith.constant 0 : index
    %63 = vector.load %arg8[%c0_91, %c0_92, %c7, %c0_93] : memref<1x20x26x8xf32, #tpu.memory_space<vmem>>, vector<1x16x16x8xf32>
    %64 = vector.shape_cast %7 : vector<8xf32> to vector<1x1x1x8xf32>
    %65 = vector.broadcast %64 : vector<1x1x1x8xf32> to vector<1x16x16x8xf32>
    %66 = arith.mulf %63, %65 : vector<1x16x16x8xf32>
    %67 = arith.addf %62, %66 : vector<1x16x16x8xf32>
    %c0_94 = arith.constant 0 : index
    %c0_95 = arith.constant 0 : index
    %c8_96 = arith.constant 8 : index
    %c0_97 = arith.constant 0 : index
    %68 = vector.load %arg8[%c0_94, %c0_95, %c8_96, %c0_97] : memref<1x20x26x8xf32, #tpu.memory_space<vmem>>, vector<1x16x16x8xf32>
    %69 = vector.shape_cast %9 : vector<8xf32> to vector<1x1x1x8xf32>
    %70 = vector.broadcast %69 : vector<1x1x1x8xf32> to vector<1x16x16x8xf32>
    %71 = arith.mulf %68, %70 : vector<1x16x16x8xf32>
    %72 = arith.addf %67, %71 : vector<1x16x16x8xf32>
    %c0_98 = arith.constant 0 : index
    %c0_99 = arith.constant 0 : index
    %c9 = arith.constant 9 : index
    %c0_100 = arith.constant 0 : index
    %73 = vector.load %arg8[%c0_98, %c0_99, %c9, %c0_100] : memref<1x20x26x8xf32, #tpu.memory_space<vmem>>, vector<1x16x16x8xf32>
    %74 = vector.shape_cast %11 : vector<8xf32> to vector<1x1x1x8xf32>
    %75 = vector.broadcast %74 : vector<1x1x1x8xf32> to vector<1x16x16x8xf32>
    %76 = arith.mulf %73, %75 : vector<1x16x16x8xf32>
    %77 = arith.addf %72, %76 : vector<1x16x16x8xf32>
    %c0_101 = arith.constant 0 : index
    %c0_102 = arith.constant 0 : index
    %c10 = arith.constant 10 : index
    %c0_103 = arith.constant 0 : index
    %78 = vector.load %arg8[%c0_101, %c0_102, %c10, %c0_103] : memref<1x20x26x8xf32, #tpu.memory_space<vmem>>, vector<1x16x16x8xf32>
    %79 = vector.shape_cast %13 : vector<8xf32> to vector<1x1x1x8xf32>
    %80 = vector.broadcast %79 : vector<1x1x1x8xf32> to vector<1x16x16x8xf32>
    %81 = arith.mulf %78, %80 : vector<1x16x16x8xf32>
    %82 = arith.addf %77, %81 : vector<1x16x16x8xf32>
    %c0_104 = arith.constant 0 : index
    %c1_105 = arith.constant 1 : index
    %c6_106 = arith.constant 6 : index
    %c0_107 = arith.constant 0 : index
    %83 = vector.load %arg8[%c0_104, %c1_105, %c6_106, %c0_107] : memref<1x20x26x8xf32, #tpu.memory_space<vmem>>, vector<1x16x16x8xf32>
    %84 = vector.shape_cast %15 : vector<8xf32> to vector<1x1x1x8xf32>
    %85 = vector.broadcast %84 : vector<1x1x1x8xf32> to vector<1x16x16x8xf32>
    %86 = arith.mulf %83, %85 : vector<1x16x16x8xf32>
    %87 = arith.addf %82, %86 : vector<1x16x16x8xf32>
    %c0_108 = arith.constant 0 : index
    %c1_109 = arith.constant 1 : index
    %c7_110 = arith.constant 7 : index
    %c0_111 = arith.constant 0 : index
    %88 = vector.load %arg8[%c0_108, %c1_109, %c7_110, %c0_111] : memref<1x20x26x8xf32, #tpu.memory_space<vmem>>, vector<1x16x16x8xf32>
    %89 = vector.shape_cast %17 : vector<8xf32> to vector<1x1x1x8xf32>
    %90 = vector.broadcast %89 : vector<1x1x1x8xf32> to vector<1x16x16x8xf32>
    %91 = arith.mulf %88, %90 : vector<1x16x16x8xf32>
    %92 = arith.addf %87, %91 : vector<1x16x16x8xf32>
    %c0_112 = arith.constant 0 : index
    %c1_113 = arith.constant 1 : index
    %c8_114 = arith.constant 8 : index
    %c0_115 = arith.constant 0 : index
    %93 = vector.load %arg8[%c0_112, %c1_113, %c8_114, %c0_115] : memref<1x20x26x8xf32, #tpu.memory_space<vmem>>, vector<1x16x16x8xf32>
    %94 = vector.shape_cast %19 : vector<8xf32> to vector<1x1x1x8xf32>
    %95 = vector.broadcast %94 : vector<1x1x1x8xf32> to vector<1x16x16x8xf32>
    %96 = arith.mulf %93, %95 : vector<1x16x16x8xf32>
    %97 = arith.addf %92, %96 : vector<1x16x16x8xf32>
    %c0_116 = arith.constant 0 : index
    %c1_117 = arith.constant 1 : index
    %c9_118 = arith.constant 9 : index
    %c0_119 = arith.constant 0 : index
    %98 = vector.load %arg8[%c0_116, %c1_117, %c9_118, %c0_119] : memref<1x20x26x8xf32, #tpu.memory_space<vmem>>, vector<1x16x16x8xf32>
    %99 = vector.shape_cast %21 : vector<8xf32> to vector<1x1x1x8xf32>
    %100 = vector.broadcast %99 : vector<1x1x1x8xf32> to vector<1x16x16x8xf32>
    %101 = arith.mulf %98, %100 : vector<1x16x16x8xf32>
    %102 = arith.addf %97, %101 : vector<1x16x16x8xf32>
    %c0_120 = arith.constant 0 : index
    %c1_121 = arith.constant 1 : index
    %c10_122 = arith.constant 10 : index
    %c0_123 = arith.constant 0 : index
    %103 = vector.load %arg8[%c0_120, %c1_121, %c10_122, %c0_123] : memref<1x20x26x8xf32, #tpu.memory_space<vmem>>, vector<1x16x16x8xf32>
    %104 = vector.shape_cast %23 : vector<8xf32> to vector<1x1x1x8xf32>
    %105 = vector.broadcast %104 : vector<1x1x1x8xf32> to vector<1x16x16x8xf32>
    %106 = arith.mulf %103, %105 : vector<1x16x16x8xf32>
    %107 = arith.addf %102, %106 : vector<1x16x16x8xf32>
    %c0_124 = arith.constant 0 : index
    %c2_125 = arith.constant 2 : index
    %c6_126 = arith.constant 6 : index
    %c0_127 = arith.constant 0 : index
    %108 = vector.load %arg8[%c0_124, %c2_125, %c6_126, %c0_127] : memref<1x20x26x8xf32, #tpu.memory_space<vmem>>, vector<1x16x16x8xf32>
    %109 = vector.shape_cast %25 : vector<8xf32> to vector<1x1x1x8xf32>
    %110 = vector.broadcast %109 : vector<1x1x1x8xf32> to vector<1x16x16x8xf32>
    %111 = arith.mulf %108, %110 : vector<1x16x16x8xf32>
    %112 = arith.addf %107, %111 : vector<1x16x16x8xf32>
    %c0_128 = arith.constant 0 : index
    %c2_129 = arith.constant 2 : index
    %c7_130 = arith.constant 7 : index
    %c0_131 = arith.constant 0 : index
    %113 = vector.load %arg8[%c0_128, %c2_129, %c7_130, %c0_131] : memref<1x20x26x8xf32, #tpu.memory_space<vmem>>, vector<1x16x16x8xf32>
    %114 = vector.shape_cast %27 : vector<8xf32> to vector<1x1x1x8xf32>
    %115 = vector.broadcast %114 : vector<1x1x1x8xf32> to vector<1x16x16x8xf32>
    %116 = arith.mulf %113, %115 : vector<1x16x16x8xf32>
    %117 = arith.addf %112, %116 : vector<1x16x16x8xf32>
    %c0_132 = arith.constant 0 : index
    %c2_133 = arith.constant 2 : index
    %c8_134 = arith.constant 8 : index
    %c0_135 = arith.constant 0 : index
    %118 = vector.load %arg8[%c0_132, %c2_133, %c8_134, %c0_135] : memref<1x20x26x8xf32, #tpu.memory_space<vmem>>, vector<1x16x16x8xf32>
    %119 = vector.shape_cast %29 : vector<8xf32> to vector<1x1x1x8xf32>
    %120 = vector.broadcast %119 : vector<1x1x1x8xf32> to vector<1x16x16x8xf32>
    %121 = arith.mulf %118, %120 : vector<1x16x16x8xf32>
    %122 = arith.addf %117, %121 : vector<1x16x16x8xf32>
    %c0_136 = arith.constant 0 : index
    %c2_137 = arith.constant 2 : index
    %c9_138 = arith.constant 9 : index
    %c0_139 = arith.constant 0 : index
    %123 = vector.load %arg8[%c0_136, %c2_137, %c9_138, %c0_139] : memref<1x20x26x8xf32, #tpu.memory_space<vmem>>, vector<1x16x16x8xf32>
    %124 = vector.shape_cast %31 : vector<8xf32> to vector<1x1x1x8xf32>
    %125 = vector.broadcast %124 : vector<1x1x1x8xf32> to vector<1x16x16x8xf32>
    %126 = arith.mulf %123, %125 : vector<1x16x16x8xf32>
    %127 = arith.addf %122, %126 : vector<1x16x16x8xf32>
    %c0_140 = arith.constant 0 : index
    %c2_141 = arith.constant 2 : index
    %c10_142 = arith.constant 10 : index
    %c0_143 = arith.constant 0 : index
    %128 = vector.load %arg8[%c0_140, %c2_141, %c10_142, %c0_143] : memref<1x20x26x8xf32, #tpu.memory_space<vmem>>, vector<1x16x16x8xf32>
    %129 = vector.shape_cast %33 : vector<8xf32> to vector<1x1x1x8xf32>
    %130 = vector.broadcast %129 : vector<1x1x1x8xf32> to vector<1x16x16x8xf32>
    %131 = arith.mulf %128, %130 : vector<1x16x16x8xf32>
    %132 = arith.addf %127, %131 : vector<1x16x16x8xf32>
    %c0_144 = arith.constant 0 : index
    %c3_145 = arith.constant 3 : index
    %c6_146 = arith.constant 6 : index
    %c0_147 = arith.constant 0 : index
    %133 = vector.load %arg8[%c0_144, %c3_145, %c6_146, %c0_147] : memref<1x20x26x8xf32, #tpu.memory_space<vmem>>, vector<1x16x16x8xf32>
    %134 = vector.shape_cast %35 : vector<8xf32> to vector<1x1x1x8xf32>
    %135 = vector.broadcast %134 : vector<1x1x1x8xf32> to vector<1x16x16x8xf32>
    %136 = arith.mulf %133, %135 : vector<1x16x16x8xf32>
    %137 = arith.addf %132, %136 : vector<1x16x16x8xf32>
    %c0_148 = arith.constant 0 : index
    %c3_149 = arith.constant 3 : index
    %c7_150 = arith.constant 7 : index
    %c0_151 = arith.constant 0 : index
    %138 = vector.load %arg8[%c0_148, %c3_149, %c7_150, %c0_151] : memref<1x20x26x8xf32, #tpu.memory_space<vmem>>, vector<1x16x16x8xf32>
    %139 = vector.shape_cast %37 : vector<8xf32> to vector<1x1x1x8xf32>
    %140 = vector.broadcast %139 : vector<1x1x1x8xf32> to vector<1x16x16x8xf32>
    %141 = arith.mulf %138, %140 : vector<1x16x16x8xf32>
    %142 = arith.addf %137, %141 : vector<1x16x16x8xf32>
    %c0_152 = arith.constant 0 : index
    %c3_153 = arith.constant 3 : index
    %c8_154 = arith.constant 8 : index
    %c0_155 = arith.constant 0 : index
    %143 = vector.load %arg8[%c0_152, %c3_153, %c8_154, %c0_155] : memref<1x20x26x8xf32, #tpu.memory_space<vmem>>, vector<1x16x16x8xf32>
    %144 = vector.shape_cast %39 : vector<8xf32> to vector<1x1x1x8xf32>
    %145 = vector.broadcast %144 : vector<1x1x1x8xf32> to vector<1x16x16x8xf32>
    %146 = arith.mulf %143, %145 : vector<1x16x16x8xf32>
    %147 = arith.addf %142, %146 : vector<1x16x16x8xf32>
    %c0_156 = arith.constant 0 : index
    %c3_157 = arith.constant 3 : index
    %c9_158 = arith.constant 9 : index
    %c0_159 = arith.constant 0 : index
    %148 = vector.load %arg8[%c0_156, %c3_157, %c9_158, %c0_159] : memref<1x20x26x8xf32, #tpu.memory_space<vmem>>, vector<1x16x16x8xf32>
    %149 = vector.shape_cast %41 : vector<8xf32> to vector<1x1x1x8xf32>
    %150 = vector.broadcast %149 : vector<1x1x1x8xf32> to vector<1x16x16x8xf32>
    %151 = arith.mulf %148, %150 : vector<1x16x16x8xf32>
    %152 = arith.addf %147, %151 : vector<1x16x16x8xf32>
    %c0_160 = arith.constant 0 : index
    %c3_161 = arith.constant 3 : index
    %c10_162 = arith.constant 10 : index
    %c0_163 = arith.constant 0 : index
    %153 = vector.load %arg8[%c0_160, %c3_161, %c10_162, %c0_163] : memref<1x20x26x8xf32, #tpu.memory_space<vmem>>, vector<1x16x16x8xf32>
    %154 = vector.shape_cast %43 : vector<8xf32> to vector<1x1x1x8xf32>
    %155 = vector.broadcast %154 : vector<1x1x1x8xf32> to vector<1x16x16x8xf32>
    %156 = arith.mulf %153, %155 : vector<1x16x16x8xf32>
    %157 = arith.addf %152, %156 : vector<1x16x16x8xf32>
    %c0_164 = arith.constant 0 : index
    %c4_165 = arith.constant 4 : index
    %c6_166 = arith.constant 6 : index
    %c0_167 = arith.constant 0 : index
    %158 = vector.load %arg8[%c0_164, %c4_165, %c6_166, %c0_167] : memref<1x20x26x8xf32, #tpu.memory_space<vmem>>, vector<1x16x16x8xf32>
    %159 = vector.shape_cast %45 : vector<8xf32> to vector<1x1x1x8xf32>
    %160 = vector.broadcast %159 : vector<1x1x1x8xf32> to vector<1x16x16x8xf32>
    %161 = arith.mulf %158, %160 : vector<1x16x16x8xf32>
    %162 = arith.addf %157, %161 : vector<1x16x16x8xf32>
    %c0_168 = arith.constant 0 : index
    %c4_169 = arith.constant 4 : index
    %c7_170 = arith.constant 7 : index
    %c0_171 = arith.constant 0 : index
    %163 = vector.load %arg8[%c0_168, %c4_169, %c7_170, %c0_171] : memref<1x20x26x8xf32, #tpu.memory_space<vmem>>, vector<1x16x16x8xf32>
    %164 = vector.shape_cast %47 : vector<8xf32> to vector<1x1x1x8xf32>
    %165 = vector.broadcast %164 : vector<1x1x1x8xf32> to vector<1x16x16x8xf32>
    %166 = arith.mulf %163, %165 : vector<1x16x16x8xf32>
    %167 = arith.addf %162, %166 : vector<1x16x16x8xf32>
    %c0_172 = arith.constant 0 : index
    %c4_173 = arith.constant 4 : index
    %c8_174 = arith.constant 8 : index
    %c0_175 = arith.constant 0 : index
    %168 = vector.load %arg8[%c0_172, %c4_173, %c8_174, %c0_175] : memref<1x20x26x8xf32, #tpu.memory_space<vmem>>, vector<1x16x16x8xf32>
    %169 = vector.shape_cast %49 : vector<8xf32> to vector<1x1x1x8xf32>
    %170 = vector.broadcast %169 : vector<1x1x1x8xf32> to vector<1x16x16x8xf32>
    %171 = arith.mulf %168, %170 : vector<1x16x16x8xf32>
    %172 = arith.addf %167, %171 : vector<1x16x16x8xf32>
    %c0_176 = arith.constant 0 : index
    %c4_177 = arith.constant 4 : index
    %c9_178 = arith.constant 9 : index
    %c0_179 = arith.constant 0 : index
    %173 = vector.load %arg8[%c0_176, %c4_177, %c9_178, %c0_179] : memref<1x20x26x8xf32, #tpu.memory_space<vmem>>, vector<1x16x16x8xf32>
    %174 = vector.shape_cast %51 : vector<8xf32> to vector<1x1x1x8xf32>
    %175 = vector.broadcast %174 : vector<1x1x1x8xf32> to vector<1x16x16x8xf32>
    %176 = arith.mulf %173, %175 : vector<1x16x16x8xf32>
    %177 = arith.addf %172, %176 : vector<1x16x16x8xf32>
    %c0_180 = arith.constant 0 : index
    %c4_181 = arith.constant 4 : index
    %c10_182 = arith.constant 10 : index
    %c0_183 = arith.constant 0 : index
    %178 = vector.load %arg8[%c0_180, %c4_181, %c10_182, %c0_183] : memref<1x20x26x8xf32, #tpu.memory_space<vmem>>, vector<1x16x16x8xf32>
    %179 = vector.shape_cast %53 : vector<8xf32> to vector<1x1x1x8xf32>
    %180 = vector.broadcast %179 : vector<1x1x1x8xf32> to vector<1x16x16x8xf32>
    %181 = arith.mulf %178, %180 : vector<1x16x16x8xf32>
    %182 = arith.addf %177, %181 : vector<1x16x16x8xf32>
    %183 = vector.shape_cast %54 : vector<1x8xf32> to vector<1x1x1x8xf32>
    %184 = vector.broadcast %183 : vector<1x1x1x8xf32> to vector<1x16x16x8xf32>
    %185 = arith.addf %182, %184 : vector<1x16x16x8xf32>
    %cst_184 = arith.constant 5.000000e-01 : f32
    %186 = vector.broadcast %cst_184 : f32 to vector<1x16x16x8xf32>
    %187 = arith.mulf %186, %185 : vector<1x16x16x8xf32>
    %cst_185 = arith.constant 4.471500e-02 : f32
    %188 = vector.broadcast %cst_185 : f32 to vector<1x16x16x8xf32>
    %189 = arith.mulf %188, %185 : vector<1x16x16x8xf32>
    %190 = arith.mulf %189, %185 : vector<1x16x16x8xf32>
    %191 = arith.mulf %190, %185 : vector<1x16x16x8xf32>
    %192 = arith.addf %185, %191 : vector<1x16x16x8xf32>
    %cst_186 = arith.constant 0.797884583 : f32
    %193 = vector.broadcast %cst_186 : f32 to vector<1x16x16x8xf32>
    %194 = arith.mulf %193, %192 : vector<1x16x16x8xf32>
    %195 = math.tanh %194 : vector<1x16x16x8xf32>
    %cst_187 = arith.constant 1.000000e+00 : f32
    %196 = vector.broadcast %cst_187 : f32 to vector<1x16x16x8xf32>
    %197 = arith.addf %196, %195 : vector<1x16x16x8xf32>
    %198 = arith.mulf %187, %197 : vector<1x16x16x8xf32>
    %199 = vector.shape_cast %55 : vector<1x8xf32> to vector<1x1x1x8xf32>
    %200 = vector.broadcast %199 : vector<1x1x1x8xf32> to vector<1x16x16x8xf32>
    %201 = arith.mulf %198, %200 : vector<1x16x16x8xf32>
    %202 = vector.shape_cast %56 : vector<1x8xf32> to vector<1x1x1x8xf32>
    %203 = vector.broadcast %202 : vector<1x1x1x8xf32> to vector<1x16x16x8xf32>
    %204 = arith.addf %201, %203 : vector<1x16x16x8xf32>
    %c0_188 = arith.constant 0 : index
    %c0_189 = arith.constant 0 : index
    %c0_190 = arith.constant 0 : index
    %c0_191 = arith.constant 0 : index
    %205 = vector.load %arg2[%c0_188, %c0_189, %c0_190, %c0_191] : memref<1x16x16x8xf32, #tpu.memory_space<vmem>>, vector<1x16x16x8xf32>
    %206 = arith.addf %204, %205 : vector<1x16x16x8xf32>
    %c0_192 = arith.constant 0 : index
    %c0_193 = arith.constant 0 : index
    %c0_194 = arith.constant 0 : index
    %c0_195 = arith.constant 0 : index
    %207 = vector.load %arg7[%c0_192, %c0_193, %c0_194, %c0_195] : memref<1x16x16x8xf32, #tpu.memory_space<vmem>>, vector<1x16x16x8xf32>
    tpu.vector_store %arg7[%c0_192, %c0_193, %c0_194, %c0_195], %206 {strides = array<i32>} : memref<1x16x16x8xf32, #tpu.memory_space<vmem>>, vector<1x16x16x8xf32>,
    return
  }
  func.func @transform_0(%arg0: i32, %arg1: i32) -> (i32, i32, i32, i32) {
    %c0_i32 = arith.constant 0 : i32
    %c0_i32_0 = arith.constant 0 : i32
    %c0_i32_1 = arith.constant 0 : i32
    return %arg0, %c0_i32, %c0_i32_0, %arg1 : i32, i32, i32, i32
  }
  func.func @transform_1(%arg0: i32, %arg1: i32) -> (i32, i32, i32) {
    %c0_i32 = arith.constant 0 : i32
    %c0_i32_0 = arith.constant 0 : i32
    %c0_i32_1 = arith.constant 0 : i32
    return %c0_i32, %c0_i32_0, %arg1 : i32, i32, i32
  }
  func.func @transform_2(%arg0: i32, %arg1: i32) -> (i32, i32) {
    %c0_i32 = arith.constant 0 : i32
    %c0_i32_0 = arith.constant 0 : i32
    return %c0_i32, %arg1 : i32, i32
  }
  func.func @transform_3(%arg0: i32, %arg1: i32) -> (i32, i32) {
    %c0_i32 = arith.constant 0 : i32
    %c0_i32_0 = arith.constant 0 : i32
    return %c0_i32, %arg1 : i32, i32
  }
  func.func @transform_4(%arg0: i32, %arg1: i32) -> (i32, i32) {
    %c0_i32 = arith.constant 0 : i32
    %c0_i32_0 = arith.constant 0 : i32
    return %c0_i32, %arg1 : i32, i32
  }
  func.func @transform_5(%arg0: i32, %arg1: i32) -> (i32, i32, i32, i32) {
    %c0_i32 = arith.constant 0 : i32
    %c0_i32_0 = arith.constant 0 : i32
    %c0_i32_1 = arith.constant 0 : i32
    return %arg0, %c0_i32, %c0_i32_0, %arg1 : i32, i32, i32, i32
  }
}

</mosaic_0001>

<bundles_post_ra>
// kernel: tpu_custom_call.1
= control target key start
LH: loop header
LB: loop body
LE: loop exit
PB: predicated region body
PF: predicated region fallthrough
CT: control target
= control target key end

     0   :  { %s3919_s18 = smov 0   ;;  %s3921_s19 = smov 0   ;;  %s6459_s0 = inlined_call_operand.vmem [shape: f32[2,16,16,8], index: 0, kind: input, shape index: {}]   ;;  %s6460_s1 = inlined_call_operand.vmem [shape: f32[5,5,8], index: 1, kind: input, shape index: {}]   ;;  %s6461_s2 = inlined_call_operand.vmem [shape: f32[1,8], index: 2, kind: input, shape index: {}]   ;;  %s6462_s3 = inlined_call_operand.vmem [shape: f32[1,8], index: 3, kind: input, shape index: {}]   ;;  %s6463_s4 = inlined_call_operand.vmem [shape: f32[1,8], index: 4, kind: input, shape index: {}]   ;;  %s6464_s5 = inlined_call_operand.vmem [shape: f32[2,16,16,8], index: 5, kind: output, shape index: {}]  }
   0x1   :  { %s3923_s20 = smov 0  }
   0x2 LB: > { %s27_s21 = sadd.s32 1, %s3882_s19  ;;  %p3638_p0 = scmp.ge.s32.totalorder %s3886_s20, 1  ;;  %s3886_s20 = sphi %s3923_s20, %s15_s20   ;;  %s3882_s19 = sphi %s3921_s19, %s6622_s19   ;;  %s3878_s18 = sphi %s3919_s18, %s6621_s18  }
   0x3   : > { %p29_p1 = scmp.ge.s32.totalorder %s27_s21, 2  ;;  %p239_p2 = scmp.lt.s32.totalorder %s3886_s20, 3 }
   0x5   : > { %s6624_s21 = smov (%p29_p1, %s27_s21), 0  ;;  %p240_p3 = pnand %p3638_p0, %p239_p2 }
   0x7   : > { %243 = sbr.rel (%p240_p3) target bundleno = 572 (0x23c), region = 40 }
   0xe   : > { %vm315_vm0 = vcmask 64512   ;;  %v3888_v0 = vmov 0.0   ;;  %vm319_vm1 = vcmask 58368   ;;  %v4102_v1 = vld [vmem:[%s6460_s1] ss:$0 sm:$0xff]  ;;  %p286_p4 = scmp.lt.s32.totalorder %s3878_s18, 1 }
   0xf   : > { %316 = vst.msk [vmem:[#allocation2] sm:$0xff] %vm315_vm0, %v3888_v0  ;;  %317 = vst.msk [vmem:[#allocation2 + $0x8] sm:$0xff] %vm315_vm0, %v3888_v0  ;;  %v4108_v2 = vld [vmem:[%s6460_s1 + $0x1] ss:$0 sm:$0xff]  ;;  %v4113_v3 = vld [vmem:[%s6460_s1 + $0x2] ss:$0 sm:$0xff] }
  0x10   : > { %318 = vst.msk [vmem:[#allocation2 + $0x10] sm:$0xff] %vm315_vm0, %v3888_v0  ;;  %321 = vst.msk [vmem:[#allocation2 + $0x20] sm:$0xff] %vm315_vm0, %v3888_v0  ;;  %v4118_v4 = vld [vmem:[%s6460_s1 + $0x3] ss:$0 sm:$0xff]  ;;  %v4123_v8 = vld [vmem:[%s6460_s1 + $0x4] ss:$0 sm:$0xff] }
  0x11   : > { %322 = vst.msk [vmem:[#allocation2 + $0x28] sm:$0xff] %vm315_vm0, %v3888_v0  ;;  %323 = vst.msk [vmem:[#allocation2 + $0x30] sm:$0xff] %vm315_vm0, %v3888_v0  ;;  %s6626_s18 = smov (!%p286_p4, %s3878_s18), 1  ;;  %v4145_v36 = vld [vmem:[%s6460_s1 + $0x8] ss:$0 sm:$0xff] }
  0x12   : > { %325 = vst.msk [vmem:[#allocation2 + $0x40] sm:$0xff] %vm315_vm0, %v3888_v0  ;;  %326 = vst.msk [vmem:[#allocation2 + $0x48] sm:$0xff] %vm315_vm0, %v3888_v0  ;;  %s3693_s9 = sshll.u32 %s6626_s18, 8  ;;  %v4153_v41 = vld [vmem:[%s6460_s1 + $0x9] ss:$0 sm:$0xff] }
  0x13   : > { %327 = vst.msk [vmem:[#allocation2 + $0x50] sm:$0xff] %vm315_vm0, %v3888_v0  ;;  %329 = vst.msk [vmem:[#allocation2 + $0x60] sm:$0xff] %vm315_vm0, %v3888_v0  ;;  %v4158_v42 = vld [vmem:[%s6460_s1 + $0xa] ss:$0 sm:$0xff]  ;;  %v4163_v43 = vld [vmem:[%s6460_s1 + $0xb] ss:$0 sm:$0xff]  ;;  %s4183_s24 = scalar_lea.vmem %s6459_s0, %s3693_s9  ;;  %s5941_s13 = scalar_lea.vmem %s6464_s5, %s3693_s9 }
  0x14   : > { %330 = vst.msk [vmem:[#allocation2 + $0x68] sm:$0xff] %vm315_vm0, %v3888_v0  ;;  %331 = vst.msk [vmem:[#allocation2 + $0x70] sm:$0xff] %vm315_vm0, %v3888_v0  ;;  %v4168_v44 = vld [vmem:[%s6460_s1 + $0xc] ss:$0 sm:$0xff] }
  0x15   : > { %333 = vst.msk [vmem:[#allocation2 + $0x80] sm:$0xff] %vm315_vm0, %v3888_v0  ;;  %334 = vst.msk [vmem:[#allocation2 + $0x88] sm:$0xff] %vm315_vm0, %v3888_v0 }
  0x16   : > { %335 = vst.msk [vmem:[#allocation2 + $0x90] sm:$0xff] %vm315_vm0, %v3888_v0  ;;  %337 = vst.msk [vmem:[#allocation2 + $0xa0] sm:$0xff] %vm315_vm0, %v3888_v0  ;;  %v494_v5 = vld [vmem:[#allocation2 + $0x6] sm:$0xff] }
  0x17   : > { %338 = vst.msk [vmem:[#allocation2 + $0xa8] sm:$0xff] %vm315_vm0, %v3888_v0  ;;  %339 = vst.msk [vmem:[#allocation2 + $0xb0] sm:$0xff] %vm315_vm0, %v3888_v0  ;;  %v495_v6 = vld [vmem:[#allocation2 + $0xe] sm:$0xff]  ;;  %v530_v10 = vmul.f32 %v4102_v1, %v494_v5 }
  0x18   : > { %341 = vst.msk [vmem:[#allocation2 + $0xc0] sm:$0xff] %vm315_vm0, %v3888_v0  ;;  %342 = vst.msk [vmem:[#allocation2 + $0xc8] sm:$0xff] %vm315_vm0, %v3888_v0  ;;  %v496_v7 = vld [vmem:[#allocation2 + $0x26] sm:$0xff]  ;;  %v497_v9 = vld [vmem:[#allocation2 + $0x2e] sm:$0xff]  ;;  %v531_v11 = vmul.f32 %v4102_v1, %v495_v6 }
  0x19   : > { %343 = vst.msk [vmem:[#allocation2 + $0xd0] sm:$0xff] %vm315_vm0, %v3888_v0  ;;  %345 = vst.msk [vmem:[#allocation2 + $0xe0] sm:$0xff] %vm315_vm0, %v3888_v0  ;;  %v532_v12 = vmul.f32 %v4102_v1, %v496_v7  ;;  %v594_v13 = vld [vmem:[#allocation2 + $0x7] sm:$0xff]  ;;  %v595_v14 = vld [vmem:[#allocation2 + $0xf] sm:$0xff]  ;;  %v533_v15 = vmul.f32 %v4102_v1, %v497_v9  ;;  %v1031_v50 = vmul.f32 %v4145_v36, %v496_v7 }
  0x1a   : > { %346 = vst.msk [vmem:[#allocation2 + $0xe8] sm:$0xff] %vm315_vm0, %v3888_v0  ;;  %347 = vst.msk [vmem:[#allocation2 + $0xf0] sm:$0xff] %vm315_vm0, %v3888_v0  ;;  %v596_v16 = vld [vmem:[#allocation2 + $0x27] sm:$0xff]  ;;  %v597_v17 = vld [vmem:[#allocation2 + $0x2f] sm:$0xff]  ;;  %v630_v18 = vmul.f32 %v4108_v2, %v594_v13  ;;  %v631_v19 = vmul.f32 %v4108_v2, %v595_v14  ;;  %v4186_v56 = vmul.f32 %v4145_v36, %v497_v9 }
  0x1b   : > { %349 = vst.msk [vmem:[#allocation2 + $0x100] sm:$0xff] %vm315_vm0, %v3888_v0  ;;  %350 = vst.msk [vmem:[#allocation2 + $0x108] sm:$0xff] %vm315_vm0, %v3888_v0  ;;  %v694_v20 = vld [vmem:[#allocation2 + $0x8] sm:$0xff]  ;;  %v632_v21 = vmul.f32 %v4108_v2, %v596_v16  ;;  %v633_v22 = vmul.f32 %v4108_v2, %v597_v17  ;;  %v695_v23 = vld [vmem:[#allocation2 + $0x10] sm:$0xff]  ;;  %v1131_v57 = vmul.f32 %v4153_v41, %v596_v16 }
  0x1c   : > { %351 = vst.msk [vmem:[#allocation2 + $0x110] sm:$0xff] %vm315_vm0, %v3888_v0  ;;  %353 = vst.msk [vmem:[#allocation2 + $0x120] sm:$0xff] %vm315_vm0, %v3888_v0  ;;  %v696_v24 = vld [vmem:[#allocation2 + $0x28] sm:$0xff]  ;;  %v697_v25 = vld [vmem:[#allocation2 + $0x30] sm:$0xff]  ;;  %v730_v26 = vmul.f32 %v4113_v3, %v694_v20  ;;  %v662_v27 = vadd.f32 %v630_v18, %v530_v10  ;;  %v663_v31 = vadd.f32 %v631_v19, %v531_v11 }
  0x1d   : > { %354 = vst.msk [vmem:[#allocation2 + $0x128] sm:$0xff] %vm315_vm0, %v3888_v0  ;;  %355 = vst.msk [vmem:[#allocation2 + $0x130] sm:$0xff] %vm315_vm0, %v3888_v0  ;;  %v732_v28 = vmul.f32 %v4113_v3, %v696_v24  ;;  %v794_v29 = vld [vmem:[#allocation2 + $0x9] sm:$0xff]  ;;  %v664_v32 = vadd.f32 %v632_v21, %v532_v12  ;;  %v731_v33 = vmul.f32 %v4113_v3, %v695_v23  ;;  %v4198_v9 = vld [vmem:[%s6460_s1 + $0x18] ss:$0 sm:$0xff] }
  0x1e   : > { %357 = vst.msk [vmem:[#allocation2 + $0x140] sm:$0xff] %vm315_vm0, %v3888_v0  ;;  %358 = vst.msk [vmem:[#allocation2 + $0x148] sm:$0xff] %vm315_vm0, %v3888_v0  ;;  %v894_v30 = vld [vmem:[#allocation2 + $0xa] sm:$0xff]  ;;  %v830_v35 = vmul.f32 %v4118_v4, %v794_v29  ;;  %v665_v37 = vadd.f32 %v633_v22, %v533_v15  ;;  %v733_v38 = vmul.f32 %v4113_v3, %v697_v25  ;;  %v4203_v10 = vld [vmem:[%s6460_s1 + $0x19] ss:$0 sm:$0xff] }
  0x1f   : > { %359 = vst.msk [vmem:[#allocation2 + $0x150] sm:$0xff] %vm315_vm0, %v3888_v0  ;;  %361 = vst.msk [vmem:[#allocation2 + $0x160] sm:$0xff] %vm315_vm0, %v3888_v0  ;;  %v796_v34 = vld [vmem:[#allocation2 + $0x29] sm:$0xff]  ;;  %v762_v39 = vadd.f32 %v730_v26, %v662_v27  ;;  %v930_v40 = vmul.f32 %v4123_v8, %v894_v30  ;;  %v764_v45 = vadd.f32 %v732_v28, %v664_v32  ;;  %v397_v18 = vld [vmem:[%s4183_s24] sm:$0xff] }
  0x20   : > { %362 = vst.msk [vmem:[#allocation2 + $0x168] sm:$0xff] %vm315_vm0, %v3888_v0  ;;  %363 = vst.msk [vmem:[#allocation2 + $0x170] sm:$0xff] %vm315_vm0, %v3888_v0  ;;  %v832_v46 = vmul.f32 %v4118_v4, %v796_v34  ;;  %v896_v48 = vld [vmem:[#allocation2 + $0x2a] sm:$0xff]  ;;  %v763_v49 = vadd.f32 %v731_v33, %v663_v31  ;;  %v765_v54 = vadd.f32 %v733_v38, %v665_v37  ;;  %v401_v28 = vld [vmem:[%s4183_s24 + $0x20] sm:$0xff] }
  0x21   : > { %365 = vst.msk [vmem:[#allocation2 + $0x180] sm:$0xff] %vm315_vm0, %v3888_v0  ;;  %366 = vst.msk [vmem:[#allocation2 + $0x188] sm:$0xff] %vm315_vm0, %v3888_v0  ;;  %v862_v47 = vadd.f32 %v830_v35, %v762_v39  ;;  %v932_v61 = vmul.f32 %v4123_v8, %v896_v48  ;;  %v4206_v13 = vmul.f32 %v4153_v41, %v597_v17  ;;  %v398_v19 = vld [vmem:[%s4183_s24 + $0x8] sm:$0xff]  ;;  %v399_v20 = vld [vmem:[%s4183_s24 + $0x10] sm:$0xff] }
  0x22   : > { %367 = vst.msk [vmem:[#allocation2 + $0x190] sm:$0xff] %vm315_vm0, %v3888_v0  ;;  %369 = vst.msk [vmem:[#allocation2 + $0x1a0] sm:$0xff] %vm315_vm0, %v3888_v0  ;;  %v864_v11 = vadd.f32 %v832_v46, %v764_v45  ;;  %v1231_v14 = vmul.f32 %v4158_v42, %v696_v24  ;;  %v4213_v21 = vmul.f32 %v4158_v42, %v697_v25  ;;  %v4225_v24 = vld [vmem:[%s6460_s1 + $0x1a] ss:$0 sm:$0xff]  ;;  %v402_v35 = vld [vmem:[%s4183_s24 + $0x28] sm:$0xff] }
  0x23   : > { %370 = vst.msk [vmem:[#allocation2 + $0x1a8] sm:$0xff] %vm315_vm0, %v3888_v0  ;;  %371 = vst.msk [vmem:[#allocation2 + $0x1b0] sm:$0xff] %vm315_vm0, %v3888_v0  ;;  %v962_v55 = vadd.f32 %v930_v40, %v862_v47  ;;  %v1331_v22 = vmul.f32 %v4163_v43, %v796_v34  ;;  %v4217_v23 = vmul.f32 %v4168_v44, %v896_v48  ;;  %v400_v25 = vld [vmem:[%s4183_s24 + $0x18] sm:$0xff]  ;;  %v403_v37 = vld [vmem:[%s4183_s24 + $0x30] sm:$0xff] }
  0x24   : > { %373 = vst.msk [vmem:[#allocation2 + $0x1c0] sm:$0xff] %vm315_vm0, %v3888_v0  ;;  %374 = vst.msk [vmem:[#allocation2 + $0x1c8] sm:$0xff] %vm315_vm0, %v3888_v0  ;;  %v4245_v34 = vld [vmem:[%s6460_s1 + $0x1b] ss:$0 sm:$0xff]  ;;  %v4258_v46 = vld [vmem:[%s6460_s1 + $0x1c] ss:$0 sm:$0xff] }
  0x25   : > { %375 = vst.msk [vmem:[#allocation2 + $0x1d0] sm:$0xff] %vm315_vm0, %v3888_v0  ;;  %377 = vst.msk [vmem:[#allocation2 + $0x1e0] sm:$0xff] %vm315_vm0, %v3888_v0  ;;  %v1063_v12 = vadd.f32 %v1031_v50, %v962_v55  ;;  %v404_v47 = vld [vmem:[%s4183_s24 + $0x38] sm:$0xff]  ;;  %v405_v48 = vld [vmem:[%s4183_s24 + $0x40] sm:$0xff]  ;;  %v964_v50 = vadd.f32 %v932_v61, %v864_v11 }
  0x26   : > { %378 = vst.msk [vmem:[#allocation2 + $0x1e8] sm:$0xff] %vm315_vm0, %v3888_v0  ;;  %379 = vst.msk [vmem:[#allocation2 + $0x1f0] sm:$0xff] %vm315_vm0, %v3888_v0 }
  0x27   : > { %381 = vst.msk [vmem:[#allocation2 + $0x200] sm:$0xff] %vm315_vm0, %v3888_v0  ;;  %382 = vst.msk [vmem:[#allocation2 + $0x208] sm:$0xff] %vm315_vm0, %v3888_v0  ;;  %v1163_v29 = vadd.f32 %v1131_v57, %v1063_v12  ;;  %v410_v12 = vld [vmem:[%s4183_s24 + $0x68] sm:$0xff] }
  0x28   : > { %383 = vst.msk [vmem:[#allocation2 + $0x210] sm:$0xff] %vm315_vm0, %v3888_v0  ;;  %385 = vst.msk [vmem:[#allocation2 + $0x220] sm:$0xff] %vm315_vm0, %v3888_v0 }
  0x29   : > { %386 = vst.msk [vmem:[#allocation2 + $0x228] sm:$0xff] %vm315_vm0, %v3888_v0  ;;  %387 = vst.msk [vmem:[#allocation2 + $0x230] sm:$0xff] %vm315_vm0, %v3888_v0 }
  0x2a   : > { %389 = vst.msk [vmem:[#allocation2 + $0x240] sm:$0xff] %vm315_vm0, %v3888_v0  ;;  %390 = vst.msk [vmem:[#allocation2 + $0x248] sm:$0xff] %vm315_vm0, %v3888_v0 }
  0x2b   : > { %391 = vst.msk [vmem:[#allocation2 + $0x250] sm:$0xff] %vm315_vm0, %v3888_v0  ;;  %393 = vst.msk [vmem:[#allocation2 + $0x260] sm:$0xff] %vm315_vm0, %v3888_v0 }
  0x2c   : > { %394 = vst.msk [vmem:[#allocation2 + $0x268] sm:$0xff] %vm315_vm0, %v3888_v0  ;;  %395 = vst.msk [vmem:[#allocation2 + $0x270] sm:$0xff] %vm315_vm0, %v3888_v0 }
  0x2d   : > { %320 = vst.msk [vmem:[#allocation2 + $0x18] sm:$0x3] %vm319_vm1, %v3888_v0  ;;  %324 = vst.msk [vmem:[#allocation2 + $0x38] sm:$0x3] %vm319_vm1, %v3888_v0 }
  0x2e   : > { %328 = vst.msk [vmem:[#allocation2 + $0x58] sm:$0x3] %vm319_vm1, %v3888_v0  ;;  %332 = vst.msk [vmem:[#allocation2 + $0x78] sm:$0x3] %vm319_vm1, %v3888_v0 }
  0x2f   : > { %336 = vst.msk [vmem:[#allocation2 + $0x98] sm:$0x3] %vm319_vm1, %v3888_v0  ;;  %340 = vst.msk [vmem:[#allocation2 + $0xb8] sm:$0x3] %vm319_vm1, %v3888_v0 }
  0x30   : > { %344 = vst.msk [vmem:[#allocation2 + $0xd8] sm:$0x3] %vm319_vm1, %v3888_v0  ;;  %348 = vst.msk [vmem:[#allocation2 + $0xf8] sm:$0x3] %vm319_vm1, %v3888_v0 }
  0x31   : > { %352 = vst.msk [vmem:[#allocation2 + $0x118] sm:$0x3] %vm319_vm1, %v3888_v0  ;;  %356 = vst.msk [vmem:[#allocation2 + $0x138] sm:$0x3] %vm319_vm1, %v3888_v0  ;;  %v4172_v51 = vld [vmem:[#allocation2 + $0x246] sm:$0xff] }
  0x32   : > { %360 = vst.msk [vmem:[#allocation2 + $0x158] sm:$0x3] %vm319_vm1, %v3888_v0  ;;  %364 = vst.msk [vmem:[#allocation2 + $0x178] sm:$0x3] %vm319_vm1, %v3888_v0  ;;  %v4174_v52 = vld [vmem:[#allocation2 + $0x24e] sm:$0xff]  ;;  %v4231_v31 = vmul.f32 %v4198_v9, %v4172_v51 }
  0x33   : > { %368 = vst.msk [vmem:[#allocation2 + $0x198] sm:$0x3] %vm319_vm1, %v3888_v0  ;;  %372 = vst.msk [vmem:[#allocation2 + $0x1b8] sm:$0x3] %vm319_vm1, %v3888_v0  ;;  %v4176_v53 = vld [vmem:[#allocation2 + $0x247] sm:$0xff]  ;;  %v4190_v62 = vld [vmem:[#allocation2 + $0x24f] sm:$0xff]  ;;  %v4235_v32 = vmul.f32 %v4198_v9, %v4174_v52 }
  0x34   : > { %376 = vst.msk [vmem:[#allocation2 + $0x1d8] sm:$0x3] %vm319_vm1, %v3888_v0  ;;  %380 = vst.msk [vmem:[#allocation2 + $0x1f8] sm:$0x3] %vm319_vm1, %v3888_v0  ;;  %v795_v58 = vld [vmem:[#allocation2 + $0x11] sm:$0xff]  ;;  %v2226_v63 = vld [vmem:[#allocation2 + $0x248] sm:$0xff]  ;;  %v4239_v33 = vmul.f32 %v4203_v10, %v4176_v53  ;;  %v4253_v45 = vmul.f32 %v4203_v10, %v4190_v62 }
  0x35   : > { %384 = vst.msk [vmem:[#allocation2 + $0x218] sm:$0x3] %vm319_vm1, %v3888_v0  ;;  %388 = vst.msk [vmem:[#allocation2 + $0x238] sm:$0x3] %vm319_vm1, %v3888_v0  ;;  %v895_v59 = vld [vmem:[#allocation2 + $0x12] sm:$0xff]  ;;  %v2326_v16 = vld [vmem:[#allocation2 + $0x249] sm:$0xff]  ;;  %v4267_v57 = vmul.f32 %v4225_v24, %v2226_v63 }
  0x36   : > { %392 = vst.msk [vmem:[#allocation2 + $0x258] sm:$0x3] %vm319_vm1, %v3888_v0  ;;  %396 = vst.msk [vmem:[#allocation2 + $0x278] sm:$0x3] %vm319_vm1, %v3888_v0  ;;  %v797_v60 = vld [vmem:[#allocation2 + $0x31] sm:$0xff]  ;;  %v831_v0 = vmul.f32 %v4118_v4, %v795_v58  ;;  %v931_v5 = vmul.f32 %v4123_v8, %v895_v59  ;;  %v4283_v63 = vmul.f32 %v4245_v34, %v2326_v16 }
  0x37   : > { %v833_v6 = vmul.f32 %v4118_v4, %v797_v60  ;;  %v897_v7 = vld [vmem:[#allocation2 + $0x32] sm:$0xff]  ;;  %v2426_v26 = vld [vmem:[#allocation2 + $0x24a] sm:$0xff]  ;;  %430 = vst.msk [vmem:[#allocation2 + $0x48] sm:$0xff] %vm315_vm0, %v397_v18  ;;  %431 = vst.msk [vmem:[#allocation2 + $0x50] sm:$0xff] %vm315_vm0, %v398_v19  ;;  %v1332_v55 = vmul.f32 %v4163_v43, %v797_v60 }
  0x38   : > { %v2227_v15 = vld [vmem:[#allocation2 + $0x250] sm:$0xff]  ;;  %v863_v17 = vadd.f32 %v831_v0, %v763_v49  ;;  %432 = vst.msk [vmem:[#allocation2 + $0x68] sm:$0xff] %vm315_vm0, %v399_v20  ;;  %6465 = vst [vmem:[#allocation3_spill] sm:$0xff] %v4235_v32  ;;  %v933_v40 = vmul.f32 %v4123_v8, %v897_v7  ;;  %v406_v49 = vld [vmem:[%s4183_s24 + $0x48] sm:$0xff]  ;;  %v4277_v11 = vmul.f32 %v4168_v44, %v897_v7 }
  0x39   : > { %6466 = vst [vmem:[#allocation4_spill] sm:$0xff] %v4239_v33  ;;  %433 = vst.msk [vmem:[#allocation2 + $0x70] sm:$0xff] %vm315_vm0, %v400_v25  ;;  %v865_v39 = vadd.f32 %v833_v6, %v765_v54  ;;  %v1263_v54 = vadd.f32 %v1231_v14, %v1163_v29  ;;  %v407_v58 = vld [vmem:[%s4183_s24 + $0x50] sm:$0xff]  ;;  %v408_v59 = vld [vmem:[%s4183_s24 + $0x58] sm:$0xff]  ;;  %v4280_v60 = vmul.f32 %v4225_v24, %v2227_v15 }
  0x3a   : > { %434 = vst.msk [vmem:[#allocation2 + $0x88] sm:$0xff] %vm315_vm0, %v401_v28  ;;  %v963_v38 = vadd.f32 %v931_v5, %v863_v17  ;;  %6467 = vst [vmem:[#allocation5_spill] sm:$0xff] %v4253_v45  ;;  %v409_v0 = vld [vmem:[%s4183_s24 + $0x60] sm:$0xff]  ;;  %v2528_v6 = vld [vmem:[#allocation2 + $0x26e] sm:$0xff]  ;;  %v4303_v16 = vmul.f32 %v4258_v46, %v2426_v26 }
  0x3b   : > { %435 = vst.msk [vmem:[#allocation2 + $0x90] sm:$0xff] %vm315_vm0, %v402_v35  ;;  %436 = vst.msk [vmem:[#allocation2 + $0xa8] sm:$0xff] %vm315_vm0, %v403_v37  ;;  %v2527_v5 = vld [vmem:[#allocation2 + $0x266] sm:$0xff]  ;;  %v1363_v14 = vadd.f32 %v1331_v22, %v1263_v54  ;;  %v4297_v7 = vld [vmem:[%s6460_s1 + $0x11] ss:$0 sm:$0xff]  ;;  %v965_v22 = vadd.f32 %v933_v40, %v865_v39 }
  0x3c   : > { %6468 = vst [vmem:[#allocation6_spill] sm:$0xff] %v4267_v57  ;;  %437 = vst.msk [vmem:[#allocation2 + $0xb0] sm:$0xff] %vm315_vm0, %v404_v47  ;;  %v1064_v61 = vadd.f32 %v4186_v56, %v963_v38  ;;  %v4292_v56 = vld [vmem:[%s6460_s1 + $0x10] ss:$0 sm:$0xff]  ;;  %v4311_v19 = vld [vmem:[%s6460_s1 + $0x20] ss:$0 sm:$0xff] }
  0x3d   : > { %v2327_v27 = vld [vmem:[#allocation2 + $0x251] sm:$0xff]  ;;  %438 = vst.msk [vmem:[#allocation2 + $0xc8] sm:$0xff] %vm315_vm0, %v405_v48  ;;  %439 = vst.msk [vmem:[#allocation2 + $0xd0] sm:$0xff] %vm315_vm0, %v406_v49  ;;  %v2627_v20 = vld [vmem:[#allocation2 + $0x267] sm:$0xff]  ;;  %v4322_v26 = vmul.f32 %v4311_v19, %v4172_v51  ;;  %v4326_v25 = vmul.f32 %v4311_v19, %v4174_v52  ;;  %v1463_v29 = vadd.f32 %v4217_v23, %v1363_v14 }
  0x3e   : > { %v2427_v30 = vld [vmem:[#allocation2 + $0x252] sm:$0xff]  ;;  %6469 = vst [vmem:[#allocation7_spill] sm:$0xff] %v4280_v60  ;;  %6470 = vst [vmem:[#allocation8_spill] sm:$0xff] %v4283_v63  ;;  %v4300_v15 = vmul.f32 %v4245_v34, %v2327_v27  ;;  %v1164_v17 = vadd.f32 %v4206_v13, %v1064_v61  ;;  %v4318_v27 = vld [vmem:[%s6460_s1 + $0x21] ss:$0 sm:$0xff]  ;;  %v4331_v13 = vmul.f32 %v4311_v19, %v2527_v5 }
  0x3f   : > { %440 = vst.msk [vmem:[#allocation2 + $0xe8] sm:$0xff] %vm315_vm0, %v407_v58  ;;  %441 = vst.msk [vmem:[#allocation2 + $0xf0] sm:$0xff] %vm315_vm0, %v408_v59  ;;  %v4306_v18 = vmul.f32 %v4258_v46, %v2427_v30  ;;  %v411_v28 = vld [vmem:[%s4183_s24 + $0x70] sm:$0xff]  ;;  %v498_v30 = vld [vmem:[#allocation2 + $0x46] sm:$0xff]  ;;  %v4334_v38 = vmul.f32 %v4311_v19, %v2528_v6  ;;  %v4338_v51 = vmul.f32 %v4318_v27, %v4176_v53 }
  0x40   : > { %442 = vst.msk [vmem:[#allocation2 + $0x108] sm:$0xff] %vm315_vm0, %v409_v0  ;;  %6471 = vst [vmem:[#allocation9_spill] sm:$0xff] %v4300_v15  ;;  %v598_v35 = vld [vmem:[#allocation2 + $0x47] sm:$0xff]  ;;  %v1264_v52 = vadd.f32 %v4213_v21, %v1164_v17  ;;  %v534_v39 = vmul.f32 %v4102_v1, %v498_v30  ;;  %v599_v47 = vld [vmem:[#allocation2 + $0x4f] sm:$0xff]  ;;  %v4346_v48 = vmul.f32 %v4318_v27, %v4190_v62 }
  0x41   : > { %6472 = vst [vmem:[#allocation10_spill] sm:$0xff] %v4303_v16  ;;  %6473 = vst [vmem:[#allocation11_spill] sm:$0xff] %v4306_v18  ;;  %v698_v37 = vld [vmem:[#allocation2 + $0x48] sm:$0xff]  ;;  %v634_v23 = vmul.f32 %v4108_v2, %v598_v35  ;;  %v1033_v53 = vmul.f32 %v4145_v36, %v498_v30  ;;  %v1531_v58 = vmul.f32 %v4292_v56, %v498_v30  ;;  %v4359_v62 = vld [vmem:[%s6460_s1 + $0x12] ss:$0 sm:$0xff] }
  0x42   : > { %443 = vst.msk [vmem:[#allocation2 + $0x110] sm:$0xff] %vm315_vm0, %v410_v12  ;;  %6474 = vst [vmem:[#allocation12_spill] sm:$0xff] %v4322_v26  ;;  %v499_v40 = vld [vmem:[#allocation2 + $0x4e] sm:$0xff]  ;;  %v734_v54 = vmul.f32 %v4113_v3, %v698_v37  ;;  %v4352_v21 = vmul.f32 %v4318_v27, %v2627_v20  ;;  %v1364_v0 = vadd.f32 %v1332_v55, %v1264_v52 }
  0x43   : > { %6475 = vst [vmem:[#allocation13_spill] sm:$0xff] %v4326_v25  ;;  %6476 = vst [vmem:[#allocation14_spill] sm:$0xff] %v4331_v13  ;;  %v2628_v49 = vld [vmem:[#allocation2 + $0x26f] sm:$0xff]  ;;  %v666_v5 = vadd.f32 %v634_v23, %v534_v39  ;;  %v1133_v6 = vmul.f32 %v4153_v41, %v598_v35  ;;  %v1631_v61 = vmul.f32 %v4297_v7, %v598_v35 }
  0x44   : > { %6477 = vst [vmem:[#allocation15_spill] sm:$0xff] %v4334_v38  ;;  %6478 = vst [vmem:[#allocation16_spill] sm:$0xff] %v4338_v51  ;;  %v798_v59 = vld [vmem:[#allocation2 + $0x49] sm:$0xff]  ;;  %v1065_v14 = vadd.f32 %v1033_v53, %v964_v50  ;;  %v1563_v17 = vadd.f32 %v1531_v58, %v1463_v29  ;;  %v635_v30 = vmul.f32 %v4108_v2, %v599_v47  ;;  %v799_v52 = vld [vmem:[#allocation2 + $0x51] sm:$0xff] }
  0x45   : > { %444 = vst.msk [vmem:[#allocation2 + $0x128] sm:$0xff] %vm315_vm0, %v411_v28  ;;  %6479 = vst [vmem:[#allocation17_spill] sm:$0xff] %v4346_v48  ;;  %v699_v12 = vld [vmem:[#allocation2 + $0x50] sm:$0xff]  ;;  %v535_v28 = vmul.f32 %v4102_v1, %v499_v40  ;;  %v766_v20 = vadd.f32 %v734_v54, %v666_v5  ;;  %v1233_v55 = vmul.f32 %v4158_v42, %v698_v37 }
  0x46   : > { %6480 = vst [vmem:[#allocation18_spill] sm:$0xff] %v4352_v21  ;;  %v834_v39 = vmul.f32 %v4118_v4, %v798_v59  ;;  %v898_v23 = vld [vmem:[#allocation2 + $0x4a] sm:$0xff]  ;;  %v4366_v35 = vmul.f32 %v4318_v27, %v2628_v49  ;;  %v1165_v38 = vadd.f32 %v1133_v6, %v1065_v14  ;;  %v1663_v21 = vadd.f32 %v1631_v61, %v1563_v17  ;;  %v899_v29 = vld [vmem:[#allocation2 + $0x52] sm:$0xff] }
  0x47   : > { %v667_v13 = vadd.f32 %v635_v30, %v535_v28  ;;  %v735_v50 = vmul.f32 %v4113_v3, %v699_v12  ;;  %v1464_v53 = vadd.f32 %v4277_v11, %v1364_v0  ;;  %v1731_v58 = vmul.f32 %v4359_v62, %v698_v37  ;;  %v4377_v6 = vld [vmem:[%s6460_s1 + $0x13] ss:$0 sm:$0xff]  ;;  %v4386_v28 = vld [vmem:[%s6460_s1 + $0x14] ss:$0 sm:$0xff] }
  0x48   : > { %6481 = vst [vmem:[#allocation19_spill] sm:$0xff] %v4366_v35  ;;  %v866_v54 = vadd.f32 %v834_v39, %v766_v20  ;;  %v1034_v5 = vmul.f32 %v4145_v36, %v499_v40  ;;  %v1265_v48 = vadd.f32 %v1233_v55, %v1165_v38  ;;  %v835_v51 = vmul.f32 %v4118_v4, %v799_v52  ;;  %v500_v39 = vld [vmem:[#allocation2 + $0x66] sm:$0xff] }
  0x49   : > { %v767_v25 = vadd.f32 %v735_v50, %v667_v13  ;;  %v934_v49 = vmul.f32 %v4123_v8, %v898_v23  ;;  %v935_v61 = vmul.f32 %v4123_v8, %v899_v29  ;;  %v1134_v11 = vmul.f32 %v4153_v41, %v599_v47  ;;  %v600_v50 = vld [vmem:[#allocation2 + $0x67] sm:$0xff] }
  0x4a   : > { %v1066_v14 = vadd.f32 %v1034_v5, %v965_v22  ;;  %v1333_v37 = vmul.f32 %v4163_v43, %v798_v59  ;;  %v1763_v0 = vadd.f32 %v1731_v58, %v1663_v21  ;;  %v1234_v13 = vmul.f32 %v4158_v42, %v699_v12 }
  0x4b   : > { %v867_v17 = vadd.f32 %v835_v51, %v767_v25  ;;  %v966_v38 = vadd.f32 %v934_v49, %v866_v54  ;;  %v1334_v20 = vmul.f32 %v4163_v43, %v799_v52  ;;  %v1532_v22 = vmul.f32 %v4292_v56, %v499_v40 }
  0x4c   : > { %v1166_v30 = vadd.f32 %v1134_v11, %v1066_v14  ;;  %v1365_v55 = vadd.f32 %v1333_v37, %v1265_v48  ;;  %v1433_v5 = vmul.f32 %v4168_v44, %v898_v23  ;;  %v1434_v25 = vmul.f32 %v4168_v44, %v899_v29  ;;  %v700_v11 = vld [vmem:[#allocation2 + $0x68] sm:$0xff] }
  0x4d   : > { %v1632_v51 = vmul.f32 %v4297_v7, %v599_v47  ;;  %v1831_v21 = vmul.f32 %v4377_v6, %v798_v59  ;;  %v967_v58 = vadd.f32 %v935_v61, %v867_v17  ;;  %v1564_v49 = vadd.f32 %v1532_v22, %v1464_v53  ;;  %v4405_v22 = vld [vmem:[#allocation2 + $0x6f] sm:$0xff] }
  0x4e   : > { %v1266_v54 = vadd.f32 %v1234_v13, %v1166_v30  ;;  %v1732_v14 = vmul.f32 %v4359_v62, %v699_v12  ;;  %v1931_v48 = vmul.f32 %v4386_v28, %v898_v23  ;;  %v536_v40 = vmul.f32 %v4102_v1, %v500_v39  ;;  %v4403_v30 = vld [vmem:[#allocation2 + $0x6e] sm:$0xff] }
  0x4f   : > { %v1863_v35 = vadd.f32 %v1831_v21, %v1763_v0  ;;  %v636_v37 = vmul.f32 %v4108_v2, %v600_v50  ;;  %v1465_v26 = vadd.f32 %v1433_v5, %v1365_v55  ;;  %v1664_v18 = vadd.f32 %v1632_v51, %v1564_v49 }
  0x50   : > { %v1832_v15 = vmul.f32 %v4377_v6, %v799_v52  ;;  %v1035_v47 = vmul.f32 %v4145_v36, %v500_v39  ;;  %v1366_v59 = vadd.f32 %v1334_v20, %v1266_v54  ;;  %v736_v53 = vmul.f32 %v4113_v3, %v700_v11  ;;  %v800_v54 = vld [vmem:[#allocation2 + $0x69] sm:$0xff] }
  0x51   : > { %v1963_v61 = vadd.f32 %v1931_v48, %v1863_v35  ;;  %v668_v17 = vadd.f32 %v636_v37, %v536_v40  ;;  %v1764_v12 = vadd.f32 %v1732_v14, %v1664_v18  ;;  %v1135_v0 = vmul.f32 %v4153_v41, %v600_v50  ;;  %v801_v40 = vld [vmem:[#allocation2 + $0x71] sm:$0xff] }
  0x52   : > { %v1067_v13 = vadd.f32 %v1035_v47, %v966_v38  ;;  %v1533_v23 = vmul.f32 %v4292_v56, %v500_v39  ;;  %v1932_v55 = vmul.f32 %v4386_v28, %v899_v29  ;;  %v1235_v5 = vmul.f32 %v4158_v42, %v700_v11  ;;  %v4411_v38 = vld [vmem:[#allocation2 + $0x70] sm:$0xff] }
  0x53   : > { %v768_v52 = vadd.f32 %v736_v53, %v668_v17  ;;  %v2032_v35 = vmul.f32 %v4198_v9, %v500_v39  ;;  %v1864_v20 = vadd.f32 %v1832_v15, %v1764_v12  ;;  %v1633_v18 = vmul.f32 %v4297_v7, %v600_v50  ;;  %v900_v47 = vld [vmem:[#allocation2 + $0x6a] sm:$0xff]  ;;  %v901_v12 = vld [vmem:[#allocation2 + $0x72] sm:$0xff] }
  0x54   : > { %v1167_v51 = vadd.f32 %v1135_v0, %v1067_v13  ;;  %v1565_v21 = vadd.f32 %v1533_v23, %v1465_v26  ;;  %v2132_v14 = vmul.f32 %v4203_v10, %v600_v50  ;;  %v537_v48 = vmul.f32 %v4102_v1, %v4403_v30 }
  0x55   : > { %v2064_v49 = vadd.f32 %v2032_v35, %v1963_v61  ;;  %v637_v29 = vmul.f32 %v4108_v2, %v4405_v22  ;;  %v1466_v37 = vadd.f32 %v1434_v25, %v1366_v59  ;;  %v1733_v15 = vmul.f32 %v4359_v62, %v700_v11 }
  0x56   : > { %v1665_v39 = vadd.f32 %v1633_v18, %v1565_v21  ;;  %v2232_v26 = vmul.f32 %v4225_v24, %v700_v11  ;;  %v737_v50 = vmul.f32 %v4113_v3, %v4411_v38  ;;  %v836_v53 = vmul.f32 %v4118_v4, %v800_v54  ;;  %v412_v18 = vld [vmem:[%s4183_s24 + $0x78] sm:$0xff] }
  0x57   : > { %v2164_v17 = vadd.f32 %v2132_v14, %v2064_v49  ;;  %v669_v61 = vadd.f32 %v637_v29, %v537_v48  ;;  %v1964_v13 = vadd.f32 %v1932_v55, %v1864_v20  ;;  %v1267_v0 = vadd.f32 %v1235_v5, %v1167_v51  ;;  %v413_v49 = vld [vmem:[%s4183_s24 + $0x80] sm:$0xff]  ;;  %445 = vst.msk [vmem:[#allocation2 + $0x130] sm:$0xff] %vm315_vm0, %v412_v18 }
  0x58   : > { %v837_v25 = vmul.f32 %v4118_v4, %v801_v40  ;;  %v1036_v59 = vmul.f32 %v4145_v36, %v4403_v30  ;;  %v1765_v23 = vadd.f32 %v1733_v15, %v1665_v39  ;;  %v868_v35 = vadd.f32 %v836_v53, %v768_v52  ;;  %446 = vst.msk [vmem:[#allocation2 + $0x148] sm:$0xff] %vm315_vm0, %v413_v49  ;;  %v414_v39 = vld [vmem:[%s4183_s24 + $0x88] sm:$0xff] }
  0x59   : > { %v769_v11 = vadd.f32 %v737_v50, %v669_v61  ;;  %v936_v21 = vmul.f32 %v4123_v8, %v900_v47  ;;  %v937_v14 = vmul.f32 %v4123_v8, %v901_v12  ;;  %v1136_v55 = vmul.f32 %v4153_v41, %v4405_v22  ;;  %447 = vst.msk [vmem:[#allocation2 + $0x150] sm:$0xff] %vm315_vm0, %v414_v39 }
  0x5a   : > { %v1068_v48 = vadd.f32 %v1036_v59, %v967_v58  ;;  %v1335_v5 = vmul.f32 %v4163_v43, %v800_v54  ;;  %v2264_v20 = vadd.f32 %v2232_v26, %v2164_v17  ;;  %v1236_v52 = vmul.f32 %v4158_v42, %v4411_v38 }
  0x5b   : > { %v869_v51 = vadd.f32 %v837_v25, %v769_v11  ;;  %v1336_v29 = vmul.f32 %v4163_v43, %v801_v40  ;;  %v968_v15 = vadd.f32 %v936_v21, %v868_v35  ;;  %v1534_v50 = vmul.f32 %v4292_v56, %v4403_v30 }
  0x5c   : > { %v1168_v61 = vadd.f32 %v1136_v55, %v1068_v48  ;;  %v1367_v58 = vadd.f32 %v1335_v5, %v1267_v0  ;;  %v1435_v53 = vmul.f32 %v4168_v44, %v900_v47  ;;  %v1436_v59 = vmul.f32 %v4168_v44, %v901_v12 }
  0x5d   : > { %v1634_v26 = vmul.f32 %v4297_v7, %v4405_v22  ;;  %v1833_v17 = vmul.f32 %v4377_v6, %v800_v54  ;;  %v4447_v25 = vadd.f32 %v937_v14, %v869_v51  ;;  %v1566_v35 = vadd.f32 %v1534_v50, %v1466_v37  ;;  %v502_v14 = vld [vmem:[#allocation2 + $0x86] sm:$0xff] }
  0x5e   : > { %v1268_v11 = vadd.f32 %v1236_v52, %v1168_v61  ;;  %v1734_v0 = vmul.f32 %v4359_v62, %v4411_v38  ;;  %v1467_v21 = vadd.f32 %v1435_v53, %v1367_v58  ;;  %v1834_v18 = vmul.f32 %v4377_v6, %v801_v40  ;;  %v602_v51 = vld [vmem:[#allocation2 + $0x87] sm:$0xff] }
  0x5f   : > { %v1865_v49 = vadd.f32 %v1833_v17, %v1765_v23  ;;  %v2033_v48 = vmul.f32 %v4198_v9, %v4403_v30  ;;  %v1666_v5 = vadd.f32 %v1634_v26, %v1566_v35  ;;  %v1933_v39 = vmul.f32 %v4386_v28, %v900_v47  ;;  %v702_v53 = vld [vmem:[#allocation2 + $0x88] sm:$0xff] }
  0x60   : > { %v1368_v55 = vadd.f32 %v1336_v29, %v1268_v11  ;;  %v2332_v16 = vmul.f32 %v4245_v34, %v800_v54  ;;  %v1934_v37 = vmul.f32 %v4386_v28, %v901_v12  ;;  %v2133_v61 = vmul.f32 %v4203_v10, %v4405_v22 }
  0x61   : > { %v2065_v52 = vadd.f32 %v2033_v48, %v1964_v13  ;;  %v2233_v23 = vmul.f32 %v4225_v24, %v4411_v38  ;;  %v1766_v58 = vadd.f32 %v1734_v0, %v1666_v5  ;;  %v1965_v50 = vadd.f32 %v1933_v39, %v1865_v49  ;;  %v4477_v39 = vld [vmem:[#allocation2 + $0x8e] sm:$0xff] }
  0x62   : > { %v2333_v30 = vmul.f32 %v4245_v34, %v801_v40  ;;  %v2364_v29 = vadd.f32 %v2332_v16, %v2264_v20  ;;  %v2432_v54 = vmul.f32 %v4258_v46, %v900_v47  ;;  %v538_v17 = vmul.f32 %v4102_v1, %v502_v14 }
  0x63   : > { %v2165_v26 = vadd.f32 %v2133_v61, %v2065_v52  ;;  %v638_v11 = vmul.f32 %v4108_v2, %v602_v51  ;;  %v4465_v13 = vadd.f32 %v1436_v59, %v1368_v55  ;;  %v1866_v35 = vadd.f32 %v1834_v18, %v1766_v58  ;;  %v4479_v52 = vld [vmem:[#allocation2 + $0x8f] sm:$0xff] }
  0x64   : > { %v2433_v22 = vmul.f32 %v4258_v46, %v901_v12  ;;  %v1037_v38 = vmul.f32 %v4145_v36, %v502_v14  ;;  %v738_v40 = vmul.f32 %v4113_v3, %v702_v53  ;;  %v1535_v16 = vmul.f32 %v4292_v56, %v502_v14 }
  0x65   : > { %v2265_v0 = vadd.f32 %v2233_v23, %v2165_v26  ;;  %v670_v49 = vadd.f32 %v638_v11, %v538_v17  ;;  %v4471_v20 = vadd.f32 %v2432_v54, %v2364_v29  ;;  %v1137_v48 = vmul.f32 %v4153_v41, %v602_v51  ;;  %v802_v29 = vld [vmem:[#allocation2 + $0x89] sm:$0xff] }
  0x66   : > { %v1069_v47 = vadd.f32 %v1037_v38, %v968_v15  ;;  %v1237_v5 = vmul.f32 %v4158_v42, %v702_v53  ;;  %v1567_v18 = vadd.f32 %v1535_v16, %v1467_v21  ;;  %v1635_v12 = vmul.f32 %v4297_v7, %v602_v51  ;;  %v703_v17 = vld [vmem:[#allocation2 + $0x90] sm:$0xff] }
  0x67   : > { %v2365_v59 = vadd.f32 %v2333_v30, %v2265_v0  ;;  %v2034_v55 = vmul.f32 %v4198_v9, %v502_v14  ;;  %v4481_v61 = vadd.f32 %v1934_v37, %v1866_v35  ;;  %v770_v23 = vadd.f32 %v738_v40, %v670_v49  ;;  %v415_v11 = vld [vmem:[%s4183_s24 + $0x90] sm:$0xff] }
  0x68   : > { %v1169_v58 = vadd.f32 %v1137_v48, %v1069_v47  ;;  %v1735_v15 = vmul.f32 %v4359_v62, %v702_v53  ;;  %v1667_v26 = vadd.f32 %v1635_v12, %v1567_v18  ;;  %v2134_v30 = vmul.f32 %v4203_v10, %v602_v51  ;;  %v803_v49 = vld [vmem:[#allocation2 + $0x91] sm:$0xff]  ;;  %448 = vst.msk [vmem:[#allocation2 + $0x168] sm:$0xff] %vm315_vm0, %v415_v11 }
  0x69   : > { %v2066_v54 = vadd.f32 %v2034_v55, %v1965_v50  ;;  %v2234_v21 = vmul.f32 %v4225_v24, %v702_v53  ;;  %v4487_v38 = vadd.f32 %v2433_v22, %v2365_v59  ;;  %v4490_v0 = vmul.f32 %v4311_v19, %v502_v14  ;;  %v902_v40 = vld [vmem:[#allocation2 + $0x8a] sm:$0xff]  ;;  %v903_v50 = vld [vmem:[#allocation2 + $0x92] sm:$0xff] }
  0x6a   : > { %v539_v37 = vmul.f32 %v4102_v1, %v4477_v39  ;;  %v639_v35 = vmul.f32 %v4108_v2, %v4479_v52  ;;  %v1269_v16 = vadd.f32 %v1237_v5, %v1169_v58  ;;  %v4498_v47 = vmul.f32 %v4318_v27, %v602_v51 }
  0x6b   : > { %v2166_v53 = vadd.f32 %v2134_v30, %v2066_v54  ;;  %v838_v22 = vmul.f32 %v4118_v4, %v802_v29  ;;  %v1767_v14 = vadd.f32 %v1735_v15, %v1667_v26  ;;  %v739_v59 = vmul.f32 %v4113_v3, %v703_v17 }
  0x6c   : > { %v671_v48 = vadd.f32 %v639_v35, %v539_v37  ;;  %v1038_v18 = vmul.f32 %v4145_v36, %v4477_v39  ;;  %v839_v12 = vmul.f32 %v4118_v4, %v803_v49  ;;  %v938_v11 = vmul.f32 %v4123_v8, %v902_v40 }
  0x6d   : > { %v870_v55 = vadd.f32 %v838_v22, %v770_v23  ;;  %v939_v5 = vmul.f32 %v4123_v8, %v903_v50  ;;  %v1138_v15 = vmul.f32 %v4153_v41, %v4479_v52  ;;  %v1337_v26 = vmul.f32 %v4163_v43, %v802_v29 }
  0x6e   : > { %v771_v58 = vadd.f32 %v739_v59, %v671_v48  ;;  %v1070_v51 = vadd.f32 %v1038_v18, %v4447_v25  ;;  %v2266_v54 = vadd.f32 %v2234_v21, %v2166_v53  ;;  %v1238_v30 = vmul.f32 %v4158_v42, %v703_v17  ;;  %v416_v48 = vld [vmem:[%s4183_s24 + $0x98] sm:$0xff] }
  0x6f   : > { %v1338_v37 = vmul.f32 %v4163_v43, %v803_v49  ;;  %v1536_v23 = vmul.f32 %v4292_v56, %v4477_v39  ;;  %v970_v22 = vadd.f32 %v938_v11, %v870_v55  ;;  %v1369_v63 = vadd.f32 %v1337_v26, %v1269_v16  ;;  %449 = vst.msk [vmem:[#allocation2 + $0x170] sm:$0xff] %vm315_vm0, %v416_v48 }
  0x70   : > { %v871_v35 = vadd.f32 %v839_v12, %v771_v58  ;;  %v1170_v60 = vadd.f32 %v1138_v15, %v1070_v51  ;;  %v1437_v25 = vmul.f32 %v4168_v44, %v902_v40  ;;  %v1636_v18 = vmul.f32 %v4297_v7, %v4479_v52 }
  0x71   : > { %v1568_v59 = vadd.f32 %v1536_v23, %v4465_v13  ;;  %v1835_v21 = vmul.f32 %v4377_v6, %v802_v29  ;;  %v1438_v45 = vmul.f32 %v4168_v44, %v903_v50  ;;  %v1736_v12 = vmul.f32 %v4359_v62, %v703_v17 }
  0x72   : > { %v1270_v53 = vadd.f32 %v1238_v30, %v1170_v60  ;;  %v1836_v55 = vmul.f32 %v4377_v6, %v803_v49  ;;  %v4525_v16 = vadd.f32 %v939_v5, %v871_v35  ;;  %v2035_v13 = vmul.f32 %v4198_v9, %v4477_v39  ;;  %v504_v35 = vld [vmem:[#allocation2 + $0xa6] sm:$0xff] }
  0x73   : > { %v1668_v11 = vadd.f32 %v1636_v18, %v1568_v59  ;;  %v1867_v58 = vadd.f32 %v1835_v21, %v1767_v14  ;;  %v1469_v15 = vadd.f32 %v1437_v25, %v1369_v63  ;;  %v1935_v26 = vmul.f32 %v4386_v28, %v902_v40  ;;  %v604_v59 = vld [vmem:[#allocation2 + $0xa7] sm:$0xff] }
  0x74   : > { %v1370_v51 = vadd.f32 %v1338_v37, %v1270_v53  ;;  %v2334_v23 = vmul.f32 %v4245_v34, %v802_v29  ;;  %v1936_v30 = vmul.f32 %v4386_v28, %v903_v50  ;;  %v2067_v48 = vadd.f32 %v2035_v13, %v4481_v61 }
  0x75   : > { %v1768_v60 = vadd.f32 %v1736_v12, %v1668_v11  ;;  %v2135_v5 = vmul.f32 %v4203_v10, %v4479_v52  ;;  %v1967_v14 = vadd.f32 %v1935_v26, %v1867_v58  ;;  %v2235_v18 = vmul.f32 %v4225_v24, %v703_v17  ;;  %v704_v12 = vld [vmem:[#allocation2 + $0xa8] sm:$0xff] }
  0x76   : > { %v2335_v37 = vmul.f32 %v4245_v34, %v803_v49  ;;  %v2366_v63 = vadd.f32 %v2334_v23, %v2266_v54  ;;  %v4537_v25 = vadd.f32 %v1438_v45, %v1370_v51  ;;  %v2434_v53 = vmul.f32 %v4258_v46, %v902_v40 }
  0x77   : > { %v1868_v21 = vadd.f32 %v1836_v55, %v1768_v60  ;;  %v2167_v29 = vadd.f32 %v2135_v5, %v2067_v48  ;;  %v2435_v61 = vmul.f32 %v4258_v46, %v903_v50  ;;  %v4543_v11 = vmul.f32 %v4311_v19, %v4477_v39  ;;  %v4560_v48 = vld [vmem:[#allocation2 + $0xae] sm:$0xff] }
  0x78   : > { %v540_v58 = vmul.f32 %v4102_v1, %v504_v35  ;;  %v640_v17 = vmul.f32 %v4108_v2, %v604_v59  ;;  %v4547_v49 = vadd.f32 %v2434_v53, %v2366_v63  ;;  %v4551_v45 = vmul.f32 %v4318_v27, %v4479_v52  ;;  %v4562_v52 = vld [vmem:[#allocation2 + $0xaf] sm:$0xff] }
  0x79   : > { %6482 = vst [vmem:[#allocation20_spill] sm:$0xff] %v4543_v11  ;;  %v2267_v13 = vadd.f32 %v2235_v18, %v2167_v29  ;;  %v1039_v40 = vmul.f32 %v4145_v36, %v504_v35  ;;  %v4554_v54 = vadd.f32 %v1936_v30, %v1868_v21  ;;  %v740_v55 = vmul.f32 %v4113_v3, %v704_v12  ;;  %v804_v21 = vld [vmem:[#allocation2 + $0xa9] sm:$0xff] }
  0x7a   : > { %6483 = vst [vmem:[#allocation21_spill] sm:$0xff] %v4547_v49  ;;  %6484 = vst [vmem:[#allocation22_spill] sm:$0xff] %v4551_v45  ;;  %v672_v50 = vadd.f32 %v640_v17, %v540_v58  ;;  %v1537_v39 = vmul.f32 %v4292_v56, %v504_v35  ;;  %v1139_v23 = vmul.f32 %v4153_v41, %v604_v59  ;;  %v705_v58 = vld [vmem:[#allocation2 + $0xb0] sm:$0xff]  ;;  %v417_v17 = vld [vmem:[%s4183_s24 + $0xa0] sm:$0xff] }
  0x7b   : > { %v2367_v51 = vadd.f32 %v2335_v37, %v2267_v13  ;;  %v1071_v26 = vadd.f32 %v1039_v40, %v970_v22  ;;  %v2036_v60 = vmul.f32 %v4198_v9, %v504_v35  ;;  %v1239_v5 = vmul.f32 %v4158_v42, %v704_v12  ;;  %450 = vst.msk [vmem:[#allocation2 + $0x188] sm:$0xff] %vm315_vm0, %v417_v17 }
  0x7c   : > { %v1569_v30 = vadd.f32 %v1537_v39, %v1469_v15  ;;  %v1637_v18 = vmul.f32 %v4297_v7, %v604_v59  ;;  %v1737_v63 = vmul.f32 %v4359_v62, %v704_v12  ;;  %v772_v29 = vadd.f32 %v740_v55, %v672_v50  ;;  %v805_v39 = vld [vmem:[#allocation2 + $0xb1] sm:$0xff] }
  0x7d   : > { %v1171_v37 = vadd.f32 %v1139_v23, %v1071_v26  ;;  %v2068_v53 = vadd.f32 %v2036_v60, %v1967_v14  ;;  %v2136_v22 = vmul.f32 %v4203_v10, %v604_v59  ;;  %v2236_v40 = vmul.f32 %v4225_v24, %v704_v12  ;;  %v904_v26 = vld [vmem:[#allocation2 + $0xaa] sm:$0xff] }
  0x7e   : > { %v1669_v13 = vadd.f32 %v1637_v18, %v1569_v30  ;;  %v541_v57 = vmul.f32 %v4102_v1, %v4560_v48  ;;  %v641_v15 = vmul.f32 %v4108_v2, %v4562_v52  ;;  %v4575_v32 = vadd.f32 %v2435_v61, %v2367_v51  ;;  %v905_v2 = vld [vmem:[#allocation2 + $0xb2] sm:$0xff] }
  0x7f   : > { %v2168_v50 = vadd.f32 %v2136_v22, %v2068_v53  ;;  %v4578_v14 = vmul.f32 %v4311_v19, %v504_v35  ;;  %v840_v55 = vmul.f32 %v4118_v4, %v804_v21  ;;  %v1271_v23 = vadd.f32 %v1239_v5, %v1171_v37 }
  0x80   : > { %6485 = vst [vmem:[#allocation23_spill] sm:$0xff] %v4575_v32  ;;  %v4582_v12 = vmul.f32 %v4318_v27, %v604_v59  ;;  %v673_v1 = vadd.f32 %v641_v15, %v541_v57  ;;  %v741_v60 = vmul.f32 %v4113_v3, %v705_v58  ;;  %v1769_v30 = vadd.f32 %v1737_v63, %v1669_v13  ;;  %v418_v13 = vld [vmem:[%s4183_s24 + $0xa8] sm:$0xff] }
  0x81   : > { %6486 = vst [vmem:[#allocation24_spill] sm:$0xff] %v4578_v14  ;;  %v841_v61 = vmul.f32 %v4118_v4, %v805_v39  ;;  %v872_v51 = vadd.f32 %v840_v55, %v772_v29  ;;  %v1040_v35 = vmul.f32 %v4145_v36, %v4560_v48  ;;  %v2268_v18 = vadd.f32 %v2236_v40, %v2168_v50  ;;  %v708_v32 = vld [vmem:[#allocation2 + $0xe8] sm:$0xff] }
  0x82   : > { %6487 = vst [vmem:[#allocation25_spill] sm:$0xff] %v4582_v12  ;;  %v773_v53 = vadd.f32 %v741_v60, %v673_v1  ;;  %v940_v22 = vmul.f32 %v4123_v8, %v904_v26  ;;  %v1339_v5 = vmul.f32 %v4163_v43, %v804_v21  ;;  %v941_v59 = vmul.f32 %v4123_v8, %v905_v2 }
  0x83   : > { %v1072_v57 = vadd.f32 %v1040_v35, %v4525_v16  ;;  %v1140_v3 = vmul.f32 %v4153_v41, %v4562_v52  ;;  %v1240_v63 = vmul.f32 %v4158_v42, %v705_v58  ;;  %v1538_v17 = vmul.f32 %v4292_v56, %v4560_v48  ;;  %451 = vst.msk [vmem:[#allocation2 + $0x190] sm:$0xff] %vm315_vm0, %v418_v13 }
  0x84   : > { %v873_v4 = vadd.f32 %v841_v61, %v773_v53  ;;  %v972_v29 = vadd.f32 %v940_v22, %v872_v51  ;;  %v1371_v37 = vadd.f32 %v1339_v5, %v1271_v23  ;;  %v1340_v15 = vmul.f32 %v4163_v43, %v805_v39 }
  0x85   : > { %v1172_v40 = vadd.f32 %v1140_v3, %v1072_v57  ;;  %v1439_v50 = vmul.f32 %v4168_v44, %v904_v26  ;;  %v1837_v8 = vmul.f32 %v4377_v6, %v804_v21  ;;  %v1440_v16 = vmul.f32 %v4168_v44, %v905_v2  ;;  %v506_v3 = vld [vmem:[#allocation2 + $0xc6] sm:$0xff] }
  0x86   : > { %v1570_v55 = vadd.f32 %v1538_v17, %v4537_v25  ;;  %v1638_v23 = vmul.f32 %v4297_v7, %v4562_v52  ;;  %v1738_v1 = vmul.f32 %v4359_v62, %v705_v58  ;;  %v4607_v60 = vadd.f32 %v941_v59, %v873_v4 }
  0x87   : > { %v1272_v61 = vadd.f32 %v1240_v63, %v1172_v40  ;;  %v1471_v51 = vadd.f32 %v1439_v50, %v1371_v37  ;;  %v1869_v43 = vadd.f32 %v1837_v8, %v1769_v30  ;;  %v1838_v53 = vmul.f32 %v4377_v6, %v805_v39  ;;  %v606_v63 = vld [vmem:[#allocation2 + $0xc7] sm:$0xff] }
  0x88   : > { %v1670_v35 = vadd.f32 %v1638_v23, %v1570_v55  ;;  %v1937_v22 = vmul.f32 %v4386_v28, %v904_v26  ;;  %v2037_v44 = vmul.f32 %v4198_v9, %v4560_v48  ;;  %v1938_v25 = vmul.f32 %v4386_v28, %v905_v2  ;;  %v706_v8 = vld [vmem:[#allocation2 + $0xc8] sm:$0xff] }
  0x89   : > { %v1372_v5 = vadd.f32 %v1340_v15, %v1272_v61  ;;  %v2137_v57 = vmul.f32 %v4203_v10, %v4562_v52  ;;  %v2336_v59 = vmul.f32 %v4245_v34, %v804_v21  ;;  %v2237_v17 = vmul.f32 %v4225_v24, %v705_v58  ;;  %v4625_v21 = vld [vmem:[%s6460_s1] ss:$0 sm:$0xff] }
  0x8a   : > { %v1770_v4 = vadd.f32 %v1738_v1, %v1670_v35  ;;  %v1969_v30 = vadd.f32 %v1937_v22, %v1869_v43  ;;  %v2069_v37 = vadd.f32 %v2037_v44, %v4554_v54  ;;  %v2337_v13 = vmul.f32 %v4245_v34, %v805_v39  ;;  %v4631_v54 = vld [vmem:[%s6460_s1 + $0x1] ss:$0 sm:$0xff] }
  0x8b   : > { %v2368_v40 = vadd.f32 %v2336_v59, %v2268_v18  ;;  %v2436_v15 = vmul.f32 %v4258_v46, %v904_v26  ;;  %v2437_v50 = vmul.f32 %v4258_v46, %v905_v2  ;;  %v542_v1 = vmul.f32 %v4625_v21, %v506_v3 }
  0x8c   : > { %v1870_v55 = vadd.f32 %v1838_v53, %v1770_v4  ;;  %v2169_v23 = vadd.f32 %v2137_v57, %v2069_v37  ;;  %v642_v58 = vmul.f32 %v4631_v54, %v606_v63  ;;  %v4634_v39 = vadd.f32 %v1440_v16, %v1372_v5  ;;  %v4650_v53 = vld [vmem:[%s6460_s1 + $0x2] ss:$0 sm:$0xff]  ;;  %v4657_v5 = vld [vmem:[#allocation2 + $0xce] sm:$0xff] }
  0x8d   : > { %v4638_v26 = vmul.f32 %v4311_v19, %v4560_v48  ;;  %v4642_v2 = vmul.f32 %v4318_v27, %v4562_v52  ;;  %v1041_v18 = vmul.f32 %v4145_v36, %v506_v3  ;;  %v4645_v43 = vadd.f32 %v2436_v15, %v2368_v40  ;;  %v4662_v37 = vld [vmem:[#allocation2 + $0xcf] sm:$0xff] }
  0x8e   : > { %v2269_v61 = vadd.f32 %v2237_v17, %v2169_v23  ;;  %v674_v35 = vadd.f32 %v642_v58, %v542_v1  ;;  %v742_v16 = vmul.f32 %v4650_v53, %v706_v8  ;;  %v4653_v22 = vadd.f32 %v1938_v25, %v1870_v55  ;;  %v4671_v23 = vld [vmem:[#allocation2 + $0xd0] sm:$0xff] }
  0x8f   : > { %6488 = vst [vmem:[#allocation26_spill] sm:$0xff] %v4638_v26  ;;  %6489 = vst [vmem:[#allocation27_spill] sm:$0xff] %v4642_v2  ;;  %v1073_v48 = vadd.f32 %v1041_v18, %v972_v29  ;;  %v1141_v44 = vmul.f32 %v4153_v41, %v606_v63  ;;  %v1539_v52 = vmul.f32 %v4292_v56, %v506_v3  ;;  %v4665_v41 = vld [vmem:[#allocation2 + $0xc9] sm:$0xff] }
  0x90   : > { %6490 = vst [vmem:[#allocation28_spill] sm:$0xff] %v4645_v43  ;;  %v2369_v36 = vadd.f32 %v2337_v13, %v2269_v61  ;;  %v1241_v57 = vmul.f32 %v4158_v42, %v706_v8  ;;  %v1639_v59 = vmul.f32 %v4297_v7, %v606_v63  ;;  %v2038_v4 = vmul.f32 %v4198_v9, %v506_v3  ;;  %v4673_v9 = vld [vmem:[#allocation2 + $0xd1] sm:$0xff] }
  0x91   : > { %v774_v17 = vadd.f32 %v742_v16, %v674_v35  ;;  %v1173_v25 = vadd.f32 %v1141_v44, %v1073_v48  ;;  %v1571_v40 = vadd.f32 %v1539_v52, %v1471_v51  ;;  %v1739_v29 = vmul.f32 %v4359_v62, %v706_v8  ;;  %v419_v1 = vld [vmem:[%s4183_s24 + $0xb0] sm:$0xff] }
  0x92   : > { %v2070_v15 = vadd.f32 %v2038_v4, %v1969_v30  ;;  %v2138_v55 = vmul.f32 %v4203_v10, %v606_v63  ;;  %v2238_v13 = vmul.f32 %v4225_v24, %v706_v8  ;;  %v543_v42 = vmul.f32 %v4625_v21, %v4657_v5  ;;  %v4683_v10 = vld [vmem:[#allocation2 + $0xca] sm:$0xff]  ;;  %v4685_v8 = vld [vmem:[#allocation2 + $0xd2] sm:$0xff]  ;;  %452 = vst.msk [vmem:[#allocation2 + $0x1a8] sm:$0xff] %vm315_vm0, %v419_v1  ;;  %v4712_v4 = vld [vmem:[%s6460_s1 + $0x4] ss:$0 sm:$0xff] }
  0x93   : > { %v4676_v58 = vadd.f32 %v2437_v50, %v2369_v36  ;;  %v1671_v51 = vadd.f32 %v1639_v59, %v1571_v40  ;;  %v4679_v18 = vmul.f32 %v4311_v19, %v506_v3  ;;  %v643_v30 = vmul.f32 %v4631_v54, %v4662_v37  ;;  %v4694_v50 = vld [vmem:[%s6460_s1 + $0x3] ss:$0 sm:$0xff] }
  0x94   : > { %v1273_v61 = vadd.f32 %v1241_v57, %v1173_v25  ;;  %v2170_v35 = vadd.f32 %v2138_v55, %v2070_v15  ;;  %v4689_v16 = vmul.f32 %v4318_v27, %v606_v63  ;;  %v842_v3 = vmul.f32 %v4694_v50, %v4665_v41  ;;  %v4705_v63 = vld [vmem:[%s6460_s1 + $0x8] ss:$0 sm:$0xff] }
  0x95   : > { %6491 = vst [vmem:[#allocation29_spill] sm:$0xff] %v4676_v58  ;;  %6492 = vst [vmem:[#allocation30_spill] sm:$0xff] %v4679_v18  ;;  %v675_v48 = vadd.f32 %v643_v30, %v543_v42  ;;  %v743_v44 = vmul.f32 %v4650_v53, %v4671_v23  ;;  %v843_v52 = vmul.f32 %v4694_v50, %v4673_v9  ;;  %v4729_v42 = vld [vmem:[%s6460_s1 + $0xb] ss:$0 sm:$0xff]  ;;  %v420_v18 = vld [vmem:[%s4183_s24 + $0xb8] sm:$0xff] }
  0x96   : > { %6493 = vst [vmem:[#allocation31_spill] sm:$0xff] %v4689_v16  ;;  %v1042_v36 = vmul.f32 %v4705_v63, %v4657_v5  ;;  %v1771_v57 = vadd.f32 %v1739_v29, %v1671_v51  ;;  %v874_v59 = vadd.f32 %v842_v3, %v774_v17  ;;  %v942_v25 = vmul.f32 %v4712_v4, %v4683_v10  ;;  %v4722_v29 = vld [vmem:[%s6460_s1 + $0x9] ss:$0 sm:$0xff] }
  0x97   : > { %v943_v40 = vmul.f32 %v4712_v4, %v4685_v8  ;;  %v775_v15 = vadd.f32 %v743_v44, %v675_v48  ;;  %v1142_v17 = vmul.f32 %v4722_v29, %v4662_v37  ;;  %v1341_v1 = vmul.f32 %v4729_v42, %v4665_v41  ;;  %453 = vst.msk [vmem:[#allocation2 + $0x1b0] sm:$0xff] %vm315_vm0, %v420_v18 }
  0x98   : > { %v1074_v55 = vadd.f32 %v1042_v36, %v4607_v60  ;;  %v2270_v51 = vadd.f32 %v2238_v13, %v2170_v35  ;;  %v4736_v60 = vld [vmem:[%s6460_s1 + $0xa] ss:$0 sm:$0xff]  ;;  %v1342_v3 = vmul.f32 %v4729_v42, %v4673_v9  ;;  %v1540_v48 = vmul.f32 %v4292_v56, %v4657_v5  ;;  %v4748_v13 = vld [vmem:[%s6460_s1 + $0xc] ss:$0 sm:$0xff] }
  0x99   : > { %v1242_v30 = vmul.f32 %v4736_v60, %v4671_v23  ;;  %v875_v44 = vadd.f32 %v843_v52, %v775_v15  ;;  %v974_v36 = vadd.f32 %v942_v25, %v874_v59  ;;  %v1373_v16 = vadd.f32 %v1341_v1, %v1273_v61  ;;  %v4769_v1 = vld [vmem:[%s6460_s1 + $0x18] ss:$0 sm:$0xff] }
  0x9a   : > { %v1174_v58 = vadd.f32 %v1142_v17, %v1074_v55  ;;  %v1441_v35 = vmul.f32 %v4748_v13, %v4683_v10  ;;  %v1572_v43 = vadd.f32 %v1540_v48, %v4634_v39  ;;  %v1640_v2 = vmul.f32 %v4297_v7, %v4662_v37 }
  0x9b   : > { %v1839_v52 = vmul.f32 %v4377_v6, %v4665_v41  ;;  %v1442_v59 = vmul.f32 %v4748_v13, %v4685_v8  ;;  %v1740_v25 = vmul.f32 %v4359_v62, %v4671_v23  ;;  %v1840_v15 = vmul.f32 %v4377_v6, %v4673_v9 }
  0x9c   : > { %v1274_v61 = vadd.f32 %v1242_v30, %v1174_v58  ;;  %v4764_v55 = vadd.f32 %v943_v40, %v875_v44  ;;  %v1672_v39 = vadd.f32 %v1640_v2, %v1572_v43  ;;  %v2039_v58 = vmul.f32 %v4769_v1, %v4657_v5  ;;  %v608_v44 = vld [vmem:[#allocation2 + $0xe7] sm:$0xff] }
  0x9d   : > { %v1871_v17 = vadd.f32 %v1839_v52, %v1771_v57  ;;  %v1473_v30 = vadd.f32 %v1441_v35, %v1373_v16  ;;  %v1939_v48 = vmul.f32 %v4386_v28, %v4683_v10  ;;  %v2338_v26 = vmul.f32 %v4245_v34, %v4665_v41  ;;  %v4783_v57 = vld [vmem:[%s6460_s1 + $0x19] ss:$0 sm:$0xff] }
  0x9e   : > { %v1374_v18 = vadd.f32 %v1342_v3, %v1274_v61  ;;  %v1772_v40 = vadd.f32 %v1740_v25, %v1672_v39  ;;  %v1940_v2 = vmul.f32 %v4386_v28, %v4685_v8  ;;  %v2071_v43 = vadd.f32 %v2039_v58, %v4653_v22  ;;  %v508_v3 = vld [vmem:[#allocation2 + $0xe6] sm:$0xff] }
  0x9f   : > { %v2139_v16 = vmul.f32 %v4783_v57, %v4662_v37  ;;  %v1971_v35 = vadd.f32 %v1939_v48, %v1871_v17  ;;  %v2239_v41 = vmul.f32 %v4225_v24, %v4671_v23  ;;  %v2339_v52 = vmul.f32 %v4245_v34, %v4673_v9 }
  0xa0   : > { %v2370_v61 = vadd.f32 %v2338_v26, %v2270_v51  ;;  %v4791_v25 = vadd.f32 %v1442_v59, %v1374_v18  ;;  %v1872_v22 = vadd.f32 %v1840_v15, %v1772_v40  ;;  %v2438_v58 = vmul.f32 %v4258_v46, %v4683_v10  ;;  %v4816_v40 = vld [vmem:[#allocation2 + $0xee] sm:$0xff] }
  0xa1   : > { %v2171_v39 = vadd.f32 %v2139_v16, %v2071_v43  ;;  %v2439_v12 = vmul.f32 %v4258_v46, %v4685_v8  ;;  %v4799_v17 = vmul.f32 %v4311_v19, %v4657_v5  ;;  %v544_v24 = vmul.f32 %v4625_v21, %v508_v3 }
  0xa2   : > { %v644_v34 = vmul.f32 %v4631_v54, %v608_v44  ;;  %v4803_v23 = vadd.f32 %v2438_v58, %v2370_v61  ;;  %v4807_v9 = vmul.f32 %v4318_v27, %v4662_v37  ;;  %v1043_v10 = vmul.f32 %v4705_v63, %v508_v3  ;;  %v4818_v37 = vld [vmem:[#allocation2 + $0xef] sm:$0xff]  ;;  %v421_v58 = vld [vmem:[%s4183_s24 + $0xc0] sm:$0xff] }
  0xa3   : > { %6494 = vst [vmem:[#allocation32_spill] sm:$0xff] %v4799_v17  ;;  %v2271_v26 = vadd.f32 %v2239_v41, %v2171_v39  ;;  %v4810_v51 = vadd.f32 %v1940_v2, %v1872_v22  ;;  %v744_v8 = vmul.f32 %v4650_v53, %v708_v32  ;;  %v1541_v5 = vmul.f32 %v4292_v56, %v508_v3  ;;  %v4823_v61 = vld [vmem:[#allocation2 + $0xe9] sm:$0xff] }
  0xa4   : > { %6495 = vst [vmem:[#allocation33_spill] sm:$0xff] %v4803_v23  ;;  %6496 = vst [vmem:[#allocation34_spill] sm:$0xff] %v4807_v9  ;;  %v676_v46 = vadd.f32 %v644_v34, %v544_v24  ;;  %v1075_v15 = vadd.f32 %v1043_v10, %v974_v36  ;;  %v1143_v18 = vmul.f32 %v4722_v29, %v608_v44  ;;  %v4826_v39 = vld [vmem:[#allocation2 + $0xf0] sm:$0xff]  ;;  %v4832_v34 = vld [vmem:[%s6460_s1 + $0x1a] ss:$0 sm:$0xff] }
  0xa5   : > { %v2371_v59 = vadd.f32 %v2339_v52, %v2271_v26  ;;  %v2040_v48 = vmul.f32 %v4769_v1, %v508_v3  ;;  %v1243_v43 = vmul.f32 %v4736_v60, %v708_v32  ;;  %v1573_v2 = vadd.f32 %v1541_v5, %v1473_v30  ;;  %454 = vst.msk [vmem:[#allocation2 + $0x1c8] sm:$0xff] %vm315_vm0, %v421_v58 }
  0xa6   : > { %v1641_v16 = vmul.f32 %v4297_v7, %v608_v44  ;;  %v1741_v41 = vmul.f32 %v4359_v62, %v708_v32  ;;  %v776_v56 = vadd.f32 %v744_v8, %v676_v46  ;;  %v1175_v52 = vadd.f32 %v1143_v18, %v1075_v15  ;;  %v908_v15 = vld [vmem:[#allocation2 + $0xea] sm:$0xff] }
  0xa7   : > { %v2072_v36 = vadd.f32 %v2040_v48, %v1971_v35  ;;  %v2140_v22 = vmul.f32 %v4783_v57, %v608_v44  ;;  %v2240_v7 = vmul.f32 %v4832_v34, %v708_v32  ;;  %v545_v30 = vmul.f32 %v4625_v21, %v4816_v40  ;;  %v809_v35 = vld [vmem:[#allocation2 + $0xf1] sm:$0xff] }
  0xa8   : > { %v1673_v24 = vadd.f32 %v1641_v16, %v1573_v2  ;;  %v645_v26 = vmul.f32 %v4631_v54, %v4818_v37  ;;  %v4840_v10 = vadd.f32 %v2439_v12, %v2371_v59  ;;  %v4843_v8 = vmul.f32 %v4311_v19, %v508_v3  ;;  %v909_v16 = vld [vmem:[#allocation2 + $0xf2] sm:$0xff] }
  0xa9   : > { %v2172_v46 = vadd.f32 %v2140_v22, %v2072_v36  ;;  %v844_v5 = vmul.f32 %v4694_v50, %v4823_v61  ;;  %v1275_v32 = vadd.f32 %v1243_v43, %v1175_v52  ;;  %v4848_v18 = vmul.f32 %v4318_v27, %v608_v44 }
  0xaa   : > { %6497 = vst [vmem:[#allocation35_spill] sm:$0xff] %v4840_v10  ;;  %6498 = vst [vmem:[#allocation36_spill] sm:$0xff] %v4843_v8  ;;  %v677_v48 = vadd.f32 %v645_v26, %v545_v30  ;;  %v745_v2 = vmul.f32 %v4650_v53, %v4826_v39  ;;  %v1773_v58 = vadd.f32 %v1741_v41, %v1673_v24 }
  0xab   : > { %6499 = vst [vmem:[#allocation37_spill] sm:$0xff] %v4848_v18  ;;  %v845_v12 = vmul.f32 %v4694_v50, %v809_v35  ;;  %v876_v59 = vadd.f32 %v844_v5, %v776_v56  ;;  %v1044_v19 = vmul.f32 %v4705_v63, %v4816_v40  ;;  %v2272_v3 = vadd.f32 %v2240_v7, %v2172_v46  ;;  %v4867_v7 = vld [vmem:[%s6460_s1 + $0x10] ss:$0 sm:$0xff]  ;;  %v422_v46 = vld [vmem:[%s4183_s24 + $0xc8] sm:$0xff] }
  0xac   : > { %v777_v36 = vadd.f32 %v745_v2, %v677_v48  ;;  %v944_v43 = vmul.f32 %v4712_v4, %v908_v15  ;;  %v1343_v27 = vmul.f32 %v4729_v42, %v4823_v61  ;;  %v945_v44 = vmul.f32 %v4712_v4, %v909_v16  ;;  %455 = vst.msk [vmem:[#allocation2 + $0x1d0] sm:$0xff] %vm315_vm0, %v422_v46 }
  0xad   : > { %v1076_v52 = vadd.f32 %v1044_v19, %v4764_v55  ;;  %v1144_v41 = vmul.f32 %v4722_v29, %v4818_v37  ;;  %v1244_v56 = vmul.f32 %v4736_v60, %v4826_v39  ;;  %v1542_v26 = vmul.f32 %v4867_v7, %v4816_v40 }
  0xae   : > { %v877_v22 = vadd.f32 %v845_v12, %v777_v36  ;;  %v976_v24 = vadd.f32 %v944_v43, %v876_v59  ;;  %v1375_v30 = vadd.f32 %v1343_v27, %v1275_v32  ;;  %v1344_v55 = vmul.f32 %v4729_v42, %v809_v35  ;;  %v4882_v59 = vld [vmem:[%s6460_s1 + $0x11] ss:$0 sm:$0xff] }
  0xaf   : > { %v1176_v5 = vadd.f32 %v1144_v41, %v1076_v52  ;;  %v1443_v48 = vmul.f32 %v4748_v13, %v908_v15  ;;  %v1841_v2 = vmul.f32 %v4377_v6, %v4823_v61  ;;  %v1444_v32 = vmul.f32 %v4748_v13, %v909_v16 }
  0xb0   : > { %v1574_v12 = vadd.f32 %v1542_v26, %v4791_v25  ;;  %v1642_v19 = vmul.f32 %v4882_v59, %v4818_v37  ;;  %v1742_v36 = vmul.f32 %v4359_v62, %v4826_v39  ;;  %v4888_v43 = vadd.f32 %v945_v44, %v877_v22  ;;  %v4900_v62 = vld [vmem:[%s6460_s1 + $0x1b] ss:$0 sm:$0xff]  ;;  %v610_v44 = vld [vmem:[#allocation2 + $0x107] sm:$0xff] }
  0xb1   : > { %v1276_v27 = vadd.f32 %v1244_v56, %v1176_v5  ;;  %v1475_v52 = vadd.f32 %v1443_v48, %v1375_v30  ;;  %v1873_v41 = vadd.f32 %v1841_v2, %v1773_v58  ;;  %v1842_v10 = vmul.f32 %v4377_v6, %v809_v35  ;;  %v510_v6 = vld [vmem:[#allocation2 + $0x106] sm:$0xff]  ;;  %v4911_v48 = vld [vmem:[%s6460_s1 + $0x1c] ss:$0 sm:$0xff] }
  0xb2   : > { %v1674_v46 = vadd.f32 %v1642_v19, %v1574_v12  ;;  %v1941_v25 = vmul.f32 %v4386_v28, %v908_v15  ;;  %v2041_v26 = vmul.f32 %v4769_v1, %v4816_v40  ;;  %v1942_v8 = vmul.f32 %v4386_v28, %v909_v16  ;;  %v710_v12 = vld [vmem:[#allocation2 + $0x108] sm:$0xff] }
  0xb3   : > { %v1376_v18 = vadd.f32 %v1344_v55, %v1276_v27  ;;  %v2141_v23 = vmul.f32 %v4783_v57, %v4818_v37  ;;  %v2340_v58 = vmul.f32 %v4900_v62, %v4823_v61  ;;  %v2241_v28 = vmul.f32 %v4832_v34, %v4826_v39 }
  0xb4   : > { %v1774_v56 = vadd.f32 %v1742_v36, %v1674_v46  ;;  %v1973_v22 = vadd.f32 %v1941_v25, %v1873_v41  ;;  %v2073_v30 = vadd.f32 %v2041_v26, %v4810_v51  ;;  %v2341_v5 = vmul.f32 %v4900_v62, %v809_v35  ;;  %v4922_v35 = vld [vmem:[%s6460_s1 + $0x20] ss:$0 sm:$0xff] }
  0xb5   : > { %v2372_v55 = vadd.f32 %v2340_v58, %v2272_v3  ;;  %v2440_v2 = vmul.f32 %v4911_v48, %v908_v15  ;;  %v2441_v61 = vmul.f32 %v4911_v48, %v909_v16  ;;  %v546_v51 = vmul.f32 %v4625_v21, %v510_v6  ;;  %v4945_v58 = vld [vmem:[#allocation2 + $0x10e] sm:$0xff] }
  0xb6   : > { %v1874_v19 = vadd.f32 %v1842_v10, %v1774_v56  ;;  %v2173_v36 = vadd.f32 %v2141_v23, %v2073_v30  ;;  %v646_v27 = vmul.f32 %v4631_v54, %v610_v44  ;;  %v4917_v39 = vadd.f32 %v1444_v32, %v1376_v18  ;;  %v4931_v10 = vld [vmem:[%s6460_s1 + $0x21] ss:$0 sm:$0xff] }
  0xb7   : > { %v4926_v3 = vmul.f32 %v4922_v35, %v4816_v40  ;;  %v4935_v23 = vmul.f32 %v4931_v10, %v4818_v37  ;;  %v1045_v15 = vmul.f32 %v4705_v63, %v510_v6  ;;  %v4938_v16 = vadd.f32 %v2440_v2, %v2372_v55  ;;  %v4950_v55 = vld [vmem:[#allocation2 + $0x10f] sm:$0xff] }
  0xb8   : > { %v2273_v18 = vadd.f32 %v2241_v28, %v2173_v36  ;;  %v678_v32 = vadd.f32 %v646_v27, %v546_v51  ;;  %v746_v41 = vmul.f32 %v4650_v53, %v710_v12  ;;  %v4941_v46 = vadd.f32 %v1942_v8, %v1874_v19 }
  0xb9   : > { %6500 = vst [vmem:[#allocation38_spill] sm:$0xff] %v4926_v3  ;;  %6501 = vst [vmem:[#allocation39_spill] sm:$0xff] %v4935_v23  ;;  %v1077_v40 = vadd.f32 %v1045_v15, %v976_v24  ;;  %v1145_v25 = vmul.f32 %v4722_v29, %v610_v44  ;;  %v1543_v26 = vmul.f32 %v4867_v7, %v510_v6  ;;  %v4955_v24 = vld [vmem:[%s6460_s1 + $0x12] ss:$0 sm:$0xff] }
  0xba   : > { %6502 = vst [vmem:[#allocation40_spill] sm:$0xff] %v4938_v16  ;;  %v2373_v56 = vadd.f32 %v2341_v5, %v2273_v18  ;;  %v1245_v37 = vmul.f32 %v4736_v60, %v710_v12  ;;  %v1643_v30 = vmul.f32 %v4882_v59, %v610_v44  ;;  %v2042_v28 = vmul.f32 %v4769_v1, %v510_v6  ;;  %v810_v5 = vld [vmem:[#allocation2 + $0x109] sm:$0xff] }
  0xbb   : > { %v778_v2 = vadd.f32 %v746_v41, %v678_v32  ;;  %v1177_v8 = vadd.f32 %v1145_v25, %v1077_v40  ;;  %v1575_v19 = vadd.f32 %v1543_v26, %v1475_v52  ;;  %v1743_v36 = vmul.f32 %v4955_v24, %v710_v12  ;;  %v711_v16 = vld [vmem:[#allocation2 + $0x110] sm:$0xff] }
  0xbc   : > { %v2074_v51 = vadd.f32 %v2042_v28, %v1973_v22  ;;  %v2142_v27 = vmul.f32 %v4783_v57, %v610_v44  ;;  %v2242_v15 = vmul.f32 %v4832_v34, %v710_v12  ;;  %v547_v18 = vmul.f32 %v4625_v21, %v4945_v58  ;;  %v811_v32 = vld [vmem:[#allocation2 + $0x111] sm:$0xff] }
  0xbd   : > { %v423_v41 = vld [vmem:[%s4183_s24 + $0xd0] sm:$0xff]  ;;  %v4963_v52 = vadd.f32 %v2441_v61, %v2373_v56  ;;  %v1675_v40 = vadd.f32 %v1643_v30, %v1575_v19  ;;  %v4966_v25 = vmul.f32 %v4922_v35, %v510_v6  ;;  %v647_v26 = vmul.f32 %v4631_v54, %v4950_v55 }
  0xbe   : > { %v910_v22 = vld [vmem:[#allocation2 + $0x10a] sm:$0xff]  ;;  %v911_v28 = vld [vmem:[#allocation2 + $0x112] sm:$0xff]  ;;  %456 = vst.msk [vmem:[#allocation2 + $0x1e8] sm:$0xff] %vm315_vm0, %v423_v41  ;;  %v1277_v12 = vadd.f32 %v1245_v37, %v1177_v8  ;;  %v2174_v23 = vadd.f32 %v2142_v27, %v2074_v51  ;;  %v4972_v3 = vmul.f32 %v4931_v10, %v610_v44  ;;  %v846_v9 = vmul.f32 %v4694_v50, %v810_v5 }
  0xbf   : > { %6503 = vst [vmem:[#allocation41_spill] sm:$0xff] %v4963_v52  ;;  %6504 = vst [vmem:[#allocation42_spill] sm:$0xff] %v4966_v25  ;;  %v679_v61 = vadd.f32 %v647_v26, %v547_v18  ;;  %v747_v56 = vmul.f32 %v4650_v53, %v711_v16  ;;  %v847_v6 = vmul.f32 %v4694_v50, %v811_v32 }
  0xc0   : > { %6505 = vst [vmem:[#allocation43_spill] sm:$0xff] %v4972_v3  ;;  %v1046_v30 = vmul.f32 %v4705_v63, %v4945_v58  ;;  %v1775_v19 = vadd.f32 %v1743_v36, %v1675_v40  ;;  %v878_v52 = vadd.f32 %v846_v9, %v778_v2  ;;  %v946_v41 = vmul.f32 %v4712_v4, %v910_v22 }
  0xc1   : > { %v947_v37 = vmul.f32 %v4712_v4, %v911_v28  ;;  %v779_v8 = vadd.f32 %v747_v56, %v679_v61  ;;  %v1146_v51 = vmul.f32 %v4722_v29, %v4950_v55  ;;  %v1345_v27 = vmul.f32 %v4729_v42, %v810_v5  ;;  %v424_v61 = vld [vmem:[%s4183_s24 + $0xd8] sm:$0xff] }
  0xc2   : > { %v1078_v44 = vadd.f32 %v1046_v30, %v4888_v43  ;;  %v2274_v18 = vadd.f32 %v2242_v15, %v2174_v23  ;;  %v1246_v26 = vmul.f32 %v4736_v60, %v711_v16  ;;  %v1346_v3 = vmul.f32 %v4729_v42, %v811_v32  ;;  %v4997_v23 = vld [vmem:[%s6460_s1 + $0x13] ss:$0 sm:$0xff]  ;;  %457 = vst.msk [vmem:[#allocation2 + $0x1f0] sm:$0xff] %vm315_vm0, %v424_v61  ;;  %v5011_v61 = vld [vmem:[%s6460_s1 + $0x14] ss:$0 sm:$0xff] }
  0xc3   : > { %v1544_v9 = vmul.f32 %v4867_v7, %v4945_v58  ;;  %v879_v2 = vadd.f32 %v847_v6, %v779_v8  ;;  %v978_v36 = vadd.f32 %v946_v41, %v878_v52  ;;  %v1377_v25 = vadd.f32 %v1345_v27, %v1277_v12 }
  0xc4   : > { %v1178_v40 = vadd.f32 %v1146_v51, %v1078_v44  ;;  %v1445_v43 = vmul.f32 %v4748_v13, %v910_v22  ;;  %v1644_v30 = vmul.f32 %v4882_v59, %v4950_v55  ;;  %v1843_v15 = vmul.f32 %v4997_v23, %v810_v5 }
  0xc5   : > { %v1576_v56 = vadd.f32 %v1544_v9, %v4917_v39  ;;  %v1446_v12 = vmul.f32 %v4748_v13, %v911_v28  ;;  %v1744_v6 = vmul.f32 %v4955_v24, %v711_v16  ;;  %v1844_v41 = vmul.f32 %v4997_v23, %v811_v32 }
  0xc6   : > { %v1278_v52 = vadd.f32 %v1246_v26, %v1178_v40  ;;  %v5004_v39 = vadd.f32 %v947_v37, %v879_v2  ;;  %v1875_v44 = vadd.f32 %v1843_v15, %v1775_v19  ;;  %v2043_v51 = vmul.f32 %v4769_v1, %v4945_v58 }
  0xc7   : > { %v1676_v8 = vadd.f32 %v1644_v30, %v1576_v56  ;;  %v1477_v9 = vadd.f32 %v1445_v43, %v1377_v25  ;;  %v1943_v26 = vmul.f32 %v5011_v61, %v910_v22  ;;  %v2342_v40 = vmul.f32 %v4900_v62, %v810_v5  ;;  %v512_v56 = vld [vmem:[#allocation2 + $0x126] sm:$0xff] }
  0xc8   : > { %v1378_v27 = vadd.f32 %v1346_v3, %v1278_v52  ;;  %v1944_v37 = vmul.f32 %v5011_v61, %v911_v28  ;;  %v2075_v2 = vadd.f32 %v2043_v51, %v4941_v46  ;;  %v2143_v19 = vmul.f32 %v4783_v57, %v4950_v55  ;;  %v612_v3 = vld [vmem:[#allocation2 + $0x127] sm:$0xff] }
  0xc9   : > { %v1776_v17 = vadd.f32 %v1744_v6, %v1676_v8  ;;  %v1975_v25 = vadd.f32 %v1943_v26, %v1875_v44  ;;  %v2243_v43 = vmul.f32 %v4832_v34, %v711_v16  ;;  %v2343_v30 = vmul.f32 %v4900_v62, %v811_v32  ;;  %v712_v8 = vld [vmem:[#allocation2 + $0x128] sm:$0xff] }
  0xca   : > { %v2374_v15 = vadd.f32 %v2342_v40, %v2274_v18  ;;  %v5021_v52 = vadd.f32 %v1446_v12, %v1378_v27  ;;  %v2175_v5 = vadd.f32 %v2143_v19, %v2075_v2  ;;  %v2442_v6 = vmul.f32 %v4911_v48, %v910_v22  ;;  %v5044_v19 = vld [vmem:[#allocation2 + $0x12e] sm:$0xff] }
  0xcb   : > { %v1876_v14 = vadd.f32 %v1844_v41, %v1776_v17  ;;  %v2443_v46 = vmul.f32 %v4911_v48, %v911_v28  ;;  %v5027_v51 = vmul.f32 %v4922_v35, %v4945_v58  ;;  %v548_v44 = vmul.f32 %v4625_v21, %v512_v56 }
  0xcc   : > { %v648_v16 = vmul.f32 %v4631_v54, %v612_v3  ;;  %v2275_v26 = vadd.f32 %v2243_v43, %v2175_v5  ;;  %v5031_v32 = vadd.f32 %v2442_v6, %v2374_v15  ;;  %v5035_v17 = vmul.f32 %v4931_v10, %v4950_v55  ;;  %v5046_v43 = vld [vmem:[#allocation2 + $0x12f] sm:$0xff] }
  0xcd   : > { %6506 = vst [vmem:[#allocation44_spill] sm:$0xff] %v5027_v51  ;;  %v1047_v22 = vmul.f32 %v4705_v63, %v512_v56  ;;  %v5038_v18 = vadd.f32 %v1944_v37, %v1876_v14  ;;  %v748_v12 = vmul.f32 %v4650_v53, %v712_v8  ;;  %v1545_v58 = vmul.f32 %v4867_v7, %v512_v56  ;;  %v812_v5 = vld [vmem:[#allocation2 + $0x129] sm:$0xff] }
  0xce   : > { %6507 = vst [vmem:[#allocation45_spill] sm:$0xff] %v5031_v32  ;;  %6508 = vst [vmem:[#allocation46_spill] sm:$0xff] %v5035_v17  ;;  %v680_v28 = vadd.f32 %v648_v16, %v548_v44  ;;  %v2375_v41 = vadd.f32 %v2343_v30, %v2275_v26  ;;  %v1147_v40 = vmul.f32 %v4722_v29, %v612_v3  ;;  %v713_v16 = vld [vmem:[#allocation2 + $0x130] sm:$0xff] }
  0xcf   : > { %v1079_v27 = vadd.f32 %v1047_v22, %v978_v36  ;;  %v2044_v2 = vmul.f32 %v4769_v1, %v512_v56  ;;  %v1247_v55 = vmul.f32 %v4736_v60, %v712_v8  ;;  %v1577_v15 = vadd.f32 %v1545_v58, %v1477_v9  ;;  %v813_v58 = vld [vmem:[#allocation2 + $0x131] sm:$0xff] }
  0xd0   : > { %v1645_v14 = vmul.f32 %v4882_v59, %v612_v3  ;;  %v1745_v37 = vmul.f32 %v4955_v24, %v712_v8  ;;  %v780_v6 = vadd.f32 %v748_v12, %v680_v28  ;;  %v2144_v36 = vmul.f32 %v4783_v57, %v612_v3  ;;  %v912_v12 = vld [vmem:[#allocation2 + $0x12a] sm:$0xff] }
  0xd1   : > { %v1179_v44 = vadd.f32 %v1147_v40, %v1079_v27  ;;  %v2076_v30 = vadd.f32 %v2044_v2, %v1975_v25  ;;  %v2244_v22 = vmul.f32 %v4832_v34, %v712_v8  ;;  %v549_v32 = vmul.f32 %v4625_v21, %v5044_v19 }
  0xd2   : > { %v1677_v26 = vadd.f32 %v1645_v14, %v1577_v15  ;;  %v649_v9 = vmul.f32 %v4631_v54, %v5046_v43  ;;  %v5057_v17 = vadd.f32 %v2443_v46, %v2375_v41  ;;  %v5060_v28 = vmul.f32 %v4922_v35, %v512_v56  ;;  %v913_v15 = vld [vmem:[#allocation2 + $0x132] sm:$0xff] }
  0xd3   : > { %v2176_v51 = vadd.f32 %v2144_v36, %v2076_v30  ;;  %v848_v25 = vmul.f32 %v4694_v50, %v812_v5  ;;  %v1279_v27 = vadd.f32 %v1247_v55, %v1179_v44  ;;  %v5064_v40 = vmul.f32 %v4931_v10, %v612_v3 }
  0xd4   : > { %6509 = vst [vmem:[#allocation47_spill] sm:$0xff] %v5057_v17  ;;  %6510 = vst [vmem:[#allocation48_spill] sm:$0xff] %v5060_v28  ;;  %v681_v8 = vadd.f32 %v649_v9, %v549_v32  ;;  %v749_v2 = vmul.f32 %v4650_v53, %v713_v16  ;;  %v1777_v14 = vadd.f32 %v1745_v37, %v1677_v26  ;;  %v425_v17 = vld [vmem:[%s4183_s24 + $0xe0] sm:$0xff] }
  0xd5   : > { %6511 = vst [vmem:[#allocation49_spill] sm:$0xff] %v5064_v40  ;;  %v849_v49 = vmul.f32 %v4694_v50, %v813_v58  ;;  %v880_v46 = vadd.f32 %v848_v25, %v780_v6  ;;  %v1048_v41 = vmul.f32 %v4705_v63, %v5044_v19  ;;  %v2276_v56 = vadd.f32 %v2244_v22, %v2176_v51 }
  0xd6   : > { %v781_v30 = vadd.f32 %v749_v2, %v681_v8  ;;  %v948_v55 = vmul.f32 %v4712_v4, %v912_v12  ;;  %v1347_v3 = vmul.f32 %v4729_v42, %v812_v5  ;;  %v949_v32 = vmul.f32 %v4712_v4, %v913_v15  ;;  %458 = vst.msk [vmem:[#allocation2 + $0x208] sm:$0xff] %vm315_vm0, %v425_v17 }
  0xd7   : > { %v1080_v44 = vadd.f32 %v1048_v41, %v5004_v39  ;;  %v1148_v37 = vmul.f32 %v4722_v29, %v5046_v43  ;;  %v1248_v6 = vmul.f32 %v4736_v60, %v713_v16  ;;  %v1546_v51 = vmul.f32 %v4867_v7, %v5044_v19  ;;  %v426_v39 = vld [vmem:[%s4183_s24 + $0xe8] sm:$0xff] }
  0xd8   : > { %v881_v36 = vadd.f32 %v849_v49, %v781_v30  ;;  %v980_v26 = vadd.f32 %v948_v55, %v880_v46  ;;  %v1379_v9 = vadd.f32 %v1347_v3, %v1279_v27  ;;  %v1348_v25 = vmul.f32 %v4729_v42, %v813_v58  ;;  %459 = vst.msk [vmem:[#allocation2 + $0x210] sm:$0xff] %vm315_vm0, %v426_v39 }
  0xd9   : > { %v1180_v22 = vadd.f32 %v1148_v37, %v1080_v44  ;;  %v1447_v8 = vmul.f32 %v4748_v13, %v912_v12  ;;  %v1845_v2 = vmul.f32 %v4997_v23, %v812_v5  ;;  %v1448_v41 = vmul.f32 %v4748_v13, %v913_v15 }
  0xda   : > { %v1578_v40 = vadd.f32 %v1546_v51, %v5021_v52  ;;  %v1646_v49 = vmul.f32 %v4882_v59, %v5046_v43  ;;  %v1746_v27 = vmul.f32 %v4955_v24, %v713_v16  ;;  %v5091_v46 = vadd.f32 %v949_v32, %v881_v36  ;;  %v514_v36 = vld [vmem:[#allocation2 + $0x146] sm:$0xff] }
  0xdb   : > { %v1280_v30 = vadd.f32 %v1248_v6, %v1180_v22  ;;  %v1479_v55 = vadd.f32 %v1447_v8, %v1379_v9  ;;  %v1877_v3 = vadd.f32 %v1845_v2, %v1777_v14  ;;  %v1846_v37 = vmul.f32 %v4997_v23, %v813_v58  ;;  %v614_v6 = vld [vmem:[#allocation2 + $0x147] sm:$0xff] }
  0xdc   : > { %v1678_v44 = vadd.f32 %v1646_v49, %v1578_v40  ;;  %v1945_v28 = vmul.f32 %v5011_v61, %v912_v12  ;;  %v2045_v52 = vmul.f32 %v4769_v1, %v5044_v19  ;;  %v1946_v45 = vmul.f32 %v5011_v61, %v913_v15  ;;  %v714_v49 = vld [vmem:[#allocation2 + $0x148] sm:$0xff] }
  0xdd   : > { %v1380_v51 = vadd.f32 %v1348_v25, %v1280_v30  ;;  %v2145_v17 = vmul.f32 %v4783_v57, %v5046_v43  ;;  %v2344_v32 = vmul.f32 %v4900_v62, %v812_v5  ;;  %v2245_v22 = vmul.f32 %v4832_v34, %v713_v16 }
  0xde   : > { %v1778_v9 = vadd.f32 %v1746_v27, %v1678_v44  ;;  %v1977_v14 = vadd.f32 %v1945_v28, %v1877_v3  ;;  %v2077_v40 = vadd.f32 %v2045_v52, %v5038_v18  ;;  %v2345_v8 = vmul.f32 %v4900_v62, %v813_v58 }
  0xdf   : > { %v2376_v2 = vadd.f32 %v2344_v32, %v2276_v56  ;;  %v2444_v25 = vmul.f32 %v4911_v48, %v912_v12  ;;  %v2445_v39 = vmul.f32 %v4911_v48, %v913_v15  ;;  %v550_v5 = vmul.f32 %v4625_v21, %v514_v36 }
  0xe0   : > { %v1878_v30 = vadd.f32 %v1846_v37, %v1778_v9  ;;  %v2177_v33 = vadd.f32 %v2145_v17, %v2077_v40  ;;  %v650_v11 = vmul.f32 %v4631_v54, %v614_v6  ;;  %v5108_v27 = vadd.f32 %v1448_v41, %v1380_v51  ;;  %v5126_v37 = vld [vmem:[#allocation2 + $0x14e] sm:$0xff] }
  0xe1   : > { %v5112_v18 = vmul.f32 %v4922_v35, %v5044_v19  ;;  %v5116_v16 = vmul.f32 %v4931_v10, %v5046_v43  ;;  %v1049_v58 = vmul.f32 %v4705_v63, %v514_v36  ;;  %v5119_v12 = vadd.f32 %v2444_v25, %v2376_v2  ;;  %v5131_v17 = vld [vmem:[#allocation2 + $0x14f] sm:$0xff] }
  0xe2   : > { %v2277_v28 = vadd.f32 %v2245_v22, %v2177_v33  ;;  %v682_v15 = vadd.f32 %v650_v11, %v550_v5  ;;  %v750_v56 = vmul.f32 %v4650_v53, %v714_v49  ;;  %v5122_v3 = vadd.f32 %v1946_v45, %v1878_v30  ;;  %v814_v9 = vld [vmem:[#allocation2 + $0x149] sm:$0xff]  ;;  %v815_v30 = vld [vmem:[#allocation2 + $0x151] sm:$0xff] }
  0xe3   : > { %6512 = vst [vmem:[#allocation50_spill] sm:$0xff] %v5119_v12  ;;  %v1081_v41 = vadd.f32 %v1049_v58, %v980_v26  ;;  %v1149_v44 = vmul.f32 %v4722_v29, %v614_v6  ;;  %v1547_v19 = vmul.f32 %v4867_v7, %v514_v36  ;;  %v1249_v43 = vmul.f32 %v4736_v60, %v714_v49  ;;  %v715_v25 = vld [vmem:[#allocation2 + $0x150] sm:$0xff] }
  0xe4   : > { %v2377_v52 = vadd.f32 %v2345_v8, %v2277_v28  ;;  %v1647_v51 = vmul.f32 %v4882_v59, %v614_v6  ;;  %v2046_v33 = vmul.f32 %v4769_v1, %v514_v36  ;;  %v782_v11 = vadd.f32 %v750_v56, %v682_v15  ;;  %v914_v15 = vld [vmem:[#allocation2 + $0x14a] sm:$0xff] }
  0xe5   : > { %v1181_v32 = vadd.f32 %v1149_v44, %v1081_v41  ;;  %v1579_v45 = vadd.f32 %v1547_v19, %v1479_v55  ;;  %v1747_v26 = vmul.f32 %v4955_v24, %v714_v49  ;;  %v2146_v22 = vmul.f32 %v4783_v57, %v614_v6 }
  0xe6   : > { %v2078_v40 = vadd.f32 %v2046_v33, %v1977_v14  ;;  %v2246_v2 = vmul.f32 %v4832_v34, %v714_v49  ;;  %v551_v8 = vmul.f32 %v4625_v21, %v5126_v37  ;;  %v5138_v5 = vadd.f32 %v2445_v39, %v2377_v52  ;;  %v915_v14 = vld [vmem:[#allocation2 + $0x152] sm:$0xff] }
  0xe7   : > { %v1679_v58 = vadd.f32 %v1647_v51, %v1579_v45  ;;  %v5141_v28 = vmul.f32 %v4922_v35, %v514_v36  ;;  %v651_v55 = vmul.f32 %v4631_v54, %v5131_v17  ;;  %v1281_v56 = vadd.f32 %v1249_v43, %v1181_v32 }
  0xe8   : > { %6513 = vst [vmem:[#allocation51_spill] sm:$0xff] %v5138_v5  ;;  %v2178_v41 = vadd.f32 %v2146_v22, %v2078_v40  ;;  %v5146_v49 = vmul.f32 %v4931_v10, %v614_v6  ;;  %v850_v44 = vmul.f32 %v4694_v50, %v814_v9  ;;  %v751_v39 = vmul.f32 %v4650_v53, %v715_v25 }
  0xe9   : > { %6514 = vst [vmem:[#allocation52_spill] sm:$0xff] %v5141_v28  ;;  %v683_v19 = vadd.f32 %v651_v55, %v551_v8  ;;  %v851_v36 = vmul.f32 %v4694_v50, %v815_v30  ;;  %v1050_v52 = vmul.f32 %v4705_v63, %v5126_v37  ;;  %v1779_v51 = vadd.f32 %v1747_v26, %v1679_v58  ;;  %v427_v26 = vld [vmem:[%s4183_s24 + $0xf0] sm:$0xff]  ;;  %v428_v58 = vld [vmem:[%s4183_s24 + $0xf8] sm:$0xff] }
  0xea   : > { %6515 = vst [vmem:[#allocation53_spill] sm:$0xff] %v5146_v49  ;;  %v882_v33 = vadd.f32 %v850_v44, %v782_v11  ;;  %v950_v43 = vmul.f32 %v4712_v4, %v914_v15  ;;  %v951_v32 = vmul.f32 %v4712_v4, %v915_v14  ;;  %v1150_v40 = vmul.f32 %v4722_v29, %v5131_v17 }
  0xeb   : > { %v783_v6 = vadd.f32 %v751_v39, %v683_v19  ;;  %v1082_v45 = vadd.f32 %v1050_v52, %v5091_v46  ;;  %v1349_v22 = vmul.f32 %v4729_v42, %v814_v9  ;;  %v2278_v8 = vadd.f32 %v2246_v2, %v2178_v41  ;;  %460 = vst.msk [vmem:[#allocation2 + $0x228] sm:$0xff] %vm315_vm0, %v427_v26 }
  0xec   : > { %v1250_v55 = vmul.f32 %v4736_v60, %v715_v25  ;;  %v1350_v5 = vmul.f32 %v4729_v42, %v815_v30  ;;  %v1548_v11 = vmul.f32 %v4867_v7, %v5126_v37  ;;  %v982_v49 = vadd.f32 %v950_v43, %v882_v33  ;;  %461 = vst.msk [vmem:[#allocation2 + $0x230] sm:$0xff] %vm315_vm0, %v428_v58 }
  0xed   : > { %v883_v44 = vadd.f32 %v851_v36, %v783_v6  ;;  %v1182_v19 = vadd.f32 %v1150_v40, %v1082_v45  ;;  %v1381_v39 = vadd.f32 %v1349_v22, %v1281_v56  ;;  %v1449_v46 = vmul.f32 %v4748_v13, %v914_v15 }
  0xee   : > { %v1580_v2 = vadd.f32 %v1548_v11, %v5108_v27  ;;  %v1648_v41 = vmul.f32 %v4882_v59, %v5131_v17  ;;  %v1847_v52 = vmul.f32 %v4997_v23, %v814_v9  ;;  %v1450_v12 = vmul.f32 %v4748_v13, %v915_v14 }
  0xef   : > { %v1282_v28 = vadd.f32 %v1250_v55, %v1182_v19  ;;  %v1748_v36 = vmul.f32 %v4955_v24, %v715_v25  ;;  %v1848_v56 = vmul.f32 %v4997_v23, %v815_v30  ;;  %v5175_v33 = vadd.f32 %v951_v32, %v883_v44  ;;  %v516_v44 = vld [vmem:[#allocation2 + $0x166] sm:$0xff] }
  0xf0   : > { %v1680_v43 = vadd.f32 %v1648_v41, %v1580_v2  ;;  %v1879_v6 = vadd.f32 %v1847_v52, %v1779_v51  ;;  %v2047_v45 = vmul.f32 %v4769_v1, %v5126_v37  ;;  %v1481_v40 = vadd.f32 %v1449_v46, %v1381_v39  ;;  %v616_v19 = vld [vmem:[#allocation2 + $0x167] sm:$0xff] }
  0xf1   : > { %v1382_v27 = vadd.f32 %v1350_v5, %v1282_v28  ;;  %v1947_v22 = vmul.f32 %v5011_v61, %v914_v15  ;;  %v2346_v11 = vmul.f32 %v4900_v62, %v814_v9  ;;  %v1948_v26 = vmul.f32 %v5011_v61, %v915_v14  ;;  %v716_v52 = vld [vmem:[#allocation2 + $0x168] sm:$0xff] }
  0xf2   : > { %v1780_v55 = vadd.f32 %v1748_v36, %v1680_v43  ;;  %v2079_v58 = vadd.f32 %v2047_v45, %v5122_v3  ;;  %v2147_v32 = vmul.f32 %v4783_v57, %v5131_v17  ;;  %v2247_v2 = vmul.f32 %v4832_v34, %v715_v25 }
  0xf3   : > { %v1979_v51 = vadd.f32 %v1947_v22, %v1879_v6  ;;  %v2347_v5 = vmul.f32 %v4900_v62, %v815_v30  ;;  %v2378_v28 = vadd.f32 %v2346_v11, %v2278_v8  ;;  %v5187_v39 = vadd.f32 %v1450_v12, %v1382_v27 }
  0xf4   : > { %v1880_v46 = vadd.f32 %v1848_v56, %v1780_v55  ;;  %v2179_v9 = vadd.f32 %v2147_v32, %v2079_v58  ;;  %v2446_v41 = vmul.f32 %v4911_v48, %v914_v15  ;;  %v2447_v3 = vmul.f32 %v4911_v48, %v915_v14  ;;  %v5210_v55 = vld [vmem:[#allocation2 + $0x16e] sm:$0xff] }
  0xf5   : > { %v5193_v36 = vmul.f32 %v4922_v35, %v5126_v37  ;;  %v552_v43 = vmul.f32 %v4625_v21, %v516_v44  ;;  %v652_v25 = vmul.f32 %v4631_v54, %v616_v19  ;;  %v5201_v12 = vmul.f32 %v4931_v10, %v5131_v17  ;;  %v5212_v58 = vld [vmem:[#allocation2 + $0x16f] sm:$0xff] }
  0xf6   : > { %v2279_v6 = vadd.f32 %v2247_v2, %v2179_v9  ;;  %v5197_v30 = vadd.f32 %v2446_v41, %v2378_v28  ;;  %v1051_v15 = vmul.f32 %v4705_v63, %v516_v44  ;;  %v5204_v8 = vadd.f32 %v1948_v26, %v1880_v46  ;;  %v717_v9 = vld [vmem:[#allocation2 + $0x170] sm:$0xff] }
  0xf7   : > { %v684_v14 = vadd.f32 %v652_v25, %v552_v43  ;;  %v752_v56 = vmul.f32 %v4650_v53, %v716_v52  ;;  %v1549_v37 = vmul.f32 %v4867_v7, %v516_v44  ;;  %v1151_v22 = vmul.f32 %v4722_v29, %v616_v19  ;;  %v816_v53 = vld [vmem:[#allocation2 + $0x169] sm:$0xff] }
  0xf8   : > { %6516 = vst [vmem:[#allocation54_spill] sm:$0xff] %v5197_v30  ;;  %v2379_v45 = vadd.f32 %v2347_v5, %v2279_v6  ;;  %v1083_v27 = vadd.f32 %v1051_v15, %v982_v49  ;;  %v2048_v11 = vmul.f32 %v4769_v1, %v516_v44  ;;  %v1251_v17 = vmul.f32 %v4736_v60, %v716_v52  ;;  %v817_v6 = vld [vmem:[#allocation2 + $0x171] sm:$0xff] }
  0xf9   : > { %v1581_v32 = vadd.f32 %v1549_v37, %v1481_v40  ;;  %v1649_v26 = vmul.f32 %v4882_v59, %v616_v19  ;;  %v1749_v2 = vmul.f32 %v4955_v24, %v716_v52  ;;  %v784_v28 = vadd.f32 %v752_v56, %v684_v14  ;;  %v916_v56 = vld [vmem:[#allocation2 + $0x16a] sm:$0xff] }
  0xfa   : > { %v1183_v46 = vadd.f32 %v1151_v22, %v1083_v27  ;;  %v2080_v5 = vadd.f32 %v2048_v11, %v1979_v51  ;;  %v2148_v49 = vmul.f32 %v4783_v57, %v616_v19  ;;  %v2248_v43 = vmul.f32 %v4832_v34, %v716_v52 }
  0xfb   : > { %v1681_v41 = vadd.f32 %v1649_v26, %v1581_v32  ;;  %v553_v25 = vmul.f32 %v4625_v21, %v5210_v55  ;;  %v653_v40 = vmul.f32 %v4631_v54, %v5212_v58  ;;  %v5223_v15 = vadd.f32 %v2447_v3, %v2379_v45  ;;  %v5235_v21 = vld [vmem:[%s6460_s1 + $0x2] ss:$0 sm:$0xff]  ;;  %v917_v3 = vld [vmem:[#allocation2 + $0x172] sm:$0xff] }
  0xfc   : > { %v2180_v37 = vadd.f32 %v2148_v49, %v2080_v5  ;;  %v5226_v14 = vmul.f32 %v4922_v35, %v516_v44  ;;  %v852_v51 = vmul.f32 %v4694_v50, %v816_v53  ;;  %v1283_v27 = vadd.f32 %v1251_v17, %v1183_v46 }
  0xfd   : > { %6517 = vst [vmem:[#allocation55_spill] sm:$0xff] %v5223_v15  ;;  %v5230_v22 = vmul.f32 %v4931_v10, %v616_v19  ;;  %v685_v52 = vadd.f32 %v653_v40, %v553_v25  ;;  %v753_v54 = vmul.f32 %v5235_v21, %v717_v9  ;;  %v1781_v45 = vadd.f32 %v1749_v2, %v1681_v41 }
  0xfe   : > { %6518 = vst [vmem:[#allocation56_spill] sm:$0xff] %v5226_v14  ;;  %v853_v44 = vmul.f32 %v4694_v50, %v817_v6  ;;  %v884_v11 = vadd.f32 %v852_v51, %v784_v28  ;;  %v1052_v32 = vmul.f32 %v4705_v63, %v5210_v55  ;;  %v2280_v17 = vadd.f32 %v2248_v43, %v2180_v37 }
  0xff   : > { %6519 = vst [vmem:[#allocation57_spill] sm:$0xff] %v5230_v22  ;;  %v785_v26 = vadd.f32 %v753_v54, %v685_v52  ;;  %v952_v19 = vmul.f32 %v4712_v4, %v916_v56  ;;  %v1351_v46 = vmul.f32 %v4729_v42, %v816_v53  ;;  %v953_v5 = vmul.f32 %v4712_v4, %v917_v3 }
 0x100   : > { %v1084_v49 = vadd.f32 %v1052_v32, %v5175_v33  ;;  %v1152_v25 = vmul.f32 %v4722_v29, %v5212_v58  ;;  %v1252_v2 = vmul.f32 %v4736_v60, %v717_v9  ;;  %v1550_v63 = vmul.f32 %v4867_v7, %v5210_v55 }
 0x101   : > { %v885_v50 = vadd.f32 %v853_v44, %v785_v26  ;;  %v984_v28 = vadd.f32 %v952_v19, %v884_v11  ;;  %v1383_v41 = vadd.f32 %v1351_v46, %v1283_v27  ;;  %v1352_v40 = vmul.f32 %v4729_v42, %v817_v6 }
 0x102   : > { %v1184_v43 = vadd.f32 %v1152_v25, %v1084_v49  ;;  %v1451_v37 = vmul.f32 %v4748_v13, %v916_v56  ;;  %v1849_v4 = vmul.f32 %v4997_v23, %v816_v53  ;;  %v1452_v33 = vmul.f32 %v4748_v13, %v917_v3  ;;  %v618_v49 = vld [vmem:[#allocation2 + $0x187] sm:$0xff] }
 0x103   : > { %v1582_v51 = vadd.f32 %v1550_v63, %v5187_v39  ;;  %v1650_v29 = vmul.f32 %v4882_v59, %v5212_v58  ;;  %v1750_v60 = vmul.f32 %v4955_v24, %v717_v9  ;;  %v5258_v27 = vadd.f32 %v953_v5, %v885_v50  ;;  %v518_v5 = vld [vmem:[#allocation2 + $0x186] sm:$0xff] }
 0x104   : > { %v1284_v52 = vadd.f32 %v1252_v2, %v1184_v43  ;;  %v1483_v54 = vadd.f32 %v1451_v37, %v1383_v41  ;;  %v1881_v44 = vadd.f32 %v1849_v4, %v1781_v45  ;;  %v1850_v42 = vmul.f32 %v4997_v23, %v817_v6 }
 0x105   : > { %v1682_v11 = vadd.f32 %v1650_v29, %v1582_v51  ;;  %v1949_v32 = vmul.f32 %v5011_v61, %v916_v56  ;;  %v2049_v13 = vmul.f32 %v4769_v1, %v5210_v55  ;;  %v1950_v39 = vmul.f32 %v5011_v61, %v917_v3 }
 0x106   : > { %v1384_v26 = vadd.f32 %v1352_v40, %v1284_v52  ;;  %v2149_v19 = vmul.f32 %v4783_v57, %v5212_v58  ;;  %v2348_v46 = vmul.f32 %v4900_v62, %v816_v53  ;;  %v2249_v50 = vmul.f32 %v4832_v34, %v717_v9  ;;  %v718_v40 = vld [vmem:[#allocation2 + $0x188] sm:$0xff]  ;;  %v5276_v53 = vld [vmem:[%s6460_s1] ss:$0 sm:$0xff] }
 0x107   : > { %v1782_v25 = vadd.f32 %v1750_v60, %v1682_v11  ;;  %v1981_v45 = vadd.f32 %v1949_v32, %v1881_v44  ;;  %v2081_v2 = vadd.f32 %v2049_v13, %v5204_v8  ;;  %v2349_v41 = vmul.f32 %v4900_v62, %v817_v6  ;;  %v5282_v8 = vld [vmem:[%s6460_s1 + $0x1] ss:$0 sm:$0xff]  ;;  %v5313_v32 = vld [vmem:[#allocation2 + $0x18e] sm:$0xff] }
 0x108   : > { %v2380_v63 = vadd.f32 %v2348_v46, %v2280_v17  ;;  %v2448_v1 = vmul.f32 %v4911_v48, %v916_v56  ;;  %v2449_v43 = vmul.f32 %v4911_v48, %v917_v3  ;;  %v554_v4 = vmul.f32 %v5276_v53, %v518_v5  ;;  %v5298_v17 = vld [vmem:[%s6460_s1 + $0x8] ss:$0 sm:$0xff] }
 0x109   : > { %v1882_v37 = vadd.f32 %v1850_v42, %v1782_v25  ;;  %v2181_v57 = vadd.f32 %v2149_v19, %v2081_v2  ;;  %v654_v9 = vmul.f32 %v5282_v8, %v618_v49  ;;  %v5285_v6 = vadd.f32 %v1452_v33, %v1384_v26  ;;  %v5318_v26 = vld [vmem:[%s6460_s1 + $0xa] ss:$0 sm:$0xff]  ;;  %v5325_v19 = vld [vmem:[%s6460_s1 + $0x18] ss:$0 sm:$0xff]  ;;  %v5328_v25 = vld [vmem:[#allocation2 + $0x18f] sm:$0xff] }
 0x10a   : > { %v5289_v56 = vmul.f32 %v4922_v35, %v5210_v55  ;;  %v5293_v3 = vmul.f32 %v4931_v10, %v5212_v58  ;;  %v1053_v51 = vmul.f32 %v5298_v17, %v518_v5  ;;  %v5301_v60 = vadd.f32 %v2448_v1, %v2380_v63  ;;  %v5309_v58 = vld [vmem:[%s6460_s1 + $0x9] ss:$0 sm:$0xff] }
 0x10b   : > { %v2281_v29 = vadd.f32 %v2249_v50, %v2181_v57  ;;  %v686_v33 = vadd.f32 %v654_v9, %v554_v4  ;;  %v754_v52 = vmul.f32 %v5235_v21, %v718_v40  ;;  %v5304_v44 = vadd.f32 %v1950_v39, %v1882_v37  ;;  %v818_v1 = vld [vmem:[#allocation2 + $0x189] sm:$0xff]  ;;  %v5334_v57 = vld [vmem:[%s6460_s1 + $0x19] ss:$0 sm:$0xff] }
 0x10c   : > { %6520 = vst [vmem:[#allocation58_spill] sm:$0xff] %v5289_v56  ;;  %6521 = vst [vmem:[#allocation59_spill] sm:$0xff] %v5293_v3  ;;  %v1085_v55 = vadd.f32 %v1053_v51, %v984_v28  ;;  %v1153_v11 = vmul.f32 %v5309_v58, %v618_v49  ;;  %v1551_v42 = vmul.f32 %v4867_v7, %v518_v5  ;;  %v5383_v3 = vld [vmem:[%s6460_s1 + $0xc] ss:$0 sm:$0xff] }
 0x10d   : > { %6522 = vst [vmem:[#allocation60_spill] sm:$0xff] %v5301_v60  ;;  %v2381_v13 = vadd.f32 %v2349_v41, %v2281_v29  ;;  %v1253_v39 = vmul.f32 %v5318_v26, %v718_v40  ;;  %v1651_v28 = vmul.f32 %v4882_v59, %v618_v49  ;;  %v2050_v46 = vmul.f32 %v5325_v19, %v518_v5  ;;  %v719_v29 = vld [vmem:[#allocation2 + $0x190] sm:$0xff] }
 0x10e   : > { %v786_v2 = vadd.f32 %v754_v52, %v686_v33  ;;  %v1185_v50 = vadd.f32 %v1153_v11, %v1085_v55  ;;  %v1583_v41 = vadd.f32 %v1551_v42, %v1483_v54  ;;  %v1751_v63 = vmul.f32 %v4955_v24, %v718_v40  ;;  %v819_v33 = vld [vmem:[#allocation2 + $0x191] sm:$0xff] }
 0x10f   : > { %v2082_v37 = vadd.f32 %v2050_v46, %v1981_v45  ;;  %v2150_v4 = vmul.f32 %v5334_v57, %v618_v49  ;;  %v2250_v9 = vmul.f32 %v4832_v34, %v718_v40  ;;  %v555_v51 = vmul.f32 %v5276_v53, %v5313_v32  ;;  %v918_v11 = vld [vmem:[#allocation2 + $0x18a] sm:$0xff]  ;;  %v919_v42 = vld [vmem:[#allocation2 + $0x192] sm:$0xff]  ;;  %v5353_v40 = vld [vmem:[%s6460_s1 + $0x3] ss:$0 sm:$0xff] }
 0x110   : > { %v5340_v52 = vadd.f32 %v2449_v43, %v2381_v13  ;;  %v1683_v54 = vadd.f32 %v1651_v28, %v1583_v41  ;;  %v5343_v55 = vmul.f32 %v4922_v35, %v518_v5  ;;  %v655_v45 = vmul.f32 %v5282_v8, %v5328_v25 }
 0x111   : > { %v1285_v46 = vadd.f32 %v1253_v39, %v1185_v50  ;;  %v2182_v60 = vadd.f32 %v2150_v4, %v2082_v37  ;;  %v5348_v34 = vmul.f32 %v4931_v10, %v618_v49  ;;  %v854_v43 = vmul.f32 %v5353_v40, %v818_v1  ;;  %v5363_v49 = vld [vmem:[%s6460_s1 + $0x4] ss:$0 sm:$0xff] }
 0x112   : > { %6523 = vst [vmem:[#allocation61_spill] sm:$0xff] %v5340_v52  ;;  %6524 = vst [vmem:[#allocation62_spill] sm:$0xff] %v5343_v55  ;;  %v687_v13 = vadd.f32 %v655_v45, %v555_v51  ;;  %v755_v5 = vmul.f32 %v5235_v21, %v719_v29  ;;  %v855_v28 = vmul.f32 %v5353_v40, %v819_v33 }
 0x113   : > { %6525 = vst [vmem:[#allocation63_spill] sm:$0xff] %v5348_v34  ;;  %v1054_v41 = vmul.f32 %v5298_v17, %v5313_v32  ;;  %v1783_v39 = vadd.f32 %v1751_v63, %v1683_v54  ;;  %v886_v50 = vadd.f32 %v854_v43, %v786_v2  ;;  %v954_v37 = vmul.f32 %v5363_v49, %v918_v11  ;;  %v5373_v63 = vld [vmem:[%s6460_s1 + $0xb] ss:$0 sm:$0xff] }
 0x114   : > { %v955_v4 = vmul.f32 %v5363_v49, %v919_v42  ;;  %v787_v52 = vadd.f32 %v755_v5, %v687_v13  ;;  %v1154_v45 = vmul.f32 %v5309_v58, %v5328_v25  ;;  %v1353_v2 = vmul.f32 %v5373_v63, %v818_v1 }
 0x115   : > { %v1086_v51 = vadd.f32 %v1054_v41, %v5258_v27  ;;  %v2282_v54 = vadd.f32 %v2250_v9, %v2182_v60  ;;  %v1254_v43 = vmul.f32 %v5318_v26, %v719_v29  ;;  %v1354_v34 = vmul.f32 %v5373_v63, %v819_v33 }
 0x116   : > { %v1552_v13 = vmul.f32 %v4867_v7, %v5313_v32  ;;  %v887_v5 = vadd.f32 %v855_v28, %v787_v52  ;;  %v986_v27 = vadd.f32 %v954_v37, %v886_v50  ;;  %v1385_v55 = vadd.f32 %v1353_v2, %v1285_v46 }
 0x117   : > { %v1186_v41 = vadd.f32 %v1154_v45, %v1086_v51  ;;  %v1453_v56 = vmul.f32 %v5383_v3, %v918_v11  ;;  %v1652_v9 = vmul.f32 %v4882_v59, %v5328_v25  ;;  %v1851_v15 = vmul.f32 %v4997_v23, %v818_v1 }
 0x118   : > { %v1584_v60 = vadd.f32 %v1552_v13, %v5285_v6  ;;  %v1454_v7 = vmul.f32 %v5383_v3, %v919_v42  ;;  %v1752_v52 = vmul.f32 %v4955_v24, %v719_v29  ;;  %v1852_v46 = vmul.f32 %v4997_v23, %v819_v33 }
 0x119   : > { %v1286_v22 = vadd.f32 %v1254_v43, %v1186_v41  ;;  %v5393_v28 = vadd.f32 %v955_v4, %v887_v5  ;;  %v1883_v37 = vadd.f32 %v1851_v15, %v1783_v39  ;;  %v2051_v51 = vmul.f32 %v5325_v19, %v5313_v32  ;;  %v520_v5 = vld [vmem:[#allocation2 + $0x1a6] sm:$0xff] }
 0x11a   : > { %v1684_v50 = vadd.f32 %v1652_v9, %v1584_v60  ;;  %v1485_v45 = vadd.f32 %v1453_v56, %v1385_v55  ;;  %v1951_v59 = vmul.f32 %v5011_v61, %v918_v11  ;;  %v2350_v2 = vmul.f32 %v4900_v62, %v818_v1  ;;  %v620_v60 = vld [vmem:[#allocation2 + $0x1a7] sm:$0xff] }
 0x11b   : > { %v1386_v6 = vadd.f32 %v1354_v34, %v1286_v22  ;;  %v1952_v13 = vmul.f32 %v5011_v61, %v919_v42  ;;  %v2083_v41 = vadd.f32 %v2051_v51, %v5304_v44  ;;  %v2151_v4 = vmul.f32 %v5334_v57, %v5328_v25  ;;  %v5406_v22 = vld [vmem:[%s6460_s1 + $0x1a] ss:$0 sm:$0xff] }
 0x11c   : > { %v1784_v43 = vadd.f32 %v1752_v52, %v1684_v50  ;;  %v1983_v15 = vadd.f32 %v1951_v59, %v1883_v37  ;;  %v2251_v56 = vmul.f32 %v5406_v22, %v719_v29  ;;  %v2351_v1 = vmul.f32 %v4900_v62, %v819_v33  ;;  %v720_v52 = vld [vmem:[#allocation2 + $0x1a8] sm:$0xff] }
 0x11d   : > { %v2382_v55 = vadd.f32 %v2350_v2, %v2282_v54  ;;  %v5410_v34 = vadd.f32 %v1454_v7, %v1386_v6  ;;  %v2183_v44 = vadd.f32 %v2151_v4, %v2083_v41  ;;  %v2450_v9 = vmul.f32 %v4911_v48, %v918_v11 }
 0x11e   : > { %v1884_v39 = vadd.f32 %v1852_v46, %v1784_v43  ;;  %v2451_v50 = vmul.f32 %v4911_v48, %v919_v42  ;;  %v5416_v37 = vmul.f32 %v4922_v35, %v5313_v32  ;;  %v556_v51 = vmul.f32 %v5276_v53, %v520_v5  ;;  %v5433_v32 = vld [vmem:[%s6460_s1 + $0x10] ss:$0 sm:$0xff] }
 0x11f   : > { %v656_v29 = vmul.f32 %v5282_v8, %v620_v60  ;;  %v2283_v59 = vadd.f32 %v2251_v56, %v2183_v44  ;;  %v5420_v62 = vadd.f32 %v2450_v9, %v2382_v55  ;;  %v5424_v33 = vmul.f32 %v4931_v10, %v5328_v25  ;;  %v5438_v43 = vld [vmem:[#allocation2 + $0x1ae] sm:$0xff] }
 0x120   : > { %6526 = vst [vmem:[#allocation64_spill] sm:$0xff] %v5416_v37  ;;  %v1055_v11 = vmul.f32 %v5298_v17, %v520_v5  ;;  %v5427_v54 = vadd.f32 %v1952_v13, %v1884_v39  ;;  %v756_v42 = vmul.f32 %v5235_v21, %v720_v52  ;;  %v1553_v7 = vmul.f32 %v5433_v32, %v520_v5  ;;  %v5440_v13 = vld [vmem:[#allocation2 + $0x1af] sm:$0xff] }
 0x121   : > { %6527 = vst [vmem:[#allocation65_spill] sm:$0xff] %v5420_v62  ;;  %6528 = vst [vmem:[#allocation66_spill] sm:$0xff] %v5424_v33  ;;  %v688_v48 = vadd.f32 %v656_v29, %v556_v51  ;;  %v2383_v46 = vadd.f32 %v2351_v1, %v2283_v59  ;;  %v1155_v2 = vmul.f32 %v5309_v58, %v620_v60  ;;  %v5446_v56 = vld [vmem:[%s6460_s1 + $0x11] ss:$0 sm:$0xff]  ;;  %v820_v1 = vld [vmem:[#allocation2 + $0x1a9] sm:$0xff] }
 0x122   : > { %v1087_v6 = vadd.f32 %v1055_v11, %v986_v27  ;;  %v2052_v25 = vmul.f32 %v5325_v19, %v520_v5  ;;  %v1255_v41 = vmul.f32 %v5318_v26, %v720_v52  ;;  %v1585_v4 = vadd.f32 %v1553_v7, %v1485_v45  ;;  %v721_v29 = vld [vmem:[#allocation2 + $0x1b0] sm:$0xff] }
 0x123   : > { %v1653_v55 = vmul.f32 %v5446_v56, %v620_v60  ;;  %v1753_v27 = vmul.f32 %v4955_v24, %v720_v52  ;;  %v788_v39 = vadd.f32 %v756_v42, %v688_v48  ;;  %v2152_v51 = vmul.f32 %v5334_v57, %v620_v60  ;;  %v821_v62 = vld [vmem:[#allocation2 + $0x1b1] sm:$0xff] }
 0x124   : > { %v1187_v44 = vadd.f32 %v1155_v2, %v1087_v6  ;;  %v2084_v9 = vadd.f32 %v2052_v25, %v1983_v15  ;;  %v2252_v11 = vmul.f32 %v5406_v22, %v720_v52  ;;  %v557_v45 = vmul.f32 %v5276_v53, %v5438_v43  ;;  %v920_v42 = vld [vmem:[#allocation2 + $0x1aa] sm:$0xff] }
 0x125   : > { %v1685_v59 = vadd.f32 %v1653_v55, %v1585_v4  ;;  %v657_v7 = vmul.f32 %v5282_v8, %v5440_v13  ;;  %v5456_v33 = vadd.f32 %v2451_v50, %v2383_v46  ;;  %v5459_v48 = vmul.f32 %v4922_v35, %v520_v5  ;;  %v921_v4 = vld [vmem:[#allocation2 + $0x1b2] sm:$0xff] }
 0x126   : > { %v2184_v24 = vadd.f32 %v2152_v51, %v2084_v9  ;;  %v856_v15 = vmul.f32 %v5353_v40, %v820_v1  ;;  %v1287_v6 = vadd.f32 %v1255_v41, %v1187_v44  ;;  %v5463_v2 = vmul.f32 %v4931_v10, %v620_v60 }
 0x127   : > { %6529 = vst [vmem:[#allocation67_spill] sm:$0xff] %v5456_v33  ;;  %6530 = vst [vmem:[#allocation68_spill] sm:$0xff] %v5459_v48  ;;  %v689_v52 = vadd.f32 %v657_v7, %v557_v45  ;;  %v757_v25 = vmul.f32 %v5235_v21, %v721_v29  ;;  %v1785_v55 = vadd.f32 %v1753_v27, %v1685_v59 }
 0x128   : > { %6531 = vst [vmem:[#allocation69_spill] sm:$0xff] %v5463_v2  ;;  %v857_v37 = vmul.f32 %v5353_v40, %v821_v62  ;;  %v888_v50 = vadd.f32 %v856_v15, %v788_v39  ;;  %v1056_v46 = vmul.f32 %v5298_v17, %v5438_v43  ;;  %v2284_v35 = vadd.f32 %v2252_v11, %v2184_v24 }
 0x129   : > { %v789_v5 = vadd.f32 %v757_v25, %v689_v52  ;;  %v956_v9 = vmul.f32 %v5363_v49, %v920_v42  ;;  %v1355_v41 = vmul.f32 %v5373_v63, %v820_v1  ;;  %v957_v10 = vmul.f32 %v5363_v49, %v921_v4 }
 0x12a   : > { %v1088_v60 = vadd.f32 %v1056_v46, %v5393_v28  ;;  %v1156_v44 = vmul.f32 %v5309_v58, %v5440_v13  ;;  %v1256_v27 = vmul.f32 %v5318_v26, %v721_v29  ;;  %v1554_v11 = vmul.f32 %v5433_v32, %v5438_v43 }
 0x12b   : > { %v889_v51 = vadd.f32 %v857_v37, %v789_v5  ;;  %v988_v39 = vadd.f32 %v956_v9, %v888_v50  ;;  %v1387_v59 = vadd.f32 %v1355_v41, %v1287_v6  ;;  %v1356_v7 = vmul.f32 %v5373_v63, %v821_v62  ;;  %v5488_v37 = vld [vmem:[%s6460_s1 + $0x12] ss:$0 sm:$0xff] }
 0x12c   : > { %v1188_v45 = vadd.f32 %v1156_v44, %v1088_v60  ;;  %v1455_v24 = vmul.f32 %v5383_v3, %v920_v42  ;;  %v1853_v15 = vmul.f32 %v4997_v23, %v820_v1  ;;  %v1456_v28 = vmul.f32 %v5383_v3, %v921_v4 }
 0x12d   : > { %v1586_v52 = vadd.f32 %v1554_v11, %v5410_v34  ;;  %v1654_v25 = vmul.f32 %v5446_v56, %v5440_v13  ;;  %v1754_v6 = vmul.f32 %v5488_v37, %v721_v29  ;;  %v5491_v50 = vadd.f32 %v957_v10, %v889_v51  ;;  %v5503_v10 = vld [vmem:[%s6460_s1 + $0x1b] ss:$0 sm:$0xff] }
 0x12e   : > { %v1288_v46 = vadd.f32 %v1256_v27, %v1188_v45  ;;  %v1487_v5 = vadd.f32 %v1455_v24, %v1387_v59  ;;  %v1885_v9 = vadd.f32 %v1853_v15, %v1785_v55  ;;  %v1854_v60 = vmul.f32 %v4997_v23, %v821_v62  ;;  %v522_v27 = vld [vmem:[#allocation2 + $0x1c6] sm:$0xff]  ;;  %v5512_v15 = vld [vmem:[%s6460_s1 + $0x1c] ss:$0 sm:$0xff] }
 0x12f   : > { %v1686_v41 = vadd.f32 %v1654_v25, %v1586_v52  ;;  %v1953_v34 = vmul.f32 %v5011_v61, %v920_v42  ;;  %v2053_v44 = vmul.f32 %v5325_v19, %v5438_v43  ;;  %v1954_v33 = vmul.f32 %v5011_v61, %v921_v4  ;;  %v622_v23 = vld [vmem:[#allocation2 + $0x1c7] sm:$0xff] }
 0x130   : > { %v1388_v11 = vadd.f32 %v1356_v7, %v1288_v46  ;;  %v2153_v2 = vmul.f32 %v5334_v57, %v5440_v13  ;;  %v2352_v55 = vmul.f32 %v5503_v10, %v820_v1  ;;  %v2253_v7 = vmul.f32 %v5406_v22, %v721_v29  ;;  %v722_v25 = vld [vmem:[#allocation2 + $0x1c8] sm:$0xff] }
 0x131   : > { %v1786_v51 = vadd.f32 %v1754_v6, %v1686_v41  ;;  %v1985_v59 = vadd.f32 %v1953_v34, %v1885_v9  ;;  %v2085_v45 = vadd.f32 %v2053_v44, %v5427_v54  ;;  %v2353_v61 = vmul.f32 %v5503_v10, %v821_v62  ;;  %v5521_v62 = vld [vmem:[%s6460_s1 + $0x20] ss:$0 sm:$0xff] }
 0x132   : > { %v2384_v24 = vadd.f32 %v2352_v55, %v2284_v35  ;;  %v2452_v52 = vmul.f32 %v5512_v15, %v920_v42  ;;  %v2453_v1 = vmul.f32 %v5512_v15, %v921_v4  ;;  %v558_v9 = vmul.f32 %v5276_v53, %v522_v27  ;;  %v5530_v42 = vld [vmem:[%s6460_s1 + $0x21] ss:$0 sm:$0xff] }
 0x133   : > { %v1886_v46 = vadd.f32 %v1854_v60, %v1786_v51  ;;  %v2185_v6 = vadd.f32 %v2153_v2, %v2085_v45  ;;  %v658_v54 = vmul.f32 %v5282_v8, %v622_v23  ;;  %v1488_v29 = vadd.f32 %v1456_v28, %v1388_v11  ;;  %v5544_v51 = vld [vmem:[#allocation2 + $0x1ce] sm:$0xff] }
 0x134   : > { %v5525_v35 = vmul.f32 %v5521_v62, %v5438_v43  ;;  %v5534_v2 = vmul.f32 %v5530_v42, %v5440_v13  ;;  %v1057_v4 = vmul.f32 %v5298_v17, %v522_v27  ;;  %v5537_v41 = vadd.f32 %v2452_v52, %v2384_v24  ;;  %v5549_v24 = vld [vmem:[#allocation2 + $0x1cf] sm:$0xff] }
 0x135   : > { %v2285_v28 = vadd.f32 %v2253_v7, %v2185_v6  ;;  %v690_v60 = vadd.f32 %v658_v54, %v558_v9  ;;  %v758_v34 = vmul.f32 %v5235_v21, %v722_v25  ;;  %v5540_v44 = vadd.f32 %v1954_v33, %v1886_v46  ;;  %v822_v46 = vld [vmem:[#allocation2 + $0x1c9] sm:$0xff] }
 0x136   : > { %6532 = vst [vmem:[#allocation70_spill] sm:$0xff] %v5525_v35  ;;  %6533 = vst [vmem:[#allocation71_spill] sm:$0xff] %v5534_v2  ;;  %v1089_v43 = vadd.f32 %v1057_v4, %v988_v39  ;;  %v1157_v11 = vmul.f32 %v5309_v58, %v622_v23  ;;  %v1555_v55 = vmul.f32 %v5433_v32, %v522_v27 }
 0x137   : > { %6534 = vst [vmem:[#allocation72_spill] sm:$0xff] %v5537_v41  ;;  %v2385_v45 = vadd.f32 %v2353_v61, %v2285_v28  ;;  %v1257_v13 = vmul.f32 %v5318_v26, %v722_v25  ;;  %v1655_v2 = vmul.f32 %v5446_v56, %v622_v23  ;;  %v2054_v7 = vmul.f32 %v5325_v19, %v522_v27  ;;  %v723_v28 = vld [vmem:[#allocation2 + $0x1d0] sm:$0xff] }
 0x138   : > { %v790_v52 = vadd.f32 %v758_v34, %v690_v60  ;;  %v1189_v6 = vadd.f32 %v1157_v11, %v1089_v43  ;;  %v1587_v33 = vadd.f32 %v1555_v55, %v1487_v5  ;;  %v1755_v39 = vmul.f32 %v5488_v37, %v722_v25  ;;  %v823_v41 = vld [vmem:[#allocation2 + $0x1d1] sm:$0xff] }
 0x139   : > { %v2086_v9 = vadd.f32 %v2054_v7, %v1985_v59  ;;  %v2154_v54 = vmul.f32 %v5334_v57, %v622_v23  ;;  %v2254_v4 = vmul.f32 %v5406_v22, %v722_v25  ;;  %v559_v61 = vmul.f32 %v5276_v53, %v5544_v51  ;;  %v922_v34 = vld [vmem:[#allocation2 + $0x1ca] sm:$0xff]  ;;  %v923_v59 = vld [vmem:[#allocation2 + $0x1d2] sm:$0xff] }
 0x13a   : > { %v5556_v35 = vadd.f32 %v2453_v1, %v2385_v45  ;;  %v1687_v48 = vadd.f32 %v1655_v2, %v1587_v33  ;;  %v5559_v60 = vmul.f32 %v5521_v62, %v522_v27  ;;  %v659_v5 = vmul.f32 %v5282_v8, %v5549_v24 }
 0x13b   : > { %v1289_v43 = vadd.f32 %v1257_v13, %v1189_v6  ;;  %v2186_v11 = vadd.f32 %v2154_v54, %v2086_v9  ;;  %v5564_v25 = vmul.f32 %v5530_v42, %v622_v23  ;;  %v858_v55 = vmul.f32 %v5353_v40, %v822_v46 }
 0x13c   : > { %6535 = vst [vmem:[#allocation73_spill] sm:$0xff] %v5556_v35  ;;  %6536 = vst [vmem:[#allocation74_spill] sm:$0xff] %v5559_v60  ;;  %v691_v7 = vadd.f32 %v659_v5, %v559_v61  ;;  %v759_v1 = vmul.f32 %v5235_v21, %v723_v28  ;;  %v859_v2 = vmul.f32 %v5353_v40, %v823_v41 }
 0x13d   : > { %6537 = vst [vmem:[#allocation75_spill] sm:$0xff] %v5564_v25  ;;  %v1058_v27 = vmul.f32 %v5298_v17, %v5544_v51  ;;  %v1787_v45 = vadd.f32 %v1755_v39, %v1687_v48  ;;  %v890_v33 = vadd.f32 %v858_v55, %v790_v52  ;;  %v958_v35 = vmul.f32 %v5363_v49, %v922_v34 }
 0x13e   : > { %v959_v13 = vmul.f32 %v5363_v49, %v923_v59  ;;  %v791_v6 = vadd.f32 %v759_v1, %v691_v7  ;;  %v1158_v9 = vmul.f32 %v5309_v58, %v5549_v24  ;;  %v1357_v54 = vmul.f32 %v5373_v63, %v822_v46 }
 0x13f   : > { %v1090_v23 = vadd.f32 %v1058_v27, %v5491_v50  ;;  %v2286_v61 = vadd.f32 %v2254_v4, %v2186_v11  ;;  %v1258_v5 = vmul.f32 %v5318_v26, %v723_v28  ;;  %v1358_v25 = vmul.f32 %v5373_v63, %v823_v41  ;;  %v5587_v4 = vld [vmem:[%s6460_s1 + $0x13] ss:$0 sm:$0xff] }
 0x140   : > { %v1556_v48 = vmul.f32 %v5433_v32, %v5544_v51  ;;  %v891_v52 = vadd.f32 %v859_v2, %v791_v6  ;;  %v990_v39 = vadd.f32 %v958_v35, %v890_v33  ;;  %v1389_v60 = vadd.f32 %v1357_v54, %v1289_v43  ;;  %v5600_v54 = vld [vmem:[%s6460_s1 + $0x14] ss:$0 sm:$0xff] }
 0x141   : > { %v1190_v55 = vadd.f32 %v1158_v9, %v1090_v23  ;;  %v1457_v7 = vmul.f32 %v5383_v3, %v922_v34  ;;  %v1656_v1 = vmul.f32 %v5446_v56, %v5549_v24  ;;  %v1855_v11 = vmul.f32 %v5587_v4, %v822_v46 }
 0x142   : > { %v1588_v50 = vadd.f32 %v1556_v48, %v1488_v29  ;;  %v1458_v14 = vmul.f32 %v5383_v3, %v923_v59  ;;  %v1756_v35 = vmul.f32 %v5488_v37, %v723_v28  ;;  %v1856_v43 = vmul.f32 %v5587_v4, %v823_v41 }
 0x143   : > { %v1290_v27 = vadd.f32 %v1258_v5, %v1190_v55  ;;  %v5593_v2 = vadd.f32 %v959_v13, %v891_v52  ;;  %v1887_v33 = vadd.f32 %v1855_v11, %v1787_v45  ;;  %v2055_v6 = vmul.f32 %v5325_v19, %v5544_v51 }
 0x144   : > { %v1688_v29 = vadd.f32 %v1656_v1, %v1588_v50  ;;  %v1489_v9 = vadd.f32 %v1457_v7, %v1389_v60  ;;  %v1955_v5 = vmul.f32 %v5600_v54, %v922_v34  ;;  %v2354_v48 = vmul.f32 %v5503_v10, %v822_v46  ;;  %v524_v50 = vld [vmem:[#allocation2 + $0x1e6] sm:$0xff] }
 0x145   : > { %v1390_v23 = vadd.f32 %v1358_v25, %v1290_v27  ;;  %v1956_v13 = vmul.f32 %v5600_v54, %v923_v59  ;;  %v2087_v52 = vadd.f32 %v2055_v6, %v5540_v44  ;;  %v2155_v45 = vmul.f32 %v5334_v57, %v5549_v24  ;;  %v624_v25 = vld [vmem:[#allocation2 + $0x1e7] sm:$0xff] }
 0x146   : > { %v1788_v55 = vadd.f32 %v1756_v35, %v1688_v29  ;;  %v1987_v60 = vadd.f32 %v1955_v5, %v1887_v33  ;;  %v2255_v7 = vmul.f32 %v5406_v22, %v723_v28  ;;  %v2355_v1 = vmul.f32 %v5503_v10, %v823_v41  ;;  %v724_v29 = vld [vmem:[#allocation2 + $0x1e8] sm:$0xff] }
 0x147   : > { %v2386_v11 = vadd.f32 %v2354_v48, %v2286_v61  ;;  %v5610_v27 = vadd.f32 %v1458_v14, %v1390_v23  ;;  %v2187_v46 = vadd.f32 %v2155_v45, %v2087_v52  ;;  %v2454_v35 = vmul.f32 %v5512_v15, %v922_v34  ;;  %v5633_v45 = vld [vmem:[#allocation2 + $0x1ee] sm:$0xff] }
 0x148   : > { %v1888_v30 = vadd.f32 %v1856_v43, %v1788_v55  ;;  %v2455_v44 = vmul.f32 %v5512_v15, %v923_v59  ;;  %v5616_v6 = vmul.f32 %v5521_v62, %v5544_v51  ;;  %v560_v33 = vmul.f32 %v5276_v53, %v524_v50 }
 0x149   : > { %v660_v28 = vmul.f32 %v5282_v8, %v624_v25  ;;  %v2287_v5 = vadd.f32 %v2255_v7, %v2187_v46  ;;  %v5620_v41 = vadd.f32 %v2454_v35, %v2386_v11  ;;  %v5624_v14 = vmul.f32 %v5530_v42, %v5549_v24  ;;  %v5635_v7 = vld [vmem:[#allocation2 + $0x1ef] sm:$0xff] }
 0x14a   : > { %6538 = vst [vmem:[#allocation76_spill] sm:$0xff] %v5616_v6  ;;  %v1059_v34 = vmul.f32 %v5298_v17, %v524_v50  ;;  %v5627_v61 = vadd.f32 %v1956_v13, %v1888_v30  ;;  %v760_v43 = vmul.f32 %v5235_v21, %v724_v29  ;;  %v1557_v51 = vmul.f32 %v5433_v32, %v524_v50  ;;  %v824_v46 = vld [vmem:[#allocation2 + $0x1e9] sm:$0xff] }
 0x14b   : > { %6539 = vst [vmem:[#allocation77_spill] sm:$0xff] %v5620_v41  ;;  %6540 = vst [vmem:[#allocation78_spill] sm:$0xff] %v5624_v14  ;;  %v692_v59 = vadd.f32 %v660_v28, %v560_v33  ;;  %v2387_v23 = vadd.f32 %v2355_v1, %v2287_v5  ;;  %v1159_v55 = vmul.f32 %v5309_v58, %v624_v25  ;;  %v725_v28 = vld [vmem:[#allocation2 + $0x1f0] sm:$0xff] }
 0x14c   : > { %v1091_v48 = vadd.f32 %v1059_v34, %v990_v39  ;;  %v2056_v52 = vmul.f32 %v5325_v19, %v524_v50  ;;  %v1259_v24 = vmul.f32 %v5318_v26, %v724_v29  ;;  %v1589_v11 = vadd.f32 %v1557_v51, %v1489_v9  ;;  %v825_v51 = vld [vmem:[#allocation2 + $0x1f1] sm:$0xff] }
 0x14d   : > { %v1657_v30 = vmul.f32 %v5446_v56, %v624_v25  ;;  %v1757_v13 = vmul.f32 %v5488_v37, %v724_v29  ;;  %v792_v35 = vadd.f32 %v760_v43, %v692_v59  ;;  %v2156_v39 = vmul.f32 %v5334_v57, %v624_v25  ;;  %v924_v43 = vld [vmem:[#allocation2 + $0x1ea] sm:$0xff] }
 0x14e   : > { %v1191_v33 = vadd.f32 %v1159_v55, %v1091_v48  ;;  %v2088_v1 = vadd.f32 %v2056_v52, %v1987_v60  ;;  %v2256_v34 = vmul.f32 %v5406_v22, %v724_v29  ;;  %v561_v41 = vmul.f32 %v5276_v53, %v5633_v45  ;;  %v925_v52 = vld [vmem:[#allocation2 + $0x1f2] sm:$0xff] }
 0x14f   : > { %v1689_v5 = vadd.f32 %v1657_v30, %v1589_v11  ;;  %v661_v9 = vmul.f32 %v5282_v8, %v5635_v7  ;;  %v5646_v14 = vadd.f32 %v2455_v44, %v2387_v23  ;;  %v5649_v59 = vmul.f32 %v5521_v62, %v524_v50 }
 0x150   : > { %v2188_v6 = vadd.f32 %v2156_v39, %v2088_v1  ;;  %v860_v60 = vmul.f32 %v5353_v40, %v824_v46  ;;  %v1291_v48 = vadd.f32 %v1259_v24, %v1191_v33  ;;  %v5653_v55 = vmul.f32 %v5530_v42, %v624_v25 }
 0x151   : > { %6541 = vst [vmem:[#allocation79_spill] sm:$0xff] %v5646_v14  ;;  %v693_v29 = vadd.f32 %v661_v9, %v561_v41  ;;  %v761_v53 = vmul.f32 %v5235_v21, %v725_v28  ;;  %v1789_v11 = vadd.f32 %v1757_v13, %v1689_v5  ;;  %v861_v8 = vmul.f32 %v5353_v40, %v825_v51 }
 0x152   : > { %6542 = vst [vmem:[#allocation80_spill] sm:$0xff] %v5653_v55  ;;  %v892_v44 = vadd.f32 %v860_v60, %v792_v35  ;;  %v1060_v23 = vmul.f32 %v5298_v17, %v5633_v45  ;;  %v2288_v50 = vadd.f32 %v2256_v34, %v2188_v6  ;;  %v960_v1 = vmul.f32 %v5363_v49, %v924_v43 }
 0x153   : > { %v793_v30 = vadd.f32 %v761_v53, %v693_v29  ;;  %v1359_v24 = vmul.f32 %v5373_v63, %v824_v46  ;;  %v961_v25 = vmul.f32 %v5363_v49, %v925_v52  ;;  %v1160_v21 = vmul.f32 %v5309_v58, %v5635_v7 }
 0x154   : > { %v1092_v41 = vadd.f32 %v1060_v23, %v5593_v2  ;;  %v1260_v13 = vmul.f32 %v5318_v26, %v725_v28  ;;  %v992_v35 = vadd.f32 %v960_v1, %v892_v44  ;;  %v1558_v6 = vmul.f32 %v5433_v32, %v5633_v45 }
 0x155   : > { %v893_v40 = vadd.f32 %v861_v8, %v793_v30  ;;  %v1391_v33 = vadd.f32 %v1359_v24, %v1291_v48  ;;  %v1360_v5 = vmul.f32 %v5373_v63, %v825_v51  ;;  %v1459_v34 = vmul.f32 %v5383_v3, %v924_v43 }
 0x156   : > { %v1192_v39 = vadd.f32 %v1160_v21, %v1092_v41  ;;  %v1857_v49 = vmul.f32 %v5587_v4, %v824_v46  ;;  %v1460_v2 = vmul.f32 %v5383_v3, %v925_v52  ;;  %v1590_v9 = vadd.f32 %v1558_v6, %v5610_v27 }
 0x157   : > { %v1658_v60 = vmul.f32 %v5446_v56, %v5635_v7  ;;  %v1758_v29 = vmul.f32 %v5488_v37, %v725_v28  ;;  %v993_v48 = vadd.f32 %v961_v25, %v893_v40  ;;  %v1491_v8 = vadd.f32 %v1459_v34, %v1391_v33  ;;  %v1025_v25 = vld [vmem:[#allocation2 + $0x206] sm:$0xff] }
 0x158   : > { %v1292_v53 = vadd.f32 %v1260_v13, %v1192_v39  ;;  %v1889_v44 = vadd.f32 %v1857_v49, %v1789_v11  ;;  %v1858_v30 = vmul.f32 %v5587_v4, %v825_v51  ;;  %v1957_v1 = vmul.f32 %v5600_v54, %v924_v43  ;;  %v1125_v39 = vld [vmem:[#allocation2 + $0x207] sm:$0xff] }
 0x159   : > { %v1690_v23 = vadd.f32 %v1658_v60, %v1590_v9  ;;  %v2057_v24 = vmul.f32 %v5325_v19, %v5633_v45  ;;  %v1958_v27 = vmul.f32 %v5600_v54, %v925_v52  ;;  %v2157_v21 = vmul.f32 %v5334_v57, %v5635_v7  ;;  %v1225_v60 = vld [vmem:[#allocation2 + $0x208] sm:$0xff] }
 0x15a   : > { %v1392_v41 = vadd.f32 %v1360_v5, %v1292_v53  ;;  %v2356_v6 = vmul.f32 %v5503_v10, %v824_v46  ;;  %v1989_v40 = vadd.f32 %v1957_v1, %v1889_v44  ;;  %v2257_v33 = vmul.f32 %v5406_v22, %v725_v28  ;;  %v5703_v44 = vld [vmem:[#allocation2 + $0x20e] sm:$0xff] }
 0x15b   : > { %v1790_v13 = vadd.f32 %v1758_v29, %v1690_v23  ;;  %v2089_v11 = vadd.f32 %v2057_v24, %v5627_v61  ;;  %v2357_v34 = vmul.f32 %v5503_v10, %v825_v51  ;;  %v2456_v5 = vmul.f32 %v5512_v15, %v924_v43 }
 0x15c   : > { %v2388_v49 = vadd.f32 %v2356_v6, %v2288_v50  ;;  %v2457_v9 = vmul.f32 %v5512_v15, %v925_v52  ;;  %v1492_v53 = vadd.f32 %v1460_v2, %v1392_v41  ;;  %v1061_v46 = vmul.f32 %v5298_v17, %v1025_v25  ;;  %v1126_v6 = vld [vmem:[#allocation2 + $0x20f] sm:$0xff] }
 0x15d   : > { %v1890_v14 = vadd.f32 %v1858_v30, %v1790_v13  ;;  %v2189_v55 = vadd.f32 %v2157_v21, %v2089_v11  ;;  %v5692_v29 = vmul.f32 %v5521_v62, %v5633_v45  ;;  %v5696_v61 = vmul.f32 %v5530_v42, %v5635_v7  ;;  %v1325_v7 = vld [vmem:[#allocation2 + $0x209] sm:$0xff] }
 0x15e   : > { %v1161_v28 = vmul.f32 %v5309_v58, %v1125_v39  ;;  %v1559_v51 = vmul.f32 %v5433_v32, %v1025_v25  ;;  %v5700_v52 = vadd.f32 %v2456_v5, %v2388_v49  ;;  %v1093_v50 = vadd.f32 %v1061_v46, %v992_v35  ;;  %v1326_v49 = vld [vmem:[#allocation2 + $0x211] sm:$0xff] }
 0x15f   : > { %v2289_v43 = vadd.f32 %v2257_v33, %v2189_v55  ;;  %v1261_v2 = vmul.f32 %v5318_v26, %v1225_v60  ;;  %v1990_v23 = vadd.f32 %v1958_v27, %v1890_v14  ;;  %v1659_v45 = vmul.f32 %v5446_v56, %v1125_v39  ;;  %v1425_v46 = vld [vmem:[#allocation2 + $0x20a] sm:$0xff] }
 0x160   : > { %v1591_v30 = vadd.f32 %v1559_v51, %v1491_v8  ;;  %v2058_v1 = vmul.f32 %v5325_v19, %v1025_v25  ;;  %v1193_v41 = vadd.f32 %v1161_v28, %v1093_v50  ;;  %v1759_v21 = vmul.f32 %v5488_v37, %v1225_v60  ;;  %v1226_v8 = vld [vmem:[#allocation2 + $0x210] sm:$0xff] }
 0x161   : > { %v2389_v24 = vadd.f32 %v2357_v34, %v2289_v43  ;;  %v2158_v55 = vmul.f32 %v5334_v57, %v1125_v39  ;;  %v2258_v11 = vmul.f32 %v5406_v22, %v1225_v60  ;;  %v1062_v14 = vmul.f32 %v5298_v17, %v5703_v44  ;;  %v1426_v28 = vld [vmem:[#allocation2 + $0x212] sm:$0xff] }
 0x162   : > { %v1691_v13 = vadd.f32 %v1659_v45, %v1591_v30  ;;  %v2090_v35 = vadd.f32 %v2058_v1, %v1989_v40  ;;  %v1293_v27 = vadd.f32 %v1261_v2, %v1193_v41  ;;  %v5713_v33 = vmul.f32 %v5521_v62, %v1025_v25 }
 0x163   : > { %v5716_v34 = vmul.f32 %v5530_v42, %v1125_v39  ;;  %v1361_v5 = vmul.f32 %v5373_v63, %v1325_v7  ;;  %v5719_v51 = vadd.f32 %v2457_v9, %v2389_v24  ;;  %v1094_v60 = vadd.f32 %v1062_v14, %v993_v48 }
 0x164   : > { %v2190_v40 = vadd.f32 %v2158_v55, %v2090_v35  ;;  %v1162_v43 = vmul.f32 %v5309_v58, %v1126_v6  ;;  %v1791_v17 = vadd.f32 %v1759_v21, %v1691_v13  ;;  %v1262_v50 = vmul.f32 %v5318_v26, %v1226_v8 }
 0x165   : > { %v1393_v2 = vadd.f32 %v1361_v5, %v1293_v27  ;;  %v1560_v25 = vmul.f32 %v5433_v32, %v5703_v44  ;;  %v1362_v30 = vmul.f32 %v5373_v63, %v1326_v49  ;;  %v1461_v45 = vmul.f32 %v5383_v3, %v1425_v46  ;;  %v1525_v5 = vld [vmem:[#allocation2 + $0x226] sm:$0xff] }
 0x166   : > { %v1194_v39 = vadd.f32 %v1162_v43, %v1094_v60  ;;  %v1462_v1 = vmul.f32 %v5383_v3, %v1426_v28  ;;  %v2290_v9 = vadd.f32 %v2258_v11, %v2190_v40  ;;  %v1660_v48 = vmul.f32 %v5446_v56, %v1126_v6 }
 0x167   : > { %v1592_v24 = vadd.f32 %v1560_v25, %v1492_v53  ;;  %v1859_v58 = vmul.f32 %v5587_v4, %v1325_v7  ;;  %v1493_v21 = vadd.f32 %v1461_v45, %v1393_v2  ;;  %v1760_v26 = vmul.f32 %v5488_v37, %v1226_v8  ;;  %v1625_v45 = vld [vmem:[#allocation2 + $0x227] sm:$0xff] }
 0x168   : > { %v1294_v41 = vadd.f32 %v1262_v50, %v1194_v39  ;;  %v2059_v55 = vmul.f32 %v5325_v19, %v5703_v44  ;;  %v1860_v63 = vmul.f32 %v5587_v4, %v1326_v49  ;;  %v1959_v14 = vmul.f32 %v5600_v54, %v1425_v46 }
 0x169   : > { %v1692_v13 = vadd.f32 %v1660_v48, %v1592_v24  ;;  %v1891_v35 = vadd.f32 %v1859_v58, %v1791_v17  ;;  %v2159_v53 = vmul.f32 %v5334_v57, %v1126_v6  ;;  %v2358_v27 = vmul.f32 %v5503_v10, %v1325_v7 }
 0x16a   : > { %v1394_v3 = vadd.f32 %v1362_v30, %v1294_v41  ;;  %v2091_v11 = vadd.f32 %v2059_v55, %v1990_v23  ;;  %v1960_v60 = vmul.f32 %v5600_v54, %v1426_v28  ;;  %v2259_v43 = vmul.f32 %v5406_v22, %v1226_v8  ;;  %v1725_v30 = vld [vmem:[#allocation2 + $0x228] sm:$0xff] }
 0x16b   : > { %v1792_v40 = vadd.f32 %v1760_v26, %v1692_v13  ;;  %v2359_v50 = vmul.f32 %v5503_v10, %v1326_v49  ;;  %v1991_v2 = vadd.f32 %v1959_v14, %v1891_v35  ;;  %v2390_v39 = vadd.f32 %v2358_v27, %v2290_v9  ;;  %v1526_v9 = vld [vmem:[#allocation2 + $0x22e] sm:$0xff] }
 0x16c   : > { %v2191_v25 = vadd.f32 %v2159_v53, %v2091_v11  ;;  %v2458_v17 = vmul.f32 %v5512_v15, %v1425_v46  ;;  %v1494_v23 = vadd.f32 %v1462_v1, %v1394_v3  ;;  %v2459_v48 = vmul.f32 %v5512_v15, %v1426_v28  ;;  %v1626_v55 = vld [vmem:[#allocation2 + $0x22f] sm:$0xff] }
 0x16d   : > { %v1892_v24 = vadd.f32 %v1860_v63, %v1792_v40  ;;  %v1561_v7 = vmul.f32 %v5433_v32, %v1525_v5  ;;  %v5745_v41 = vmul.f32 %v5521_v62, %v5703_v44  ;;  %v5748_v8 = vmul.f32 %v5530_v42, %v1126_v6  ;;  %v1726_v13 = vld [vmem:[#allocation2 + $0x230] sm:$0xff] }
 0x16e   : > { %v2291_v58 = vadd.f32 %v2259_v43, %v2191_v25  ;;  %v2060_v49 = vmul.f32 %v5325_v19, %v1525_v5  ;;  %v5751_v46 = vadd.f32 %v2458_v17, %v2390_v39  ;;  %v1661_v1 = vmul.f32 %v5446_v56, %v1625_v45  ;;  %v1825_v3 = vld [vmem:[#allocation2 + $0x229] sm:$0xff]  ;;  %v1826_v27 = vld [vmem:[#allocation2 + $0x231] sm:$0xff] }
 0x16f   : > { %v1593_v26 = vadd.f32 %v1561_v7, %v1493_v21  ;;  %v1761_v28 = vmul.f32 %v5488_v37, %v1725_v30  ;;  %v1992_v63 = vadd.f32 %v1960_v60, %v1892_v24  ;;  %v2160_v44 = vmul.f32 %v5334_v57, %v1625_v45  ;;  %v1925_v40 = vld [vmem:[#allocation2 + $0x22a] sm:$0xff] }
 0x170   : > { %v2391_v35 = vadd.f32 %v2359_v50, %v2291_v58  ;;  %v2092_v14 = vadd.f32 %v2060_v49, %v1991_v2  ;;  %v2260_v11 = vmul.f32 %v5406_v22, %v1725_v30  ;;  %v5758_v53 = vmul.f32 %v5521_v62, %v1525_v5  ;;  %v1926_v2 = vld [vmem:[#allocation2 + $0x232] sm:$0xff] }
 0x171   : > { %v1693_v6 = vadd.f32 %v1661_v1, %v1593_v26  ;;  %v1562_v21 = vmul.f32 %v5433_v32, %v1526_v9  ;;  %v5762_v25 = vmul.f32 %v5530_v42, %v1625_v45  ;;  %v1662_v60 = vmul.f32 %v5446_v56, %v1626_v55 }
 0x172   : > { %v2192_v43 = vadd.f32 %v2160_v44, %v2092_v14  ;;  %v1762_v50 = vmul.f32 %v5488_v37, %v1726_v13  ;;  %v5766_v39 = vadd.f32 %v2459_v48, %v2391_v35  ;;  %v1861_v5 = vmul.f32 %v5587_v4, %v1825_v3 }
 0x173   : > { %v1793_v17 = vadd.f32 %v1761_v28, %v1693_v6  ;;  %v1594_v30 = vadd.f32 %v1562_v21, %v1494_v23  ;;  %v1862_v32 = vmul.f32 %v5587_v4, %v1826_v27  ;;  %v1961_v7 = vmul.f32 %v5600_v54, %v1925_v40  ;;  %v5780_v4 = vld [vmem:[%s6460_s1 + $0x22] ss:$0 sm:$0xff] }
 0x174   : > { %v2292_v24 = vadd.f32 %v2260_v11, %v2192_v43  ;;  %v2061_v58 = vmul.f32 %v5325_v19, %v1526_v9  ;;  %v1962_v56 = vmul.f32 %v5600_v54, %v1926_v2  ;;  %v2360_v37 = vmul.f32 %v5503_v10, %v1825_v3  ;;  %v5786_v54 = vld [vmem:[%s6460_s1 + $0x23] ss:$0 sm:$0xff]  ;;  %v2897_v3 = vld [vmem:[#allocation2 + $0x8a] sm:$0xff] }
 0x175   : > { %v1694_v45 = vadd.f32 %v1662_v60, %v1594_v30  ;;  %v1893_v49 = vadd.f32 %v1861_v5, %v1793_v17  ;;  %v2161_v48 = vmul.f32 %v5334_v57, %v1626_v55  ;;  %v2261_v23 = vmul.f32 %v5406_v22, %v1726_v13  ;;  %v2797_v57 = vld [vmem:[#allocation2 + $0x89] sm:$0xff]  ;;  %v5795_v13 = vld [vmem:[%s6460_s1 + $0x24] ss:$0 sm:$0xff]  ;;  %v6545_v17 = vld [vmem:[#allocation22_spill] sm:$0xff] }
 0x176   : > { %v2093_v26 = vadd.f32 %v2061_v58, %v1992_v63  ;;  %v2361_v1 = vmul.f32 %v5503_v10, %v1826_v27  ;;  %v2392_v35 = vadd.f32 %v2360_v37, %v2292_v24  ;;  %v2460_v14 = vmul.f32 %v5512_v15, %v1925_v40  ;;  %v3828_v27 = vld [vmem:[#allocation2 + $0x88] sm:$0xff]  ;;  %v3829_v5 = vld [vmem:[#allocation2 + $0x90] sm:$0xff] }
 0x177   : > { %v1794_v28 = vadd.f32 %v1762_v50, %v1694_v45  ;;  %v1993_v19 = vadd.f32 %v1961_v7, %v1893_v49  ;;  %v2461_v22 = vmul.f32 %v5512_v15, %v1926_v2  ;;  %v5790_v10 = vmul.f32 %v5521_v62, %v1526_v9  ;;  %v6543_v43 = vld [vmem:[#allocation20_spill] sm:$0xff]  ;;  %v2798_v50 = vld [vmem:[#allocation2 + $0x91] sm:$0xff] }
 0x178   : > { %v2193_v63 = vadd.f32 %v2161_v48, %v2093_v26  ;;  %v2565_v44 = vadd.f32 %v4490_v0, %v4471_v20  ;;  %v5800_v11 = vmul.f32 %v5530_v42, %v1626_v55  ;;  %v2733_v15 = vmul.f32 %v3828_v27, %v5780_v4  ;;  %v6544_v2 = vld [vmem:[#allocation4_spill] sm:$0xff] }
 0x179   : > { %v1894_v6 = vadd.f32 %v1862_v32, %v1794_v28  ;;  %v2094_v21 = vadd.f32 %v4231_v31, %v1993_v19  ;;  %v2833_v40 = vmul.f32 %v5786_v54, %v2797_v57  ;;  %v2566_v60 = vadd.f32 %v6543_v43, %v4487_v38  ;;  %v6546_v32 = vld [vmem:[#allocation21_spill] sm:$0xff]  ;;  %v6547_v7 = vld [vmem:[#allocation24_spill] sm:$0xff]  ;;  %v6548_v38 = vld [vmem:[#allocation3_spill] sm:$0xff] }
 0x17a   : > { %v2293_v62 = vadd.f32 %v2261_v23, %v2193_v63  ;;  %v2665_v9 = vadd.f32 %v4498_v47, %v2565_v44  ;;  %v5808_v0 = vadd.f32 %v2460_v14, %v2392_v35  ;;  %v2933_v55 = vmul.f32 %v5795_v13, %v2897_v3  ;;  %v2898_v47 = vld [vmem:[#allocation2 + $0x92] sm:$0xff]  ;;  %v2799_v48 = vld [vmem:[#allocation2 + $0xa9] sm:$0xff] }
 0x17b   : > { %v1994_v20 = vadd.f32 %v1962_v56, %v1894_v6  ;;  %v2194_v42 = vadd.f32 %v6544_v2, %v2094_v21  ;;  %v2666_v30 = vadd.f32 %v6545_v17, %v2566_v60  ;;  %v2734_v24 = vmul.f32 %v3829_v5, %v5780_v4  ;;  %v6549_v56 = vld [vmem:[#allocation6_spill] sm:$0xff]  ;;  %v6550_v19 = vld [vmem:[#allocation25_spill] sm:$0xff]  ;;  %v3830_v14 = vld [vmem:[#allocation2 + $0xa8] sm:$0xff] }
 0x17c   : > { %v2765_v31 = vadd.f32 %v2733_v15, %v2665_v9  ;;  %v2567_v58 = vadd.f32 %v6547_v7, %v6546_v32  ;;  %v2393_v45 = vadd.f32 %v2361_v1, %v2293_v62  ;;  %v2834_v26 = vmul.f32 %v5786_v54, %v2798_v50  ;;  %v6551_v63 = vld [vmem:[#allocation5_spill] sm:$0xff]  ;;  %v6552_v3 = vld [vmem:[#allocation8_spill] sm:$0xff]  ;;  %v5826_v1 = vld [vmem:[%s6461_s2] ss:$0 sm:$0xff] }
 0x17d   : > { %v2095_v49 = vadd.f32 %v6548_v38, %v1994_v20  ;;  %v2294_v37 = vadd.f32 %v6549_v56, %v2194_v42  ;;  %v2766_v28 = vadd.f32 %v2734_v24, %v2666_v30  ;;  %v2735_v57 = vmul.f32 %v3830_v14, %v5780_v4  ;;  %v2899_v27 = vld [vmem:[#allocation2 + $0xaa] sm:$0xff]  ;;  %v6553_v15 = vld [vmem:[#allocation23_spill] sm:$0xff]  ;;  %v6554_v62 = vld [vmem:[#allocation26_spill] sm:$0xff] }
 0x17e   : > { %v2865_v23 = vadd.f32 %v2833_v40, %v2765_v31  ;;  %v2667_v35 = vadd.f32 %v6550_v19, %v2567_v58  ;;  %v2934_v21 = vmul.f32 %v5795_v13, %v2898_v47  ;;  %v2568_v9 = vadd.f32 %v6554_v62, %v6553_v15  ;;  %v2800_v20 = vld [vmem:[#allocation2 + $0xb1] sm:$0xff]  ;;  %v6555_v42 = vld [vmem:[#allocation7_spill] sm:$0xff] }
 0x17f   : > { %v2195_v44 = vadd.f32 %v6551_v63, %v2095_v49  ;;  %v2394_v6 = vadd.f32 %v6552_v3, %v2294_v37  ;;  %v2866_v43 = vadd.f32 %v2834_v26, %v2766_v28  ;;  %v2835_v50 = vmul.f32 %v5786_v54, %v2799_v48  ;;  %v6556_v17 = vld [vmem:[#allocation27_spill] sm:$0xff]  ;;  %v3831_v5 = vld [vmem:[#allocation2 + $0xb0] sm:$0xff]  ;;  %v6557_v38 = vld [vmem:[#allocation10_spill] sm:$0xff] }
 0x180   : > { %v2965_v40 = vadd.f32 %v2933_v55, %v2865_v23  ;;  %v2767_v60 = vadd.f32 %v2735_v57, %v2667_v35  ;;  %v5832_v2 = vadd.f32 %v2461_v22, %v2393_v45  ;;  %v2668_v30 = vadd.f32 %v6556_v17, %v2568_v9  ;;  %v2900_v47 = vld [vmem:[#allocation2 + $0xb2] sm:$0xff]  ;;  %v6558_v45 = vld [vmem:[#allocation28_spill] sm:$0xff] }
 0x181   : > { %v2295_v31 = vadd.f32 %v6555_v42, %v2195_v44  ;;  %v2736_v24 = vmul.f32 %v3831_v5, %v5780_v4  ;;  %v2966_v7 = vadd.f32 %v2934_v21, %v2866_v43  ;;  %v2935_v55 = vmul.f32 %v5795_v13, %v2899_v27  ;;  %v6559_v37 = vld [vmem:[#allocation30_spill] sm:$0xff]  ;;  %v2801_v35 = vld [vmem:[#allocation2 + $0xc9] sm:$0xff]  ;;  %v6561_v44 = vld [vmem:[#allocation31_spill] sm:$0xff] }
 0x182   : > { %v3003_v32 = vadd.f32 %v5826_v1, %v2965_v40  ;;  %v2867_v58 = vadd.f32 %v2835_v50, %v2767_v60  ;;  %v5840_v49 = vadd.f32 %v6557_v38, %v2394_v6  ;;  %v2836_v22 = vmul.f32 %v5786_v54, %v2800_v20  ;;  %v6560_v14 = vld [vmem:[#allocation9_spill] sm:$0xff]  ;;  %v3832_v6 = vld [vmem:[#allocation2 + $0xc8] sm:$0xff] }
 0x183   : > { %v2768_v56 = vadd.f32 %v2736_v24, %v2668_v30  ;;  %v2569_v26 = vadd.f32 %v6559_v37, %v6558_v45  ;;  %v3004_v23 = vadd.f32 %v5826_v1, %v2966_v7  ;;  %v2936_v19 = vmul.f32 %v5795_v13, %v2900_v47  ;;  %v2901_v27 = vld [vmem:[#allocation2 + $0xca] sm:$0xff]  ;;  %v2902_v45 = vld [vmem:[#allocation2 + $0xd2] sm:$0xff]  ;;  %v6565_v37 = vld [vmem:[#allocation11_spill] sm:$0xff] }
 0x184   : > { %v3067_v48 = vmul.f32 0.044715, %v3003_v32  ;;  %v2967_v28 = vadd.f32 %v2935_v55, %v2867_v58  ;;  %v2395_v57 = vadd.f32 %v6560_v14, %v2295_v31  ;;  %v2737_v21 = vmul.f32 %v3832_v6, %v5780_v4  ;;  %v6562_v20 = vld [vmem:[#allocation29_spill] sm:$0xff]  ;;  %v6563_v42 = vld [vmem:[#allocation32_spill] sm:$0xff]  ;;  %v6564_v55 = vld [vmem:[#allocation34_spill] sm:$0xff] }
 0x185   : > { %v2868_v63 = vadd.f32 %v2836_v22, %v2768_v56  ;;  %v2669_v3 = vadd.f32 %v6561_v44, %v2569_v26  ;;  %v5850_v15 = vmul.f32 0.5, %v3003_v32  ;;  %v3068_v9 = vmul.f32 0.044715, %v3004_v23  ;;  %v2802_v47 = vld [vmem:[#allocation2 + $0xd1] sm:$0xff] }
 0x186   : > { %v3099_v62 = vmul.f32 %v3067_v48, %v3003_v32  ;;  %v3005_v40 = vadd.f32 %v5826_v1, %v2967_v28  ;;  %v2837_v50 = vmul.f32 %v5786_v54, %v2801_v35  ;;  %v2570_v31 = vadd.f32 %v6563_v42, %v6562_v20  ;;  %v3833_v56 = vld [vmem:[#allocation2 + $0xd0] sm:$0xff] }
 0x187   : > { %v2968_v43 = vadd.f32 %v2936_v19, %v2868_v63  ;;  %v2769_v60 = vadd.f32 %v2737_v21, %v2669_v3  ;;  %v3100_v30 = vmul.f32 %v3068_v9, %v3004_v23  ;;  %v2937_v24 = vmul.f32 %v5795_v13, %v2901_v27 }
 0x188   : > { %v3131_v17 = vmul.f32 %v3099_v62, %v3003_v32  ;;  %v3069_v5 = vmul.f32 0.044715, %v3005_v40  ;;  %v2670_v38 = vadd.f32 %v6564_v55, %v2570_v31  ;;  %v2738_v22 = vmul.f32 %v3833_v56, %v5780_v4 }
 0x189   : > { %v3006_v7 = vadd.f32 %v5826_v1, %v2968_v43  ;;  %v2869_v58 = vadd.f32 %v2837_v50, %v2769_v60  ;;  %v5861_v26 = vadd.f32 %v6565_v37, %v2395_v57  ;;  %v3132_v28 = vmul.f32 %v3100_v30, %v3004_v23  ;;  %v6566_v57 = vld [vmem:[#allocation33_spill] sm:$0xff]  ;;  %v6567_v60 = vld [vmem:[#allocation36_spill] sm:$0xff] }
 0x18a   : > { %v3163_v48 = vadd.f32 %v3131_v17, %v3003_v32  ;;  %v3101_v19 = vmul.f32 %v3069_v5, %v3005_v40  ;;  %v2770_v63 = vadd.f32 %v2738_v22, %v2670_v38  ;;  %v2838_v44 = vmul.f32 %v5786_v54, %v2802_v47  ;;  %v3834_v38 = vld [vmem:[#allocation2 + $0xe8] sm:$0xff] }
 0x18b   : > { %v3070_v35 = vmul.f32 0.044715, %v3006_v7  ;;  %v2969_v14 = vadd.f32 %v2937_v24, %v2869_v58  ;;  %v3164_v6 = vadd.f32 %v3132_v28, %v3004_v23  ;;  %v2938_v27 = vmul.f32 %v5795_v13, %v2902_v45  ;;  %v2803_v24 = vld [vmem:[#allocation2 + $0xe9] sm:$0xff] }
 0x18c   : > { %v3195_v3 = vmul.f32 0.7978846, %v3163_v48  ;;  %v3133_v21 = vmul.f32 %v3101_v19, %v3005_v40  ;;  %v2870_v43 = vadd.f32 %v2838_v44, %v2770_v63  ;;  %v2571_v32 = vadd.f32 %v6567_v60, %v6566_v57  ;;  %v6568_v58 = vld [vmem:[#allocation37_spill] sm:$0xff] }
 0x18d   : > { %v3102_v62 = vmul.f32 %v3070_v35, %v3006_v7  ;;  %v5866_v9 = vadd.f32 %v5826_v1, %v2969_v14  ;;  %v5870_v50 = vmul.f32 0.5, %v3004_v23  ;;  %v3196_v20 = vmul.f32 0.7978846, %v3164_v6  ;;  %v2903_v22 = vld [vmem:[#allocation2 + $0xea] sm:$0xff]  ;;  %v6569_v35 = vld [vmem:[#allocation35_spill] sm:$0xff]  ;;  %v6570_v14 = vld [vmem:[#allocation38_spill] sm:$0xff] }
 0x18e   : > { %3720 = vtanh.f32 %v3195_v3  ;;  %v3165_v42 = vadd.f32 %v3133_v21, %v3005_v40  ;;  %v5872_v31 = vmul.f32 0.5, %v3005_v40  ;;  %v2970_v5 = vadd.f32 %v2938_v27, %v2870_v43  ;;  %v2804_v48 = vld [vmem:[#allocation2 + $0xf1] sm:$0xff] }
 0x18f   : > { %v3134_v17 = vmul.f32 %v3102_v62, %v3006_v7  ;;  %v3071_v30 = vmul.f32 0.044715, %v5866_v9  ;;  %3722 = vtanh.f32 %v3196_v20  ;;  %v2671_v55 = vadd.f32 %v6568_v58, %v2571_v32  ;;  %v2904_v21 = vld [vmem:[#allocation2 + $0xf2] sm:$0xff]  ;;  %v6571_v62 = vld [vmem:[#allocation39_spill] sm:$0xff]  ;;  %v2805_v20 = vld [vmem:[#allocation2 + $0x109] sm:$0xff] }
 0x190   : > { %v3197_v47 = vmul.f32 0.7978846, %v3165_v42  ;;  %v2739_v56 = vmul.f32 %v3834_v38, %v5780_v4  ;;  %v5877_v45 = vmul.f32 0.5, %v3006_v7  ;;  %v5881_v40 = vadd.f32 %v5826_v1, %v2970_v5  ;;  %v3835_v57 = vld [vmem:[#allocation2 + $0xf0] sm:$0xff]  ;;  %v6573_v5 = vld [vmem:[#allocation42_spill] sm:$0xff] }
 0x191   : > { %v3166_v23 = vadd.f32 %v3134_v17, %v3006_v7  ;;  %v3103_v37 = vmul.f32 %v3071_v30, %v5866_v9  ;;  %v2839_v19 = vmul.f32 %v5786_v54, %v2803_v24  ;;  %v2572_v63 = vadd.f32 %v6570_v14, %v6569_v35  ;;  %v6572_v30 = vld [vmem:[#allocation40_spill] sm:$0xff] }
 0x192   : > { %3724 = vtanh.f32 %v3197_v47  ;;  %v2771_v28 = vadd.f32 %v2739_v56, %v2671_v55  ;;  %v3072_v6 = vmul.f32 0.044715, %v5881_v40  ;;  %v2939_v7 = vmul.f32 %v5795_v13, %v2903_v22  ;;  %v2905_v47 = vld [vmem:[#allocation2 + $0x10a] sm:$0xff] }
 0x193   : > { %v3198_v44 = vmul.f32 0.7978846, %v3166_v23  ;;  %v3135_v3 = vmul.f32 %v3103_v37, %v5866_v9  ;;  %v2672_v43 = vadd.f32 %v6571_v62, %v2572_v63  ;;  %v2740_v60 = vmul.f32 %v3835_v57, %v5780_v4  ;;  %v3836_v56 = vld [vmem:[#allocation2 + $0x108] sm:$0xff] }
 0x194   : > { %v2871_v27 = vadd.f32 %v2839_v19, %v2771_v28  ;;  %v2840_v32 = vmul.f32 %v5786_v54, %v2804_v48  ;;  %v3104_v17 = vmul.f32 %v3072_v6, %v5881_v40  ;;  %v2573_v24 = vadd.f32 %v6573_v5, %v6572_v30  ;;  %v6574_v48 = vld [vmem:[#allocation43_spill] sm:$0xff]  ;;  %v6576_v6 = vld [vmem:[#allocation44_spill] sm:$0xff]  ;;  %v3837_v30 = vld [vmem:[#allocation2 + $0x110] sm:$0xff] }
 0x195   : > { %3726 = vtanh.f32 %v3198_v44  ;;  %v3167_v42 = vadd.f32 %v3135_v3, %v5866_v9  ;;  %v2772_v55 = vadd.f32 %v2740_v60, %v2672_v43  ;;  %v2940_v38 = vmul.f32 %v5795_v13, %v2904_v21  ;;  %v6575_v3 = vld [vmem:[#allocation41_spill] sm:$0xff]  ;;  %v5911_v60 = vld [vmem:[%s6462_s3] ss:$0 sm:$0xff] }
 0x196   : > { %v2971_v58 = vadd.f32 %v2939_v7, %v2871_v27  ;;  %v2741_v22 = vmul.f32 %v3836_v56, %v5780_v4  ;;  %v3136_v37 = vmul.f32 %v3104_v17, %v5881_v40  ;;  %v2673_v28 = vadd.f32 %v6574_v48, %v2573_v24  ;;  %v2806_v43 = vld [vmem:[#allocation2 + $0x111] sm:$0xff] }
 0x197   : > { %v3199_v23 = vmul.f32 0.7978846, %v3167_v42  ;;  %v2841_v19 = vmul.f32 %v5786_v54, %v2805_v20  ;;  %v2872_v63 = vadd.f32 %v2840_v32, %v2772_v55  ;;  %v2941_v44 = vmul.f32 %v5795_v13, %v2905_v47  ;;  %v6577_v42 = vld [vmem:[#allocation46_spill] sm:$0xff] }
 0x198   : > { %v3721_v35 = vpop.eup %3720  ;;  %v5902_v14 = vadd.f32 %v5826_v1, %v2971_v58  ;;  %v2574_v7 = vadd.f32 %v6576_v6, %v6575_v3  ;;  %v3168_v27 = vadd.f32 %v3136_v37, %v5881_v40  ;;  %v2773_v62 = vadd.f32 %v2741_v22, %v2673_v28  ;;  %v5920_v22 = vld [vmem:[%s6463_s4] ss:$0 sm:$0xff] }
 0x199   : > { %v3259_v21 = vadd.f32 1.0, %v3721_v35  ;;  %3728 = vtanh.f32 %v3199_v23  ;;  %v3723_v57 = vpop.eup %3722  ;;  %v2972_v32 = vadd.f32 %v2940_v38, %v2872_v63  ;;  %v2742_v5 = vmul.f32 %v3837_v30, %v5780_v4  ;;  %v3399_v35 = vld [vmem:[%s4183_s24] sm:$0xff] }
 0x19a   : > { %v3073_v20 = vmul.f32 0.044715, %v5902_v14  ;;  %v2674_v17 = vadd.f32 %v6577_v42, %v2574_v7  ;;  %v3260_v47 = vadd.f32 1.0, %v3723_v57  ;;  %v3200_v58 = vmul.f32 0.7978846, %v3168_v27 }
 0x19b   : > { %v3291_v24 = vmul.f32 %v3259_v21, %v5850_v15  ;;  %v2873_v55 = vadd.f32 %v2841_v19, %v2773_v62  ;;  %v5924_v38 = vadd.f32 %v5826_v1, %v2972_v32  ;;  %v2842_v48 = vmul.f32 %v5786_v54, %v2806_v43  ;;  %v2906_v21 = vld [vmem:[#allocation2 + $0x112] sm:$0xff] }
 0x19c   : > { %v3725_v56 = vpop.eup %3724  ;;  %v3105_v23 = vmul.f32 %v3073_v20, %v5902_v14  ;;  %v2774_v37 = vadd.f32 %v2742_v5, %v2674_v17  ;;  %v3292_v28 = vmul.f32 %v3260_v47, %v5870_v50  ;;  %3730 = vtanh.f32 %v3200_v58 }
 0x19d   : > { %v3329_v15 = vmul.f32 %v5911_v60, %v3291_v24  ;;  %v3261_v19 = vadd.f32 1.0, %v3725_v56  ;;  %v3039_v63 = vmul.f32 0.5, %v5866_v9  ;;  %v3074_v6 = vmul.f32 0.044715, %v5924_v38  ;;  %v3400_v9 = vld [vmem:[%s4183_s24 + $0x8] sm:$0xff]  ;;  %v3401_v24 = vld [vmem:[%s4183_s24 + $0x10] sm:$0xff] }
 0x19e   : > { %v3137_v3 = vmul.f32 %v3105_v23, %v5902_v14  ;;  %v2973_v7 = vadd.f32 %v2941_v44, %v2873_v55  ;;  %v3330_v43 = vmul.f32 %v5911_v60, %v3292_v28  ;;  %v2874_v50 = vadd.f32 %v2842_v48, %v2774_v37 }
 0x19f   : > { %v3727_v27 = vpop.eup %3726  ;;  %v3367_v62 = vadd.f32 %v5920_v22, %v3329_v15  ;;  %v3293_v57 = vmul.f32 %v3261_v19, %v5872_v31  ;;  %v3106_v32 = vmul.f32 %v3074_v6, %v5924_v38  ;;  %v2942_v5 = vmul.f32 %v5795_v13, %v2906_v21  ;;  %v6578_v21 = vld [vmem:[#allocation45_spill] sm:$0xff] }
 0x1a0   : > { %v3262_v20 = vadd.f32 1.0, %v3727_v27  ;;  %v3169_v44 = vadd.f32 %v3137_v3, %v5902_v14  ;;  %v5947_v42 = vadd.f32 %v5826_v1, %v2973_v7  ;;  %v3368_v31 = vadd.f32 %v5920_v22, %v3330_v43  ;;  %v3402_v3 = vld [vmem:[%s4183_s24 + $0x18] sm:$0xff]  ;;  %v6579_v27 = vld [vmem:[#allocation48_spill] sm:$0xff] }
 0x1a1   : > { %v3431_v17 = vadd.f32 %v3399_v35, %v3367_v62  ;;  %v3331_v30 = vmul.f32 %v5911_v60, %v3293_v57  ;;  %v3040_v58 = vmul.f32 0.5, %v5881_v40  ;;  %v3138_v56 = vmul.f32 %v3106_v32, %v5924_v38 }
 0x1a2   : > { %v3294_v47 = vmul.f32 %v3262_v20, %v5877_v45  ;;  %v3201_v55 = vmul.f32 0.7978846, %v3169_v44  ;;  %v3432_v37 = vadd.f32 %v3400_v9, %v3368_v31  ;;  %v3075_v15 = vmul.f32 0.044715, %v5947_v42  ;;  %v2807_v20 = vld [vmem:[#allocation2 + $0x129] sm:$0xff] }
 0x1a3   : > { %v3729_v23 = vpop.eup %3728  ;;  %3463 = vst.msk [vmem:[%s5941_s13] sm:$0xff] %vm315_vm0, %v3431_v17  ;;  %v3369_v48 = vadd.f32 %v5920_v22, %v3331_v30  ;;  %v2974_v28 = vadd.f32 %v2942_v5, %v2874_v50  ;;  %v3170_v45 = vadd.f32 %v3138_v56, %v5924_v38  ;;  %v2575_v62 = vadd.f32 %v6579_v27, %v6578_v21  ;;  %v6580_v31 = vld [vmem:[#allocation49_spill] sm:$0xff]  ;;  %v3838_v5 = vld [vmem:[#allocation2 + $0x128] sm:$0xff]  ;;  %v3403_v56 = vld [vmem:[%s4183_s24 + $0x20] sm:$0xff] }
 0x1a4   : > { %v3332_v19 = vmul.f32 %v5911_v60, %v3294_v47  ;;  %v3263_v35 = vadd.f32 1.0, %v3729_v23  ;;  %3732 = vtanh.f32 %v3201_v55  ;;  %3464 = vst.msk [vmem:[%s5941_s13 + $0x8] sm:$0xff] %vm315_vm0, %v3432_v37  ;;  %v3107_v6 = vmul.f32 %v3075_v15, %v5947_v42 }
 0x1a5   : > { %v3433_v40 = vadd.f32 %v3401_v24, %v3369_v48  ;;  %v5967_v7 = vadd.f32 %v5826_v1, %v2974_v28  ;;  %v3041_v50 = vmul.f32 0.5, %v5902_v14  ;;  %v3202_v9 = vmul.f32 0.7978846, %v3170_v45  ;;  %v2907_v14 = vld [vmem:[#allocation2 + $0x12a] sm:$0xff]  ;;  %v6581_v45 = vld [vmem:[#allocation47_spill] sm:$0xff] }
 0x1a6   : > { %v3370_v43 = vadd.f32 %v5920_v22, %v3332_v19  ;;  %v3295_v57 = vmul.f32 %v3263_v35, %v3039_v63  ;;  %v3731_v44 = vpop.eup %3730  ;;  %v3139_v32 = vmul.f32 %v3107_v6, %v5947_v42  ;;  %v2675_v30 = vadd.f32 %v6580_v31, %v2575_v62  ;;  %v2808_v62 = vld [vmem:[#allocation2 + $0x131] sm:$0xff] }
 0x1a7   : > { %3465 = vst.msk [vmem:[%s5941_s13 + $0x10] sm:$0xff] %vm315_vm0, %v3433_v40  ;;  %v3076_v17 = vmul.f32 0.044715, %v5967_v7  ;;  %v2743_v24 = vmul.f32 %v3838_v5, %v5780_v4  ;;  %v3264_v55 = vadd.f32 1.0, %v3731_v44  ;;  %3734 = vtanh.f32 %v3202_v9  ;;  %v3404_v44 = vld [vmem:[%s4183_s24 + $0x28] sm:$0xff] }
 0x1a8   : > { %v3434_v47 = vadd.f32 %v3402_v3, %v3370_v43  ;;  %v3333_v63 = vmul.f32 %v5911_v60, %v3295_v57  ;;  %v3171_v23 = vadd.f32 %v3139_v32, %v5947_v42  ;;  %v2843_v15 = vmul.f32 %v5786_v54, %v2807_v20  ;;  %v3839_v20 = vld [vmem:[#allocation2 + $0x130] sm:$0xff] }
 0x1a9   : > { %v3108_v37 = vmul.f32 %v3076_v17, %v5967_v7  ;;  %v2775_v48 = vadd.f32 %v2743_v24, %v2675_v30  ;;  %v3296_v19 = vmul.f32 %v3264_v55, %v3040_v58  ;;  %v3042_v35 = vmul.f32 0.5, %v5924_v38  ;;  %v2908_v38 = vld [vmem:[#allocation2 + $0x132] sm:$0xff] }
 0x1aa   : > { %3466 = vst.msk [vmem:[%s5941_s13 + $0x18] sm:$0xff] %vm315_vm0, %v3434_v47  ;;  %v3371_v28 = vadd.f32 %v5920_v22, %v3333_v63  ;;  %v2576_v40 = vadd.f32 %v5112_v18, %v6581_v45  ;;  %v3203_v3 = vmul.f32 0.7978846, %v3171_v23  ;;  %v2943_v27 = vmul.f32 %v5795_v13, %v2907_v14  ;;  %v6582_v24 = vld [vmem:[#allocation50_spill] sm:$0xff]  ;;  %v6583_v47 = vld [vmem:[#allocation52_spill] sm:$0xff] }
 0x1ab   : > { %v3140_v6 = vmul.f32 %v3108_v37, %v5967_v7  ;;  %v2875_v21 = vadd.f32 %v2843_v15, %v2775_v48  ;;  %v3334_v57 = vmul.f32 %v5911_v60, %v3296_v19  ;;  %v2744_v58 = vmul.f32 %v3839_v20, %v5780_v4  ;;  %v2809_v23 = vld [vmem:[#allocation2 + $0x149] sm:$0xff] }
 0x1ac   : > { %v3435_v43 = vadd.f32 %v3403_v56, %v3371_v28  ;;  %v2676_v9 = vadd.f32 %v5116_v16, %v2576_v40  ;;  %v5997_v18 = vmul.f32 0.5, %v5947_v42  ;;  %3736 = vtanh.f32 %v3203_v3  ;;  %v6584_v15 = vld [vmem:[#allocation53_spill] sm:$0xff]  ;;  %v3840_v19 = vld [vmem:[#allocation2 + $0x148] sm:$0xff] }
 0x1ad   : > { %v3172_v32 = vadd.f32 %v3140_v6, %v5967_v7  ;;  %v2975_v17 = vadd.f32 %v2943_v27, %v2875_v21  ;;  %v3372_v30 = vadd.f32 %v5920_v22, %v3334_v57  ;;  %v2844_v16 = vmul.f32 %v5786_v54, %v2808_v62  ;;  %v2909_v40 = vld [vmem:[#allocation2 + $0x14a] sm:$0xff] }
 0x1ae   : > { %v3733_v31 = vpop.eup %3732  ;;  %3467 = vst.msk [vmem:[%s5941_s13 + $0x20] sm:$0xff] %vm315_vm0, %v3435_v43  ;;  %v2776_v5 = vadd.f32 %v2744_v58, %v2676_v9  ;;  %v2577_v63 = vadd.f32 %v6583_v47, %v6582_v24  ;;  %v2944_v56 = vmul.f32 %v5795_v13, %v2908_v38  ;;  %v2745_v45 = vmul.f32 %v3840_v19, %v5780_v4  ;;  %v6585_v9 = vld [vmem:[#allocation51_spill] sm:$0xff] }
 0x1af   : > { %v3265_v55 = vadd.f32 1.0, %v3733_v31  ;;  %v3204_v14 = vmul.f32 0.7978846, %v3172_v32  ;;  %v6007_v42 = vadd.f32 %v5826_v1, %v2975_v17  ;;  %v3436_v37 = vadd.f32 %v3404_v44, %v3372_v30  ;;  %v2810_v44 = vld [vmem:[#allocation2 + $0x151] sm:$0xff] }
 0x1b0   : > { %v2876_v48 = vadd.f32 %v2844_v16, %v2776_v5  ;;  %v2677_v28 = vadd.f32 %v6584_v15, %v2577_v63  ;;  %v6013_v6 = vmul.f32 0.5, %v5967_v7  ;;  %v2845_v57 = vmul.f32 %v5786_v54, %v2809_v23  ;;  %v3405_v32 = vld [vmem:[%s4183_s24 + $0x30] sm:$0xff]  ;;  %v6586_v63 = vld [vmem:[#allocation54_spill] sm:$0xff] }
 0x1b1   : > { %v3297_v3 = vmul.f32 %v3265_v55, %v3041_v50  ;;  %3738 = vtanh.f32 %v3204_v14  ;;  %v3077_v21 = vmul.f32 0.044715, %v6007_v42  ;;  %v3735_v27 = vpop.eup %3734  ;;  %3468 = vst.msk [vmem:[%s5941_s13 + $0x28] sm:$0xff] %vm315_vm0, %v3436_v37  ;;  %v2578_v20 = vadd.f32 %v5193_v36, %v6585_v9  ;;  %v3841_v5 = vld [vmem:[#allocation2 + $0x150] sm:$0xff]  ;;  %v6587_v55 = vld [vmem:[#allocation56_spill] sm:$0xff] }
 0x1b2   : > { %v2976_v62 = vadd.f32 %v2944_v56, %v2876_v48  ;;  %v2777_v43 = vadd.f32 %v2745_v45, %v2677_v28  ;;  %v3266_v38 = vadd.f32 1.0, %v3735_v27  ;;  %v2945_v7 = vmul.f32 %v5795_v13, %v2909_v40 }
 0x1b3   : > { %v3335_v58 = vmul.f32 %v5911_v60, %v3297_v3  ;;  %v3109_v50 = vmul.f32 %v3077_v21, %v6007_v42  ;;  %v2678_v30 = vadd.f32 %v5201_v12, %v2578_v20  ;;  %v2746_v16 = vmul.f32 %v3841_v5, %v5780_v4  ;;  %v2910_v12 = vld [vmem:[#allocation2 + $0x152] sm:$0xff]  ;;  %v2811_v3 = vld [vmem:[#allocation2 + $0x169] sm:$0xff] }
 0x1b4   : > { %v6026_v17 = vadd.f32 %v5826_v1, %v2976_v62  ;;  %v2877_v31 = vadd.f32 %v2845_v57, %v2777_v43  ;;  %v3298_v24 = vmul.f32 %v3266_v38, %v3042_v35  ;;  %v2579_v14 = vadd.f32 %v6587_v55, %v6586_v63  ;;  %v6588_v35 = vld [vmem:[#allocation57_spill] sm:$0xff]  ;;  %v3406_v21 = vld [vmem:[%s4183_s24 + $0x38] sm:$0xff]  ;;  %v3842_v38 = vld [vmem:[#allocation2 + $0x168] sm:$0xff] }
 0x1b5   : > { %v3373_v36 = vadd.f32 %v5920_v22, %v3335_v58  ;;  %v3141_v47 = vmul.f32 %v3109_v50, %v6007_v42  ;;  %v2778_v37 = vadd.f32 %v2746_v16, %v2678_v30  ;;  %v2846_v48 = vmul.f32 %v5786_v54, %v2810_v44  ;;  %v2911_v30 = vld [vmem:[#allocation2 + $0x16a] sm:$0xff] }
 0x1b6   : > { %v3078_v56 = vmul.f32 0.044715, %v6026_v17  ;;  %v2977_v23 = vadd.f32 %v2945_v7, %v2877_v31  ;;  %v3737_v15 = vpop.eup %3736  ;;  %v3336_v19 = vmul.f32 %v5911_v60, %v3298_v24  ;;  %v2679_v40 = vadd.f32 %v6588_v35, %v2579_v14 }
 0x1b7   : > { %v3437_v28 = vadd.f32 %v3405_v32, %v3373_v36  ;;  %v3173_v45 = vadd.f32 %v3141_v47, %v6007_v42  ;;  %v3267_v27 = vadd.f32 1.0, %v3737_v15  ;;  %v2878_v57 = vadd.f32 %v2846_v48, %v2778_v37  ;;  %v6589_v48 = vld [vmem:[#allocation55_spill] sm:$0xff] }
 0x1b8   : > { %v3110_v62 = vmul.f32 %v3078_v56, %v6026_v17  ;;  %v3015_v43 = vadd.f32 %v5826_v1, %v2977_v23  ;;  %v3374_v9 = vadd.f32 %v5920_v22, %v3336_v19  ;;  %v2946_v58 = vmul.f32 %v5795_v13, %v2910_v12  ;;  %v6590_v12 = vld [vmem:[#allocation58_spill] sm:$0xff] }
 0x1b9   : > { %3469 = vst.msk [vmem:[%s5941_s13 + $0x30] sm:$0xff] %vm315_vm0, %v3437_v28  ;;  %v3205_v20 = vmul.f32 0.7978846, %v3173_v45  ;;  %v2747_v50 = vmul.f32 %v3842_v38, %v5780_v4  ;;  %v3299_v7 = vmul.f32 %v3267_v27, %v5997_v18  ;;  %v2847_v31 = vmul.f32 %v5786_v54, %v2811_v3  ;;  %v3407_v18 = vld [vmem:[%s4183_s24 + $0x40] sm:$0xff]  ;;  %v3408_v38 = vld [vmem:[%s4183_s24 + $0x48] sm:$0xff] }
 0x1ba   : > { %v3142_v44 = vmul.f32 %v3110_v62, %v6026_v17  ;;  %v3079_v32 = vmul.f32 0.044715, %v3015_v43  ;;  %v3438_v16 = vadd.f32 %v3406_v21, %v3374_v9  ;;  %v2978_v36 = vadd.f32 %v2946_v58, %v2878_v57  ;;  %v6591_v27 = vld [vmem:[#allocation59_spill] sm:$0xff]  ;;  %v2812_v58 = vld [vmem:[#allocation2 + $0x171] sm:$0xff] }
 0x1bb   : > { %v3739_v5 = vpop.eup %3738  ;;  %3740 = vtanh.f32 %v3205_v20  ;;  %v2779_v24 = vadd.f32 %v2747_v50, %v2679_v40  ;;  %v3337_v47 = vmul.f32 %v5911_v60, %v3299_v7  ;;  %v2947_v37 = vmul.f32 %v5795_v13, %v2911_v30 }
 0x1bc   : > { %v3268_v63 = vadd.f32 1.0, %v3739_v5  ;;  %v3174_v55 = vadd.f32 %v3142_v44, %v6026_v17  ;;  %v3111_v14 = vmul.f32 %v3079_v32, %v3015_v43  ;;  %3470 = vst.msk [vmem:[%s5941_s13 + $0x38] sm:$0xff] %vm315_vm0, %v3438_v16  ;;  %v6056_v56 = vadd.f32 %v5826_v1, %v2978_v36  ;;  %v2912_v5 = vld [vmem:[#allocation2 + $0x172] sm:$0xff]  ;;  %v6592_v16 = vld [vmem:[#allocation60_spill] sm:$0xff] }
 0x1bd   : > { %v2879_v23 = vadd.f32 %v2847_v31, %v2779_v24  ;;  %v2580_v15 = vadd.f32 %v6590_v12, %v6589_v48  ;;  %v3375_v28 = vadd.f32 %v5920_v22, %v3337_v47  ;;  %v3045_v40 = vmul.f32 0.5, %v6007_v42  ;;  %v3843_v42 = vld [vmem:[#allocation2 + $0x170] sm:$0xff]  ;;  %v6593_v36 = vld [vmem:[#allocation62_spill] sm:$0xff] }
 0x1be   : > { %v3300_v19 = vmul.f32 %v3268_v63, %v6013_v6  ;;  %v3206_v45 = vmul.f32 0.7978846, %v3174_v55  ;;  %v3143_v35 = vmul.f32 %v3111_v14, %v3015_v43  ;;  %v3080_v3 = vmul.f32 0.044715, %v6056_v56  ;;  %v2813_v14 = vld [vmem:[#allocation2 + $0x189] sm:$0xff] }
 0x1bf   : > { %v2979_v21 = vadd.f32 %v2947_v37, %v2879_v23  ;;  %v2680_v62 = vadd.f32 %v6591_v27, %v2580_v15  ;;  %v3439_v57 = vadd.f32 %v3407_v18, %v3375_v28  ;;  %v3046_v50 = vmul.f32 0.5, %v6026_v17  ;;  %v6594_v23 = vld [vmem:[#allocation63_spill] sm:$0xff]  ;;  %v2913_v12 = vld [vmem:[#allocation2 + $0x18a] sm:$0xff] }
 0x1c0   : > { %v3338_v9 = vmul.f32 %v5911_v60, %v3300_v19  ;;  %3742 = vtanh.f32 %v3206_v45  ;;  %v3175_v20 = vadd.f32 %v3143_v35, %v3015_v43  ;;  %v3112_v6 = vmul.f32 %v3080_v3, %v6056_v56 }
 0x1c1   : > { %v6071_v7 = vadd.f32 %v5826_v1, %v2979_v21  ;;  %v2748_v44 = vmul.f32 %v3843_v42, %v5780_v4  ;;  %3471 = vst.msk [vmem:[%s5941_s13 + $0x40] sm:$0xff] %vm315_vm0, %v3439_v57  ;;  %v6077_v31 = vmul.f32 0.5, %v3015_v43  ;;  %v2581_v24 = vadd.f32 %v6593_v36, %v6592_v16  ;;  %v3844_v43 = vld [vmem:[#allocation2 + $0x188] sm:$0xff]  ;;  %v3845_v16 = vld [vmem:[#allocation2 + $0x190] sm:$0xff] }
 0x1c2   : > { %v3376_v32 = vadd.f32 %v5920_v22, %v3338_v9  ;;  %v3207_v30 = vmul.f32 0.7978846, %v3175_v20  ;;  %v3144_v17 = vmul.f32 %v3112_v6, %v6056_v56  ;;  %v2848_v55 = vmul.f32 %v5786_v54, %v2812_v58  ;;  %v6596_v57 = vld [vmem:[#allocation64_spill] sm:$0xff]  ;;  %v2814_v20 = vld [vmem:[#allocation2 + $0x191] sm:$0xff] }
 0x1c3   : > { %v3081_v47 = vmul.f32 0.044715, %v6071_v7  ;;  %v2780_v63 = vadd.f32 %v2748_v44, %v2680_v62  ;;  %v2681_v37 = vadd.f32 %v6594_v23, %v2581_v24  ;;  %v2749_v48 = vmul.f32 %v3844_v43, %v5780_v4  ;;  %v6595_v62 = vld [vmem:[#allocation61_spill] sm:$0xff] }
 0x1c4   : > { %v3440_v18 = vadd.f32 %v3408_v38, %v3376_v32  ;;  %3744 = vtanh.f32 %v3207_v30  ;;  %v3176_v28 = vadd.f32 %v3144_v17, %v6056_v56  ;;  %v2948_v35 = vmul.f32 %v5795_v13, %v2912_v5  ;;  %v6597_v30 = vld [vmem:[#allocation66_spill] sm:$0xff] }
 0x1c5   : > { %v3741_v15 = vpop.eup %3740  ;;  %v3113_v19 = vmul.f32 %v3081_v47, %v6071_v7  ;;  %v2880_v45 = vadd.f32 %v2848_v55, %v2780_v63  ;;  %v2781_v21 = vadd.f32 %v2749_v48, %v2681_v37  ;;  %v2849_v27 = vmul.f32 %v5786_v54, %v2813_v14  ;;  %v2914_v24 = vld [vmem:[#allocation2 + $0x192] sm:$0xff]  ;;  %v6599_v37 = vld [vmem:[#allocation68_spill] sm:$0xff] }
 0x1c6   : > { %3472 = vst.msk [vmem:[%s5941_s13 + $0x48] sm:$0xff] %vm315_vm0, %v3440_v18  ;;  %v3269_v3 = vadd.f32 1.0, %v3741_v15  ;;  %v2582_v9 = vadd.f32 %v6596_v57, %v6595_v62  ;;  %v3208_v58 = vmul.f32 0.7978846, %v3176_v28  ;;  %v2949_v42 = vmul.f32 %v5795_v13, %v2913_v12  ;;  %v3409_v48 = vld [vmem:[%s4183_s24 + $0x50] sm:$0xff] }
 0x1c7   : > { %v3145_v38 = vmul.f32 %v3113_v19, %v6071_v7  ;;  %v2980_v6 = vadd.f32 %v2948_v35, %v2880_v45  ;;  %v2881_v32 = vadd.f32 %v2849_v27, %v2781_v21  ;;  %v2750_v36 = vmul.f32 %v3845_v16, %v5780_v4  ;;  %v6600_v21 = vld [vmem:[#allocation69_spill] sm:$0xff] }
 0x1c8   : > { %v3301_v44 = vmul.f32 %v3269_v3, %v3045_v40  ;;  %v2682_v5 = vadd.f32 %v6597_v30, %v2582_v9  ;;  %3746 = vtanh.f32 %v3208_v58  ;;  %v2850_v63 = vmul.f32 %v5786_v54, %v2814_v20  ;;  %v6598_v40 = vld [vmem:[#allocation65_spill] sm:$0xff]  ;;  %v3846_v9 = vld [vmem:[#allocation2 + $0x1a8] sm:$0xff] }
 0x1c9   : > { %v3177_v17 = vadd.f32 %v3145_v38, %v6071_v7  ;;  %v3018_v47 = vadd.f32 %v5826_v1, %v2980_v6  ;;  %v2981_v18 = vadd.f32 %v2949_v42, %v2881_v32  ;;  %v2583_v43 = vadd.f32 %v6599_v37, %v6598_v40  ;;  %v2815_v58 = vld [vmem:[#allocation2 + $0x1a9] sm:$0xff]  ;;  %v6601_v40 = vld [vmem:[#allocation67_spill] sm:$0xff]  ;;  %v6602_v37 = vld [vmem:[#allocation70_spill] sm:$0xff] }
 0x1ca   : > { %v3743_v55 = vpop.eup %3742  ;;  %v3339_v14 = vmul.f32 %v5911_v60, %v3301_v44  ;;  %v2782_v23 = vadd.f32 %v2750_v36, %v2682_v5  ;;  %v2950_v19 = vmul.f32 %v5795_v13, %v2914_v24  ;;  %v2751_v20 = vmul.f32 %v3846_v9, %v5780_v4  ;;  %v2915_v36 = vld [vmem:[#allocation2 + $0x1aa] sm:$0xff]  ;;  %v3410_v24 = vld [vmem:[%s4183_s24 + $0x58] sm:$0xff] }
 0x1cb   : > { %v3270_v12 = vadd.f32 1.0, %v3743_v55  ;;  %v3209_v15 = vmul.f32 0.7978846, %v3177_v17  ;;  %v3082_v28 = vmul.f32 0.044715, %v3018_v47  ;;  %v6108_v35 = vadd.f32 %v5826_v1, %v2981_v18 }
 0x1cc   : > { %v3377_v45 = vadd.f32 %v5920_v22, %v3339_v14  ;;  %v2882_v3 = vadd.f32 %v2850_v63, %v2782_v23  ;;  %v2683_v27 = vadd.f32 %v6600_v21, %v2583_v43  ;;  %v3048_v42 = vmul.f32 0.5, %v6056_v56  ;;  %v6603_v21 = vld [vmem:[#allocation71_spill] sm:$0xff] }
 0x1cd   : > { %v3302_v62 = vmul.f32 %v3270_v12, %v3046_v50  ;;  %3748 = vtanh.f32 %v3209_v15  ;;  %v3114_v57 = vmul.f32 %v3082_v28, %v3018_v47  ;;  %v3083_v44 = vmul.f32 0.044715, %v6108_v35 }
 0x1ce   : > { %v3745_v38 = vpop.eup %3744  ;;  %v3441_v6 = vadd.f32 %v3409_v48, %v3377_v45  ;;  %v2982_v32 = vadd.f32 %v2950_v19, %v2882_v3  ;;  %v2783_v50 = vadd.f32 %v2751_v20, %v2683_v27  ;;  %v3049_v17 = vmul.f32 0.5, %v6071_v7 }
 0x1cf   : > { %v3340_v30 = vmul.f32 %v5911_v60, %v3302_v62  ;;  %v3271_v5 = vadd.f32 1.0, %v3745_v38  ;;  %v3146_v16 = vmul.f32 %v3114_v57, %v3018_v47  ;;  %v3115_v63 = vmul.f32 %v3083_v44, %v6108_v35  ;;  %v3847_v44 = vld [vmem:[#allocation2 + $0x1b0] sm:$0xff] }
 0x1d0   : > { %3473 = vst.msk [vmem:[%s5941_s13 + $0x50] sm:$0xff] %vm315_vm0, %v3441_v6  ;;  %v6121_v55 = vadd.f32 %v5826_v1, %v2982_v32  ;;  %v2851_v56 = vmul.f32 %v5786_v54, %v2815_v58  ;;  %v2584_v43 = vadd.f32 %v6602_v37, %v6601_v40  ;;  %v2951_v15 = vmul.f32 %v5795_v13, %v2915_v36  ;;  %v2816_v58 = vld [vmem:[#allocation2 + $0x1b1] sm:$0xff] }
 0x1d1   : > { %v3378_v14 = vadd.f32 %v5920_v22, %v3340_v30  ;;  %v3303_v18 = vmul.f32 %v3271_v5, %v6077_v31  ;;  %v3178_v23 = vadd.f32 %v3146_v16, %v3018_v47  ;;  %v3147_v48 = vmul.f32 %v3115_v63, %v6108_v35  ;;  %v3411_v31 = vld [vmem:[%s4183_s24 + $0x60] sm:$0xff]  ;;  %v2916_v36 = vld [vmem:[#allocation2 + $0x1b2] sm:$0xff] }
 0x1d2   : > { %v3084_v7 = vmul.f32 0.044715, %v6121_v55  ;;  %v2883_v12 = vadd.f32 %v2851_v56, %v2783_v50  ;;  %v3747_v28 = vpop.eup %3746  ;;  %v2684_v27 = vadd.f32 %v6603_v21, %v2584_v43  ;;  %v6139_v6 = vmul.f32 0.5, %v3018_v47  ;;  %v2817_v43 = vld [vmem:[#allocation2 + $0x1c9] sm:$0xff] }
 0x1d3   : > { %v3442_v19 = vadd.f32 %v3410_v24, %v3378_v14  ;;  %v3341_v45 = vmul.f32 %v5911_v60, %v3303_v18  ;;  %v3210_v3 = vmul.f32 0.7978846, %v3178_v23  ;;  %v3272_v62 = vadd.f32 1.0, %v3747_v28  ;;  %v6604_v14 = vld [vmem:[#allocation72_spill] sm:$0xff]  ;;  %v6605_v18 = vld [vmem:[#allocation74_spill] sm:$0xff]  ;;  %v6606_v28 = vld [vmem:[#allocation75_spill] sm:$0xff] }
 0x1d4   : > { %v3179_v57 = vadd.f32 %v3147_v48, %v6108_v35  ;;  %v3116_v9 = vmul.f32 %v3084_v7, %v6121_v55  ;;  %v2983_v20 = vadd.f32 %v2951_v15, %v2883_v12  ;;  %v2752_v32 = vmul.f32 %v3847_v44, %v5780_v4  ;;  %v3412_v48 = vld [vmem:[%s4183_s24 + $0x68] sm:$0xff] }
 0x1d5   : > { %3474 = vst.msk [vmem:[%s5941_s13 + $0x58] sm:$0xff] %vm315_vm0, %v3442_v19  ;;  %v3379_v38 = vadd.f32 %v5920_v22, %v3341_v45  ;;  %3750 = vtanh.f32 %v3210_v3  ;;  %v3304_v30 = vmul.f32 %v3272_v62, %v3048_v42  ;;  %v2852_v47 = vmul.f32 %v5786_v54, %v2816_v58  ;;  %v2917_v58 = vld [vmem:[#allocation2 + $0x1ca] sm:$0xff] }
 0x1d6   : > { %v3211_v5 = vmul.f32 0.7978846, %v3179_v57  ;;  %v3148_v16 = vmul.f32 %v3116_v9, %v6121_v55  ;;  %v6144_v50 = vadd.f32 %v5826_v1, %v2983_v20  ;;  %v2784_v56 = vadd.f32 %v2752_v32, %v2684_v27  ;;  %v3848_v27 = vld [vmem:[#allocation2 + $0x1c8] sm:$0xff] }
 0x1d7   : > { %v3749_v24 = vpop.eup %3748  ;;  %v3443_v63 = vadd.f32 %v3411_v31, %v3379_v38  ;;  %v2585_v23 = vadd.f32 %v6605_v18, %v6604_v14  ;;  %v3342_v40 = vmul.f32 %v5911_v60, %v3304_v30  ;;  %v2952_v15 = vmul.f32 %v5795_v13, %v2916_v36  ;;  %v2818_v30 = vld [vmem:[#allocation2 + $0x1d1] sm:$0xff] }
 0x1d8   : > { %v3273_v37 = vadd.f32 1.0, %v3749_v24  ;;  %3752 = vtanh.f32 %v3211_v5  ;;  %v3180_v42 = vadd.f32 %v3148_v16, %v6121_v55  ;;  %v3085_v7 = vmul.f32 0.044715, %v6144_v50  ;;  %v6607_v36 = vld [vmem:[#allocation73_spill] sm:$0xff]  ;;  %v6608_v24 = vld [vmem:[#allocation76_spill] sm:$0xff] }
 0x1d9   : > { %3475 = vst.msk [vmem:[%s5941_s13 + $0x60] sm:$0xff] %vm315_vm0, %v3443_v63  ;;  %v2884_v12 = vadd.f32 %v2852_v47, %v2784_v56  ;;  %v2685_v19 = vadd.f32 %v6606_v28, %v2585_v23  ;;  %v3380_v45 = vadd.f32 %v5920_v22, %v3342_v40  ;;  %v2753_v31 = vmul.f32 %v3848_v27, %v5780_v4  ;;  %v3849_v18 = vld [vmem:[#allocation2 + $0x1d0] sm:$0xff] }
 0x1da   : > { %v3305_v3 = vmul.f32 %v3273_v37, %v3049_v17  ;;  %v3212_v21 = vmul.f32 0.7978846, %v3180_v42  ;;  %v3051_v62 = vmul.f32 0.5, %v6108_v35  ;;  %v3117_v57 = vmul.f32 %v3085_v7, %v6144_v50  ;;  %v3413_v17 = vld [vmem:[%s4183_s24 + $0x70] sm:$0xff] }
 0x1db   : > { %v2984_v9 = vadd.f32 %v2952_v15, %v2884_v12  ;;  %v2853_v20 = vmul.f32 %v5786_v54, %v2817_v43  ;;  %v3444_v38 = vadd.f32 %v3412_v48, %v3380_v45  ;;  %v2785_v32 = vadd.f32 %v2753_v31, %v2685_v19  ;;  %v6609_v43 = vld [vmem:[#allocation78_spill] sm:$0xff]  ;;  %v6610_v19 = vld [vmem:[#allocation77_spill] sm:$0xff] }
 0x1dc   : > { %v3343_v44 = vmul.f32 %v5911_v60, %v3305_v3  ;;  %3754 = vtanh.f32 %v3212_v21  ;;  %v6165_v5 = vmul.f32 0.5, %v6121_v55  ;;  %v3149_v16 = vmul.f32 %v3117_v57, %v6144_v50  ;;  %v2918_v55 = vld [vmem:[#allocation2 + $0x1d2] sm:$0xff]  ;;  %v6188_v21 = vld [vmem:[%s6460_s1 + $0x24] ss:$0 sm:$0xff]  ;;  %v2819_v31 = vld [vmem:[#allocation2 + $0x1e9] sm:$0xff] }
 0x1dd   : > { %v6169_v35 = vadd.f32 %v5826_v1, %v2984_v9  ;;  %v2586_v63 = vadd.f32 %v6608_v24, %v6607_v36  ;;  %3476 = vst.msk [vmem:[%s5941_s13 + $0x68] sm:$0xff] %vm315_vm0, %v3444_v38  ;;  %v2885_v47 = vadd.f32 %v2853_v20, %v2785_v32  ;;  %v2953_v14 = vmul.f32 %v5795_v13, %v2917_v58  ;;  %v6611_v9 = vld [vmem:[#allocation80_spill] sm:$0xff]  ;;  %v6199_v38 = vld [vmem:[%s6460_s1 + $0x22] ss:$0 sm:$0xff] }
 0x1de   : > { %v3381_v56 = vadd.f32 %v5920_v22, %v3343_v44  ;;  %v2754_v23 = vmul.f32 %v3849_v18, %v5780_v4  ;;  %v3181_v37 = vadd.f32 %v3149_v16, %v6144_v50  ;;  %v2854_v7 = vmul.f32 %v5786_v54, %v2818_v30  ;;  %v3851_v58 = vld [vmem:[#allocation2 + $0x1e8] sm:$0xff] }
 0x1df   : > { %v3751_v40 = vpop.eup %3750  ;;  %v3086_v42 = vmul.f32 0.044715, %v6169_v35  ;;  %v2686_v48 = vadd.f32 %v6609_v43, %v2586_v63  ;;  %v2985_v28 = vadd.f32 %v2953_v14, %v2885_v47  ;;  %v2587_v13 = vadd.f32 %v5649_v59, %v6610_v19  ;;  %v2919_v32 = vld [vmem:[#allocation2 + $0x1ea] sm:$0xff]  ;;  %v6207_v63 = vld [vmem:[%s6460_s1 + $0x23] ss:$0 sm:$0xff]  ;;  %v3414_v47 = vld [vmem:[%s4183_s24 + $0x78] sm:$0xff] }
 0x1e0   : > { %v3445_v12 = vadd.f32 %v3413_v17, %v3381_v56  ;;  %v3274_v15 = vadd.f32 1.0, %v3751_v40  ;;  %v3213_v45 = vmul.f32 0.7978846, %v3181_v37  ;;  %v2954_v27 = vmul.f32 %v6188_v21, %v2918_v55 }
 0x1e1   : > { %v3118_v4 = vmul.f32 %v3086_v42, %v6169_v35  ;;  %v2786_v3 = vadd.f32 %v2754_v23, %v2686_v48  ;;  %v3023_v59 = vadd.f32 %v5826_v1, %v2985_v28  ;;  %v2687_v20 = vadd.f32 %v6611_v9, %v2587_v13  ;;  %v6612_v48 = vld [vmem:[#allocation79_spill] sm:$0xff] }
 0x1e2   : > { %v3753_v57 = vpop.eup %3752  ;;  %3477 = vst.msk [vmem:[%s5941_s13 + $0x70] sm:$0xff] %vm315_vm0, %v3445_v12  ;;  %v3306_v54 = vmul.f32 %v3274_v15, %v6139_v6  ;;  %v2755_v44 = vmul.f32 %v6199_v38, %v3851_v58  ;;  %3756 = vtanh.f32 %v3213_v45  ;;  %v2855_v56 = vmul.f32 %v6207_v63, %v2819_v31  ;;  %v3415_v13 = vld [vmem:[%s4183_s24 + $0x80] sm:$0xff] }
 0x1e3   : > { %v3275_v30 = vadd.f32 1.0, %v3753_v57  ;;  %v3150_v17 = vmul.f32 %v3118_v4, %v6169_v35  ;;  %v2886_v16 = vadd.f32 %v2854_v7, %v2786_v3  ;;  %v3087_v36 = vmul.f32 0.044715, %v3023_v59  ;;  %v2820_v57 = vld [vmem:[#allocation2 + $0x1f1] sm:$0xff] }
 0x1e4   : > { %v3344_v6 = vmul.f32 %v5911_v60, %v3306_v54  ;;  %v2787_v24 = vadd.f32 %v2755_v44, %v2687_v20  ;;  %v2955_v55 = vmul.f32 %v6188_v21, %v2919_v32  ;;  %v2588_v7 = vadd.f32 %v5692_v29, %v6612_v48  ;;  %v2920_v20 = vld [vmem:[#allocation2 + $0x1f2] sm:$0xff]  ;;  %v3856_v48 = vld [vmem:[#allocation2 + $0x208] sm:$0xff] }
 0x1e5   : > { %v3307_v14 = vmul.f32 %v3275_v30, %v3051_v62  ;;  %v3182_v18 = vadd.f32 %v3150_v17, %v6169_v35  ;;  %v2986_v23 = vadd.f32 %v2954_v27, %v2886_v16  ;;  %v3119_v42 = vmul.f32 %v3087_v36, %v3023_v59  ;;  %v3855_v32 = vld [vmem:[#allocation2 + $0x1f0] sm:$0xff]  ;;  %v3416_v30 = vld [vmem:[%s4183_s24 + $0x88] sm:$0xff] }
 0x1e6   : > { %v3755_v40 = vpop.eup %3754  ;;  %v3382_v37 = vadd.f32 %v5920_v22, %v3344_v6  ;;  %v2887_v43 = vadd.f32 %v2855_v56, %v2787_v24  ;;  %v3053_v45 = vmul.f32 0.5, %v6144_v50  ;;  %v2688_v29 = vadd.f32 %v5696_v61, %v2588_v7  ;;  %v6231_v50 = vld [vmem:[%s6461_s2] ss:$0 sm:$0xff] }
 0x1e7   : > { %v3345_v12 = vmul.f32 %v5911_v60, %v3307_v14  ;;  %v3276_v15 = vadd.f32 1.0, %v3755_v40  ;;  %v3214_v28 = vmul.f32 0.7978846, %v3182_v18  ;;  %v3024_v62 = vadd.f32 %v5826_v1, %v2986_v23  ;;  %v2821_v40 = vld [vmem:[#allocation2 + $0x209] sm:$0xff] }
 0x1e8   : > { %v3446_v19 = vadd.f32 %v3414_v47, %v3382_v37  ;;  %v3151_v4 = vmul.f32 %v3119_v42, %v3023_v59  ;;  %v2987_v3 = vadd.f32 %v2955_v55, %v2887_v43  ;;  %v6226_v54 = vmul.f32 0.5, %v6169_v35 }
 0x1e9   : > { %v3383_v27 = vadd.f32 %v5920_v22, %v3345_v12  ;;  %v3308_v31 = vmul.f32 %v3276_v15, %v6165_v5  ;;  %3758 = vtanh.f32 %v3214_v28  ;;  %v3088_v9 = vmul.f32 0.044715, %v3024_v62  ;;  %v2921_v12 = vld [vmem:[#allocation2 + $0x20a] sm:$0xff] }
 0x1ea   : > { %3478 = vst.msk [vmem:[%s5941_s13 + $0x78] sm:$0xff] %vm315_vm0, %v3446_v19  ;;  %v3183_v1 = vadd.f32 %v3151_v4, %v3023_v59  ;;  %v6234_v5 = vadd.f32 %v6231_v50, %v2987_v3  ;;  %v6237_v44 = vmul.f32 0.5, %v3023_v59  ;;  %v2756_v35 = vmul.f32 %v3855_v32, %v6199_v38 }
 0x1eb   : > { %v3447_v58 = vadd.f32 %v3415_v13, %v3383_v27  ;;  %v3346_v61 = vmul.f32 %v5911_v60, %v3308_v31  ;;  %v3120_v16 = vmul.f32 %v3088_v9, %v3024_v62  ;;  %v2856_v36 = vmul.f32 %v6207_v63, %v2820_v57  ;;  %v3417_v57 = vld [vmem:[%s4183_s24 + $0x90] sm:$0xff] }
 0x1ec   : > { %v3215_v17 = vmul.f32 0.7978846, %v3183_v1  ;;  %v3089_v6 = vmul.f32 0.044715, %v6234_v5  ;;  %v3757_v24 = vpop.eup %3756  ;;  %v2788_v47 = vadd.f32 %v2756_v35, %v2688_v29  ;;  %v2956_v14 = vmul.f32 %v6188_v21, %v2920_v20  ;;  %v2822_v29 = vld [vmem:[#allocation2 + $0x211] sm:$0xff] }
 0x1ed   : > { %3479 = vst.msk [vmem:[%s5941_s13 + $0x80] sm:$0xff] %vm315_vm0, %v3447_v58  ;;  %v3384_v56 = vadd.f32 %v5920_v22, %v3346_v61  ;;  %v2589_v59 = vadd.f32 %v5713_v33, %v5700_v52  ;;  %v3277_v18 = vadd.f32 1.0, %v3757_v24  ;;  %v3152_v23 = vmul.f32 %v3120_v16, %v3024_v62  ;;  %v3857_v58 = vld [vmem:[#allocation2 + $0x210] sm:$0xff] }
 0x1ee   : > { %3760 = vtanh.f32 %v3215_v17  ;;  %v3121_v55 = vmul.f32 %v3089_v6, %v6234_v5  ;;  %v2888_v42 = vadd.f32 %v2856_v36, %v2788_v47  ;;  %v2757_v7 = vmul.f32 %v3856_v48, %v6199_v38  ;;  %v2922_v35 = vld [vmem:[#allocation2 + $0x212] sm:$0xff]  ;;  %v2823_v36 = vld [vmem:[#allocation2 + $0x229] sm:$0xff] }
 0x1ef   : > { %v3448_v37 = vadd.f32 %v3416_v30, %v3384_v56  ;;  %v2689_v43 = vadd.f32 %v5716_v34, %v2589_v59  ;;  %v3309_v15 = vmul.f32 %v3277_v18, %v3053_v45  ;;  %v6252_v28 = vmul.f32 0.5, %v3024_v62  ;;  %v2923_v47 = vld [vmem:[#allocation2 + $0x22a] sm:$0xff] }
 0x1f0   : > { %v3184_v52 = vadd.f32 %v3152_v23, %v3024_v62  ;;  %v3153_v33 = vmul.f32 %v3121_v55, %v6234_v5  ;;  %v2988_v19 = vadd.f32 %v2956_v14, %v2888_v42  ;;  %v2857_v4 = vmul.f32 %v6207_v63, %v2821_v40 }
 0x1f1   : > { %3480 = vst.msk [vmem:[%s5941_s13 + $0x88] sm:$0xff] %vm315_vm0, %v3448_v37  ;;  %v2789_v13 = vadd.f32 %v2757_v7, %v2689_v43  ;;  %v2590_v34 = vadd.f32 %v5745_v41, %v5719_v51  ;;  %v3347_v3 = vmul.f32 %v5911_v60, %v3309_v15  ;;  %v2957_v45 = vmul.f32 %v6188_v21, %v2921_v12  ;;  %v3858_v37 = vld [vmem:[#allocation2 + $0x228] sm:$0xff] }
 0x1f2   : > { %v3216_v27 = vmul.f32 0.7978846, %v3184_v52  ;;  %v3185_v31 = vadd.f32 %v3153_v33, %v6234_v5  ;;  %v6265_v1 = vadd.f32 %v6231_v50, %v2988_v19  ;;  %v2758_v61 = vmul.f32 %v3857_v58, %v6199_v38  ;;  %v3419_v58 = vld [vmem:[%s4183_s24 + $0xa0] sm:$0xff] }
 0x1f3   : > { %v3759_v62 = vpop.eup %3758  ;;  %v2889_v9 = vadd.f32 %v2857_v4, %v2789_v13  ;;  %v2690_v20 = vadd.f32 %v5748_v8, %v2590_v34  ;;  %v3385_v51 = vadd.f32 %v5920_v22, %v3347_v3  ;;  %v2858_v6 = vmul.f32 %v6207_v63, %v2822_v29  ;;  %v3859_v34 = vld [vmem:[#allocation2 + $0x230] sm:$0xff] }
 0x1f4   : > { %v3278_v41 = vadd.f32 1.0, %v3759_v62  ;;  %3762 = vtanh.f32 %v3216_v27  ;;  %v3217_v32 = vmul.f32 0.7978846, %v3185_v31  ;;  %v3090_v30 = vmul.f32 0.044715, %v6265_v1  ;;  %v2824_v27 = vld [vmem:[#allocation2 + $0x231] sm:$0xff] }
 0x1f5   : > { %v2989_v17 = vadd.f32 %v2957_v45, %v2889_v9  ;;  %v2790_v16 = vadd.f32 %v2758_v61, %v2690_v20  ;;  %v3449_v24 = vadd.f32 %v3417_v57, %v3385_v51  ;;  %v2591_v56 = vadd.f32 %v5758_v53, %v5751_v46  ;;  %v3418_v53 = vld [vmem:[%s4183_s24 + $0x98] sm:$0xff] }
 0x1f6   : > { %v3310_v8 = vmul.f32 %v3278_v41, %v6226_v54  ;;  %3764 = vtanh.f32 %v3217_v32  ;;  %v3122_v14 = vmul.f32 %v3090_v30, %v6265_v1  ;;  %v2958_v23 = vmul.f32 %v6188_v21, %v2922_v35  ;;  %v2924_v9 = vld [vmem:[#allocation2 + $0x232] sm:$0xff] }
 0x1f7   : > { %v6277_v59 = vadd.f32 %v6231_v50, %v2989_v17  ;;  %v2890_v18 = vadd.f32 %v2858_v6, %v2790_v16  ;;  %3481 = vst.msk [vmem:[%s5941_s13 + $0x90] sm:$0xff] %vm315_vm0, %v3449_v24  ;;  %v2691_v54 = vadd.f32 %v5762_v25, %v2591_v56  ;;  %v2759_v42 = vmul.f32 %v3858_v37, %v6199_v38 }
 0x1f8   : > { %v3761_v55 = vpop.eup %3760  ;;  %v3348_v40 = vmul.f32 %v5911_v60, %v3310_v8  ;;  %v2859_v46 = vmul.f32 %v6207_v63, %v2823_v36  ;;  %v3154_v48 = vmul.f32 %v3122_v14, %v6265_v1  ;;  %v2959_v12 = vmul.f32 %v6188_v21, %v2923_v47 }
 0x1f9   : > { %v3279_v43 = vadd.f32 1.0, %v3761_v55  ;;  %v3091_v7 = vmul.f32 0.044715, %v6277_v59  ;;  %v2990_v52 = vadd.f32 %v2958_v23, %v2890_v18  ;;  %v2791_v33 = vadd.f32 %v2759_v42, %v2691_v54  ;;  %v6320_v23 = vld [vmem:[%s6462_s3] ss:$0 sm:$0xff] }
 0x1fa   : > { %v3386_v15 = vadd.f32 %v5920_v22, %v3348_v40  ;;  %v2592_v25 = vadd.f32 %v5790_v10, %v5766_v39  ;;  %v3186_v13 = vadd.f32 %v3154_v48, %v6265_v1  ;;  %v2760_v3 = vmul.f32 %v3859_v34, %v6199_v38  ;;  %v6336_v48 = vld [vmem:[%s6463_s4] ss:$0 sm:$0xff]  ;;  %v2925_v34 = vld [vmem:[#allocation2 + $0x24a] sm:$0xff] }
 0x1fb   : > { %v3311_v19 = vmul.f32 %v3279_v43, %v6237_v44  ;;  %v3123_v4 = vmul.f32 %v3091_v7, %v6277_v59  ;;  %v3028_v45 = vadd.f32 %v6231_v50, %v2990_v52  ;;  %v2891_v29 = vadd.f32 %v2859_v46, %v2791_v33  ;;  %v2825_v43 = vld [vmem:[#allocation2 + $0x249] sm:$0xff] }
 0x1fc   : > { %v3450_v31 = vadd.f32 %v3418_v53, %v3386_v15  ;;  %v2692_v62 = vadd.f32 %v5800_v11, %v2592_v25  ;;  %v3057_v10 = vmul.f32 0.5, %v6234_v5  ;;  %v3218_v44 = vmul.f32 0.7978846, %v3186_v13  ;;  %v6614_v15 = vld [vmem:[#allocation16_spill] sm:$0xff] }
 0x1fd   : > { %v3349_v39 = vmul.f32 %v5911_v60, %v3311_v19  ;;  %v3155_v57 = vmul.f32 %v3123_v4, %v6277_v59  ;;  %v3092_v61 = vmul.f32 0.044715, %v3028_v45  ;;  %v2991_v51 = vadd.f32 %v2959_v12, %v2891_v29  ;;  %v3421_v12 = vld [vmem:[%s4183_s24 + $0xb0] sm:$0xff]  ;;  %v3862_v52 = vld [vmem:[#allocation2 + $0x248] sm:$0xff] }
 0x1fe   : > { %v3763_v20 = vpop.eup %3762  ;;  %3482 = vst.msk [vmem:[%s5941_s13 + $0x98] sm:$0xff] %vm315_vm0, %v3450_v31  ;;  %v2792_v41 = vadd.f32 %v2760_v3, %v2692_v62  ;;  %v2860_v32 = vmul.f32 %v6207_v63, %v2824_v27  ;;  %3766 = vtanh.f32 %v3218_v44  ;;  %v2960_v6 = vmul.f32 %v6188_v21, %v2924_v9  ;;  %v2826_v44 = vld [vmem:[#allocation2 + $0x251] sm:$0xff] }
 0x1ff   : > { %v3387_v35 = vadd.f32 %v5920_v22, %v3349_v39  ;;  %v3280_v11 = vadd.f32 1.0, %v3763_v20  ;;  %v3187_v60 = vadd.f32 %v3155_v57, %v6277_v59  ;;  %v3124_v30 = vmul.f32 %v3092_v61, %v3028_v45  ;;  %v2926_v57 = vld [vmem:[#allocation2 + $0x252] sm:$0xff] }
 0x200   : > { %v3765_v5 = vpop.eup %3764  ;;  %v6309_v17 = vadd.f32 %v6231_v50, %v2991_v51  ;;  %v2892_v16 = vadd.f32 %v2860_v32, %v2792_v41  ;;  %v3058_v22 = vmul.f32 0.5, %v6265_v1  ;;  %v3420_v1 = vld [vmem:[%s4183_s24 + $0xa8] sm:$0xff]  ;;  %v6327_v37 = vmul.f32 0.5, %v6277_v59  ;;  %v3863_v51 = vld [vmem:[#allocation2 + $0x250] sm:$0xff] }
 0x201   : > { %v3451_v36 = vadd.f32 %v3419_v58, %v3387_v35  ;;  %v3312_v24 = vmul.f32 %v3280_v11, %v6252_v28  ;;  %v3281_v8 = vadd.f32 1.0, %v3765_v5  ;;  %v3219_v56 = vmul.f32 0.7978846, %v3187_v60  ;;  %v6613_v28 = vld [vmem:[#allocation12_spill] sm:$0xff]  ;;  %v6616_v5 = vld [vmem:[#allocation17_spill] sm:$0xff] }
 0x202   : > { %v3156_v47 = vmul.f32 %v3124_v30, %v3028_v45  ;;  %v3093_v14 = vmul.f32 0.044715, %v6309_v17  ;;  %v2992_v18 = vadd.f32 %v2960_v6, %v2892_v16  ;;  %v2593_v54 = vadd.f32 %v6613_v28, %v5808_v0  ;;  %v2727_v32 = vld [vmem:[#allocation2 + $0x268] sm:$0xff]  ;;  %v6618_v28 = vld [vmem:[#allocation18_spill] sm:$0xff] }
 0x203   : > { %3483 = vst.msk [vmem:[%s5941_s13 + $0xa0] sm:$0xff] %vm315_vm0, %v3451_v36  ;;  %v3350_v55 = vmul.f32 %v6320_v23, %v3312_v24  ;;  %v3313_v40 = vmul.f32 %v3281_v8, %v3057_v10  ;;  %3768 = vtanh.f32 %v3219_v56  ;;  %v2761_v33 = vmul.f32 %v3862_v52, %v6199_v38  ;;  %v2827_v30 = vld [vmem:[#allocation2 + $0x269] sm:$0xff]  ;;  %v6617_v24 = vld [vmem:[#allocation14_spill] sm:$0xff]  ;;  %v6619_v52 = vld [vmem:[#allocation15_spill] sm:$0xff] }
 0x204   : > { %v3188_v42 = vadd.f32 %v3156_v47, %v3028_v45  ;;  %v3125_v46 = vmul.f32 %v3093_v14, %v6309_v17  ;;  %v6331_v53 = vadd.f32 %v6231_v50, %v2992_v18  ;;  %v2693_v59 = vadd.f32 %v6614_v15, %v2593_v54  ;;  %v2927_v18 = vld [vmem:[#allocation2 + $0x26a] sm:$0xff] }
 0x205   : > { %v3388_v7 = vadd.f32 %v6336_v48, %v3350_v55  ;;  %v3351_v0 = vmul.f32 %v6320_v23, %v3313_v40  ;;  %v6343_v25 = vmul.f32 0.5, %v3028_v45  ;;  %v2861_v29 = vmul.f32 %v6207_v63, %v2825_v43  ;;  %v6615_v45 = vld [vmem:[#allocation13_spill] sm:$0xff] }
 0x206   : > { %v3220_v19 = vmul.f32 0.7978846, %v3188_v42  ;;  %v3157_v13 = vmul.f32 %v3125_v46, %v6309_v17  ;;  %v3094_v4 = vmul.f32 0.044715, %v6331_v53  ;;  %v2793_v31 = vadd.f32 %v2761_v33, %v2693_v59  ;;  %v2728_v46 = vld [vmem:[#allocation2 + $0x270] sm:$0xff] }
 0x207   : > { %v3452_v3 = vadd.f32 %v3420_v1, %v3388_v7  ;;  %v3389_v27 = vadd.f32 %v6336_v48, %v3351_v0  ;;  %v2594_v10 = vadd.f32 %v6615_v45, %v5832_v2  ;;  %v2961_v61 = vmul.f32 %v6188_v21, %v2925_v34  ;;  %v3422_v0 = vld [vmem:[%s4183_s24 + $0xb8] sm:$0xff] }
 0x208   : > { %3770 = vtanh.f32 %v3220_v19  ;;  %v3189_v62 = vadd.f32 %v3157_v13, %v6309_v17  ;;  %v3126_v39 = vmul.f32 %v3094_v4, %v6331_v53  ;;  %v3767_v9 = vpop.eup %3766  ;;  %v2893_v58 = vadd.f32 %v2861_v29, %v2793_v31  ;;  %v2828_v19 = vld [vmem:[#allocation2 + $0x271] sm:$0xff]  ;;  %v6620_v31 = vld [vmem:[#allocation19_spill] sm:$0xff] }
 0x209   : > { %3484 = vst.msk [vmem:[%s5941_s13 + $0xa8] sm:$0xff] %vm315_vm0, %v3452_v3  ;;  %v3453_v20 = vadd.f32 %v3421_v12, %v3389_v27  ;;  %v2762_v41 = vmul.f32 %v3863_v51, %v6199_v38  ;;  %v3282_v35 = vadd.f32 1.0, %v3767_v9  ;;  %v2694_v2 = vadd.f32 %v6616_v5, %v2594_v10 }
 0x20a   : > { %v3221_v11 = vmul.f32 0.7978846, %v3189_v62  ;;  %v3158_v60 = vmul.f32 %v3126_v39, %v6331_v53  ;;  %v2993_v16 = vadd.f32 %v2961_v61, %v2893_v58  ;;  %v2862_v6 = vmul.f32 %v6207_v63, %v2826_v44  ;;  %v2928_v61 = vld [vmem:[#allocation2 + $0x272] sm:$0xff] }
 0x20b   : > { %3485 = vst.msk [vmem:[%s5941_s13 + $0xb0] sm:$0xff] %vm315_vm0, %v3453_v20  ;;  %v2962_v36 = vmul.f32 %v6188_v21, %v2926_v57  ;;  %v2595_v8 = vadd.f32 %v6617_v24, %v5840_v49  ;;  %v3314_v56 = vmul.f32 %v3282_v35, %v3058_v22  ;;  %v2794_v14 = vadd.f32 %v2762_v41, %v2694_v2 }
 0x20c   : > { %3772 = vtanh.f32 %v3221_v11  ;;  %v3190_v47 = vadd.f32 %v3158_v60, %v6331_v53  ;;  %v6367_v40 = vadd.f32 %v6231_v50, %v2993_v16  ;;  %v2763_v1 = vmul.f32 %v6199_v38, %v2727_v32 }
 0x20d   : > { %v3769_v55 = vpop.eup %3768  ;;  %v2695_v54 = vadd.f32 %v6618_v28, %v2595_v8  ;;  %v2863_v42 = vmul.f32 %v6207_v63, %v2827_v30  ;;  %v3352_v49 = vmul.f32 %v6320_v23, %v3314_v56  ;;  %v2894_v7 = vadd.f32 %v2862_v6, %v2794_v14 }
 0x20e   : > { %v3283_v43 = vadd.f32 1.0, %v3769_v55  ;;  %v3222_v22 = vmul.f32 0.7978846, %v3190_v47  ;;  %v3095_v12 = vmul.f32 0.044715, %v6367_v40  ;;  %v2963_v59 = vmul.f32 %v6188_v21, %v2927_v18 }
 0x20f   : > { %v2795_v15 = vadd.f32 %v2763_v1, %v2695_v54  ;;  %v2596_v33 = vadd.f32 %v6619_v52, %v5861_v26  ;;  %v3390_v13 = vadd.f32 %v6336_v48, %v3352_v49  ;;  %v2994_v34 = vadd.f32 %v2962_v36, %v2894_v7 }
 0x210   : > { %v3315_v4 = vmul.f32 %v3283_v43, %v6327_v37  ;;  %3774 = vtanh.f32 %v3222_v22  ;;  %v3127_v3 = vmul.f32 %v3095_v12, %v6367_v40  ;;  %v2764_v62 = vmul.f32 %v6199_v38, %v2728_v46  ;;  %v3423_v37 = vld [vmem:[%s4183_s24 + $0xc0] sm:$0xff]  ;;  %v3425_v46 = vld [vmem:[%s4183_s24 + $0xd0] sm:$0xff] }
 0x211   : > { %v2895_v27 = vadd.f32 %v2863_v42, %v2795_v15  ;;  %v2696_v29 = vadd.f32 %v6620_v31, %v2596_v33  ;;  %v3454_v45 = vadd.f32 %v3422_v0, %v3390_v13  ;;  %v6385_v26 = vadd.f32 %v6231_v50, %v2994_v34 }
 0x212   : > { %v3771_v39 = vpop.eup %3770  ;;  %v3353_v10 = vmul.f32 %v6320_v23, %v3315_v4  ;;  %v2864_v44 = vmul.f32 %v6207_v63, %v2828_v19  ;;  %v3159_v9 = vmul.f32 %v3127_v3, %v6367_v40  ;;  %v2964_v2 = vmul.f32 %v6188_v21, %v2928_v61 }
 0x213   : > { %v3284_v57 = vadd.f32 1.0, %v3771_v39  ;;  %v2995_v20 = vadd.f32 %v2963_v59, %v2895_v27  ;;  %v2796_v58 = vadd.f32 %v2764_v62, %v2696_v29  ;;  %3486 = vst.msk [vmem:[%s5941_s13 + $0xb8] sm:$0xff] %vm315_vm0, %v3454_v45  ;;  %v3096_v51 = vmul.f32 0.044715, %v6385_v26  ;;  %v3426_v59 = vld [vmem:[%s4183_s24 + $0xd8] sm:$0xff]  ;;  %v3427_v45 = vld [vmem:[%s4183_s24 + $0xe0] sm:$0xff] }
 0x214   : > { %v3391_v38 = vadd.f32 %v6336_v48, %v3353_v10  ;;  %v3191_v32 = vadd.f32 %v3159_v9, %v6367_v40  ;;  %v3061_v16 = vmul.f32 0.5, %v6309_v17  ;;  %v3062_v1 = vmul.f32 0.5, %v6331_v53 }
 0x215   : > { %v3316_v41 = vmul.f32 %v3284_v57, %v6343_v25  ;;  %v6397_v63 = vadd.f32 %v6231_v50, %v2995_v20  ;;  %v2896_v35 = vadd.f32 %v2864_v44, %v2796_v58  ;;  %v3128_v5 = vmul.f32 %v3096_v51, %v6385_v26  ;;  %v3424_v25 = vld [vmem:[%s4183_s24 + $0xc8] sm:$0xff] }
 0x216   : > { %v3773_v11 = vpop.eup %3772  ;;  %v3455_v60 = vadd.f32 %v3423_v37, %v3391_v38  ;;  %v3223_v36 = vmul.f32 0.7978846, %v3191_v32  ;;  %v3063_v3 = vmul.f32 0.5, %v6367_v40  ;;  %v3064_v10 = vmul.f32 0.5, %v6385_v26  ;;  %v3428_v38 = vld [vmem:[%s4183_s24 + $0xe8] sm:$0xff] }
 0x217   : > { %v3354_v30 = vmul.f32 %v6320_v23, %v3316_v41  ;;  %v3285_v6 = vadd.f32 1.0, %v3773_v11  ;;  %v3160_v24 = vmul.f32 %v3128_v5, %v6385_v26  ;;  %v3097_v8 = vmul.f32 0.044715, %v6397_v63  ;;  %v3429_v5 = vld [vmem:[%s4183_s24 + $0xf0] sm:$0xff] }
 0x218   : > { %3487 = vst.msk [vmem:[%s5941_s13 + $0xc0] sm:$0xff] %vm315_vm0, %v3455_v60  ;;  %v2996_v56 = vadd.f32 %v2964_v2, %v2896_v35  ;;  %3776 = vtanh.f32 %v3223_v36  ;;  %v3065_v58 = vmul.f32 0.5, %v6397_v63 }
 0x219   : > { %v3392_v47 = vadd.f32 %v6336_v48, %v3354_v30  ;;  %v3317_v14 = vmul.f32 %v3285_v6, %v3061_v16  ;;  %v3192_v18 = vadd.f32 %v3160_v24, %v6385_v26  ;;  %v3129_v17 = vmul.f32 %v3097_v8, %v6397_v63  ;;  %v3430_v6 = vld [vmem:[%s4183_s24 + $0xf8] sm:$0xff] }
 0x21a   : > { %v3775_v21 = vpop.eup %3774  ;;  %v3034_v55 = vadd.f32 %v6231_v50, %v2996_v56 }
 0x21b   : > { %v3456_v28 = vadd.f32 %v3424_v25, %v3392_v47  ;;  %v3355_v54 = vmul.f32 %v6320_v23, %v3317_v14  ;;  %v3286_v42 = vadd.f32 1.0, %v3775_v21  ;;  %v3224_v49 = vmul.f32 0.7978846, %v3192_v18 }
 0x21c   : > { %v3161_v43 = vmul.f32 %v3129_v17, %v6397_v63  ;;  %v3098_v22 = vmul.f32 0.044715, %v3034_v55  ;;  %v3066_v11 = vmul.f32 0.5, %v3034_v55 }
 0x21d   : > { %3488 = vst.msk [vmem:[%s5941_s13 + $0xc8] sm:$0xff] %vm315_vm0, %v3456_v28  ;;  %v3393_v7 = vadd.f32 %v6336_v48, %v3355_v54  ;;  %v3318_v0 = vmul.f32 %v3286_v42, %v3062_v1  ;;  %3778 = vtanh.f32 %v3224_v49 }
 0x21e   : > { %v3193_v50 = vadd.f32 %v3161_v43, %v6397_v63  ;;  %v3130_v12 = vmul.f32 %v3098_v22, %v3034_v55 }
 0x21f   : > { %v3457_v15 = vadd.f32 %v3425_v46, %v3393_v7  ;;  %v3356_v53 = vmul.f32 %v6320_v23, %v3318_v0 }
 0x220   : > { %v3225_v52 = vmul.f32 0.7978846, %v3193_v50  ;;  %v3162_v33 = vmul.f32 %v3130_v12, %v3034_v55 }
 0x221   : > { %3489 = vst.msk [vmem:[%s5941_s13 + $0xd0] sm:$0xff] %vm315_vm0, %v3457_v15  ;;  %v3394_v19 = vadd.f32 %v6336_v48, %v3356_v53 }
 0x222   : > { %3780 = vtanh.f32 %v3225_v52  ;;  %v3194_v13 = vadd.f32 %v3162_v33, %v3034_v55  ;;  %v3777_v4 = vpop.eup %3776 }
 0x223   : > { %v3458_v34 = vadd.f32 %v3426_v59, %v3394_v19  ;;  %v3287_v27 = vadd.f32 1.0, %v3777_v4 }
 0x224   : > { %v3226_v31 = vmul.f32 0.7978846, %v3194_v13 }
 0x225   : > { %3490 = vst.msk [vmem:[%s5941_s13 + $0xd8] sm:$0xff] %vm315_vm0, %v3458_v34  ;;  %v3319_v29 = vmul.f32 %v3287_v27, %v3063_v3 }
 0x226   : > { %3782 = vtanh.f32 %v3226_v31 }
 0x227   : > { %v3779_v62 = vpop.eup %3778  ;;  %v3357_v39 = vmul.f32 %v6320_v23, %v3319_v29 }
 0x228   : > { %v3288_v44 = vadd.f32 1.0, %v3779_v62 }
 0x229   : > { %v3395_v37 = vadd.f32 %v6336_v48, %v3357_v39 }
 0x22a   : > { %v3320_v57 = vmul.f32 %v3288_v44, %v3064_v10 }
 0x22b   : > { %v3459_v9 = vadd.f32 %v3427_v45, %v3395_v37 }
 0x22c   : > { %v3781_v40 = vpop.eup %3780  ;;  %v3358_v20 = vmul.f32 %v6320_v23, %v3320_v57 }
 0x22d   : > { %v3289_v61 = vadd.f32 1.0, %v3781_v40  ;;  %3491 = vst.msk [vmem:[%s5941_s13 + $0xe0] sm:$0xff] %vm315_vm0, %v3459_v9 }
 0x22e   : > { %v3396_v26 = vadd.f32 %v6336_v48, %v3358_v20 }
 0x22f   : > { %v3321_v51 = vmul.f32 %v3289_v61, %v3065_v58 }
 0x230   : > { %v3783_v41 = vpop.eup %3782  ;;  %v3460_v32 = vadd.f32 %v3428_v38, %v3396_v26 }
 0x231   : > { %v3359_v35 = vmul.f32 %v6320_v23, %v3321_v51  ;;  %v3290_v60 = vadd.f32 1.0, %v3783_v41 }
 0x232   : > { %3492 = vst.msk [vmem:[%s5941_s13 + $0xe8] sm:$0xff] %vm315_vm0, %v3460_v32 }
 0x233   : > { %v3397_v63 = vadd.f32 %v6336_v48, %v3359_v35  ;;  %v3322_v2 = vmul.f32 %v3290_v60, %v3066_v11 }
 0x235   : > { %v3461_v30 = vadd.f32 %v3429_v5, %v3397_v63  ;;  %v3360_v16 = vmul.f32 %v6320_v23, %v3322_v2 }
 0x237   : > { %3493 = vst.msk [vmem:[%s5941_s13 + $0xf0] sm:$0xff] %vm315_vm0, %v3461_v30  ;;  %v3398_v36 = vadd.f32 %v6336_v48, %v3360_v16 }
 0x239   : > { %v3462_v25 = vadd.f32 %v3430_v6, %v3398_v36 }
 0x23b   : > { %3494 = vst.msk [vmem:[%s5941_s13 + $0xf8] sm:$0xff] %vm315_vm0, %v3462_v25 }
 0x23c PF: > { %s15_s20 = sadd.s32 1, %s3886_s20   ;;  %s6621_s18 = smov %s3882_s19 }
 0x23d   : > { %p12_p5 = scmp.ge.s32.totalorder %s15_s20, 4   ;;  %s6622_s19 = smov %s6624_s21 }
 0x23f   :  { %14 = sbr.rel (!%p12_p5) target bundleno = 2 (0x2), region = 90 }

</bundles_post_ra>
